<compile_context>
chip_gen: v5e
topology: v5e:2x2
jax: 0.10.0
libtpu: 0.0.40
codegen_flags: <defaults>
</compile_context>

<pallas_src>
import functools

import jax
import jax.numpy as jnp
from jax.experimental import pallas as pl
from jax.experimental.pallas import tpu as pltpu

# ----------------------------- configuration --------------------------------
N = 2
IN_CHANNELS = 8
OUT_CHANNELS = 8          # == IN_CHANNELS, stride == 1 -> identity down branches
INTER_CHANNELS = 4
NUM_SUBSET = 3
NUM_FRAME = 16            # T
NUM_NODE = 16             # V
BN_EPS = 1e-5
LEAKY_SLOPE = 0.1


# ----------------------------- fused kernel ----------------------------------
def _st_attention_kernel(
    x_ref,
    w_in_s_ref, b_in_s_ref, w_out_s_ref, b_out_s_ref, w_ff_s_ref, b_ff_s_ref,
    w_in_t_ref, b_in_t_ref, w_out_t_ref, b_out_t_ref, w_ff_t_ref, b_ff_t_ref,
    a0s_ref, a0t_ref, alphas_ref, alphat_ref,
    o_ref,
    *, c, t, v, s, ci, neg_slope):
  """One grid step == one batch element.  All activations are (rows=(chan,frame), lanes=V)."""
  f32 = jnp.float32

  def leaky(z):
    return jnp.where(z >= 0, z, neg_slope * z)

  def mm(a, b):  # plain MXU matmul, f32 accumulate
    return jnp.dot(a, b, preferred_element_type=f32)

  x = x_ref[0]                                              # (C*T, V)
  k_off = s * ci * t                                        # row offset of the k half

  # ---------------- spatial attention ----------------
  # in_nets as kron(W, I_T):  qk[(c',t), v] = sum_c W[c',c] * x[(c,t), v] + b[c']
  qk = mm(w_in_s_ref[...], x) + b_in_s_ref[...]             # (2*S*Ci*T, V)
  inv_ds = 1.0 / float(ci * t)

  y_parts = []
  for si in range(s):                                       # unrolled, subsets in-kernel
    r0 = si * ci * t
    q_s = qk[r0:r0 + ci * t, :]                             # (Ci*T, V)
    k_s = qk[k_off + r0:k_off + r0 + ci * t, :]             # (Ci*T, V)
    # einsum 'nsctu,nsctv->nsuv' : contract over rows (c,t)
    logits = jax.lax.dot_general(q_s, k_s, (((0,), (0,)), ((), ())),
                                 preferred_element_type=f32)          # (V, V)[u, v]
    att = jnp.tanh(logits * inv_ds) * alphas_ref[si] + a0s_ref[si]
    # einsum 'nctu,nsuv->nsctv'
    y_parts.append(mm(x, att))                              # (C*T, V)
  y5 = jnp.concatenate(y_parts, axis=0)                     # (S*C*T, V), rows ((s,c),t)

  # out_nets (+BN folded) + residual x + LeakyReLU ; ff_nets (+BN) + residual x + LeakyReLU
  y = leaky(mm(w_out_s_ref[...], y5) + b_out_s_ref[...] + x)           # (C*T, V)
  y = leaky(mm(w_ff_s_ref[...], y) + b_ff_s_ref[...] + x)

  # ---------------- temporal attention ----------------
  qkt = mm(w_in_t_ref[...], y) + b_in_t_ref[...]            # (2*S*Ci*T, V)
  inv_dt = 1.0 / float(ci * v)

  z_parts = []
  for si in range(s):
    # einsum 'nsctv,nscqv->nstq' : accumulate per inter-channel, contract over V
    logits = jnp.zeros((t, t), f32)
    for cc in range(ci):
      r = (si * ci + cc) * t
      q_ct = qkt[r:r + t, :]                                # (T, V)
      k_ct = qkt[k_off + r:k_off + r + t, :]                # (T, V)
      logits = logits + jax.lax.dot_general(
          q_ct, k_ct, (((1,), (1,)), ((), ())),
          preferred_element_type=f32)                       # (T, T)[t, q]
    att = jnp.tanh(logits * inv_dt) * alphat_ref[si] + a0t_ref[si]     # (T, T)[t, q]
    # einsum 'nctv,nstq->nscqv' : per output channel, z5[(c,q),v] = sum_t att[t,q]*y[(c,t),v]
    sub_parts = []
    for cc in range(c):
      y_ct = y[cc * t:(cc + 1) * t, :]                      # (T, V)
      sub_parts.append(jax.lax.dot_general(
          att, y_ct, (((0,), (0,)), ((), ())),
          preferred_element_type=f32))                      # (T, V)[q, v]
    z_parts.append(jnp.concatenate(sub_parts, axis=0))      # (C*T, V)
  z5 = jnp.concatenate(z_parts, axis=0)                     # (S*C*T, V), rows ((s,c),q)

  z = leaky(mm(w_out_t_ref[...], z5) + b_out_t_ref[...] + y)
  z = leaky(mm(w_ff_t_ref[...], z) + b_ff_t_ref[...] + y)   # (C*T, V)

  o_ref[0] = z.astype(o_ref.dtype)


# ------------------------------- wrapper --------------------------------------
def st_attention_block(x, kp):
  n, c, t, v = x.shape
  s, ci = NUM_SUBSET, INTER_CHANNELS
  ct = c * t
  qrows = 2 * s * ci * t
  srows = s * c * t

  x_r = x.reshape(n, ct, v)                                 # metadata-only reshape

  kernel = functools.partial(_st_attention_kernel, c=c, t=t, v=v, s=s, ci=ci,
                             neg_slope=LEAKY_SLOPE)

  batch3 = lambda i: (i, 0, 0)
  const2 = lambda i: (0, 0)
  const3 = lambda i: (0, 0, 0)

  out = pl.pallas_call(
      kernel,
      out_shape=jax.ShapeDtypeStruct((n, ct, v), jnp.float32),
      grid_spec=pltpu.PrefetchScalarGridSpec(
          num_scalar_prefetch=0,
          grid=(n,),
          in_specs=[
              pl.BlockSpec((1, ct, v), batch3),             # x (row layout)
              pl.BlockSpec((qrows, ct), const2),            # in_nets  kron weight
              pl.BlockSpec((qrows, 1), const2),             # in_nets  bias
              pl.BlockSpec((ct, srows), const2),            # out_nets kron weight (BN folded)
              pl.BlockSpec((ct, 1), const2),                # out_nets shift
              pl.BlockSpec((ct, ct), const2),               # ff_nets  kron weight
              pl.BlockSpec((ct, 1), const2),                # ff_nets  shift
              pl.BlockSpec((qrows, ct), const2),            # in_nett
              pl.BlockSpec((qrows, 1), const2),
              pl.BlockSpec((ct, srows), const2),            # out_nett
              pl.BlockSpec((ct, 1), const2),
              pl.BlockSpec((ct, ct), const2),               # ff_nett
              pl.BlockSpec((ct, 1), const2),
              pl.BlockSpec((s, v, v), const3),              # attention0s
              pl.BlockSpec((s, t, t), const3),              # attention0t
              pl.BlockSpec(memory_space=pltpu.MemorySpace.SMEM),   # alphas
              pl.BlockSpec(memory_space=pltpu.MemorySpace.SMEM),   # alphat
          ],
          out_specs=pl.BlockSpec((1, ct, v), batch3),
      ),
      compiler_params=pltpu.CompilerParams(dimension_semantics=("parallel",)),
  )(x_r,
    kp["w_in_s"], kp["b_in_s"], kp["w_out_s"], kp["b_out_s"],
    kp["w_ff_s"], kp["b_ff_s"],
    kp["w_in_t"], kp["b_in_t"], kp["w_out_t"], kp["b_out_t"],
    kp["w_ff_t"], kp["b_ff_t"],
    kp["a0s"], kp["a0t"], kp["alphas"], kp["alphat"])

  return out.reshape(n, c, t, v)                            # metadata-only reshape


# ----------------------------- parameters ------------------------------------
def init_raw_params(key):
  """Torch-like parameters: conv weights (Cout, Cin), biases, eval-mode BN stats."""
  s, ci, c = NUM_SUBSET, INTER_CHANNELS, IN_CHANNELS
  t, v = NUM_FRAME, NUM_NODE
  keys = jax.random.split(key, 10)

  def conv_init(k, cout, cin):
    kw, kb = jax.random.split(k)
    w = 0.1 * jax.random.normal(kw, (cout, cin), jnp.float32)
    b = 0.05 * jax.random.normal(kb, (cout,), jnp.float32)
    return w, b

  def bn_init(k, ch):
    k1, k2, k3, k4 = jax.random.split(k, 4)
    gamma = 1.0 + 0.2 * jax.random.normal(k1, (ch,), jnp.float32)
    beta = 0.05 * jax.random.normal(k2, (ch,), jnp.float32)
    mean = 0.05 * jax.random.normal(k3, (ch,), jnp.float32)
    var = 0.8 + 0.4 * jax.random.uniform(k4, (ch,), jnp.float32)
    return gamma, beta, mean, var

  return {
      "in_nets": conv_init(keys[0], 2 * s * ci, c),
      "out_nets": conv_init(keys[1], c, s * c) + (bn_init(keys[2], c),),
      "ff_nets": conv_init(keys[3], c, c) + (bn_init(keys[4], c),),
      "in_nett": conv_init(keys[5], 2 * s * ci, c),
      "out_nett": conv_init(keys[6], c, s * c) + (bn_init(keys[7], c),),
      "ff_nett": conv_init(keys[8], c, c) + (bn_init(keys[9], c),),
      "alphas": jnp.ones((s,), jnp.float32),
      "alphat": jnp.ones((s,), jnp.float32),
      "attention0s": jnp.ones((s, v, v), jnp.float32) / v,
      "attention0t": jnp.broadcast_to(jnp.eye(t, dtype=jnp.float32), (s, t, t)),
  }


def prepare_kernel_params(raw):
  """Fold eval-mode BN into conv, expand 1x1 conv weights to kron(W, I_T) row layout."""
  t = NUM_FRAME
  eye_t = jnp.eye(t, dtype=jnp.float32)

  def fold(entry, has_bn):
    if has_bn:
      w, b, (gamma, beta, mean, var) = entry
      scale = gamma / jnp.sqrt(var + BN_EPS)
      shift = (b - mean) * scale + beta
      w = w * scale[:, None]
    else:
      w, b = entry
      shift = b
    w_kron = jnp.kron(w, eye_t)                # (Cout*T, Cin*T), rows/cols = (chan, frame)
    shift_r = jnp.repeat(shift, t)[:, None]    # (Cout*T, 1) -> lane-broadcast in kernel
    return w_kron, shift_r

  kp = {}
  kp["w_in_s"], kp["b_in_s"] = fold(raw["in_nets"], False)
  kp["w_out_s"], kp["b_out_s"] = fold(raw["out_nets"], True)
  kp["w_ff_s"], kp["b_ff_s"] = fold(raw["ff_nets"], True)
  kp["w_in_t"], kp["b_in_t"] = fold(raw["in_nett"], False)
  kp["w_out_t"], kp["b_out_t"] = fold(raw["out_nett"], True)
  kp["w_ff_t"], kp["b_ff_t"] = fold(raw["ff_nett"], True)
  kp["alphas"] = raw["alphas"]
  kp["alphat"] = raw["alphat"]
  kp["a0s"] = raw["attention0s"]
  kp["a0t"] = raw["attention0t"]
  return kp


# -------------------------- plain-JAX reference --------------------------------
def reference_forward(x, raw):
  """Direct transcription of the PyTorch forward (eval-mode BN), for validation."""
  n, c, t, v = x.shape
  s, ci = NUM_SUBSET, INTER_CHANNELS
  hp = jax.lax.Precision.HIGHEST

  def conv(inp, w, b):
    return jnp.einsum("oc,nctv->notv", w, inp, precision=hp) + b[None, :, None, None]

  def bn_eval(inp, bn):
    g, be, m, va = bn
    return (inp - m[None, :, None, None]) * (g / jnp.sqrt(va + BN_EPS))[None, :, None, None] \
        + be[None, :, None, None]

  def leaky(z):
    return jnp.where(z >= 0, z, LEAKY_SLOPE * z)

  # spatial
  w, b = raw["in_nets"]
  qk = conv(x, w, b).reshape(n, 2 * s, ci, t, v)
  q, k = qk[:, :s], qk[:, s:]
  att = jnp.tanh(jnp.einsum("nsctu,nsctv->nsuv", q, k, precision=hp) / (ci * t))
  att = att * raw["alphas"][None, :, None, None] + raw["attention0s"][None]
  y5 = jnp.einsum("nctu,nsuv->nsctv", x, att, precision=hp).reshape(n, s * c, t, v)
  w, b, bnp = raw["out_nets"]
  y = leaky(x + bn_eval(conv(y5, w, b), bnp))
  w, b, bnp = raw["ff_nets"]
  y = leaky(x + bn_eval(conv(y, w, b), bnp))

  # temporal
  w, b = raw["in_nett"]
  qk = conv(y, w, b).reshape(n, 2 * s, ci, t, v)
  q, k = qk[:, :s], qk[:, s:]
  att = jnp.tanh(jnp.einsum("nsctv,nscqv->nstq", q, k, precision=hp) / (ci * v))
  att = att * raw["alphat"][None, :, None, None] + raw["attention0t"][None]
  z5 = jnp.einsum("nctv,nstq->nscqv", y, att, precision=hp).reshape(n, s * c, t, v)
  w, b, bnp = raw["out_nett"]
  z = leaky(y + bn_eval(conv(z5, w, b), bnp))
  w, b, bnp = raw["ff_nett"]
  z = leaky(y + bn_eval(conv(z, w, b), bnp))
  return z


# --------------------------------- main ---------------------------------------
if __name__ == "__main__":
  key = jax.random.PRNGKey(0)
  k_param, k_x = jax.random.split(key)
  raw = init_raw_params(k_param)
  kparams = prepare_kernel_params(raw)
  x = jax.random.normal(k_x, (N, IN_CHANNELS, NUM_FRAME, NUM_NODE), jnp.float32)

  out = jax.jit(st_attention_block)(x, kparams)
  out = jax.block_until_ready(out)

  assert out.shape == (N, OUT_CHANNELS, NUM_FRAME, NUM_NODE), out.shape
  assert bool(jnp.all(jnp.isfinite(out)))

  ref = jax.block_until_ready(jax.jit(reference_forward)(x, raw))
  max_err = float(jnp.max(jnp.abs(out - ref)))
  assert max_err < 1e-2, f"mismatch vs plain-JAX reference: max abs err {max_err}"

  print("KERNEL_OK")
</pallas_src>

<mosaic_0001>
module attributes {stable_mosaic.version = 11 : i64} {
  func.func @_st_attention_kernel(%arg0: i32, %arg1: memref<1x128x16xf32, #tpu.memory_space<vmem>>, %arg2: memref<384x128xf32, #tpu.memory_space<vmem>>, %arg3: memref<384x1xf32, #tpu.memory_space<vmem>>, %arg4: memref<128x384xf32, #tpu.memory_space<vmem>>, %arg5: memref<128x1xf32, #tpu.memory_space<vmem>>, %arg6: memref<128x128xf32, #tpu.memory_space<vmem>>, %arg7: memref<128x1xf32, #tpu.memory_space<vmem>>, %arg8: memref<384x128xf32, #tpu.memory_space<vmem>>, %arg9: memref<384x1xf32, #tpu.memory_space<vmem>>, %arg10: memref<128x384xf32, #tpu.memory_space<vmem>>, %arg11: memref<128x1xf32, #tpu.memory_space<vmem>>, %arg12: memref<128x128xf32, #tpu.memory_space<vmem>>, %arg13: memref<128x1xf32, #tpu.memory_space<vmem>>, %arg14: memref<3x16x16xf32, #tpu.memory_space<vmem>>, %arg15: memref<3x16x16xf32, #tpu.memory_space<vmem>>, %arg16: memref<3xf32, #tpu.memory_space<smem>>, %arg17: memref<3xf32, #tpu.memory_space<smem>>, %arg18: memref<1x128x16xf32, #tpu.memory_space<vmem>>) attributes {dimension_semantics = [#tpu.dimension_semantics<parallel>], iteration_bounds = array<i64: 2>, scalar_prefetch = 0 : i64, scratch_operands = 0 : i64, tpu.core_type = #tpu.core_type<tc>, window_params = [{transform_indices = @transform_0, window_bounds = array<i64: 1, 128, 16>}, {pipeline_mode = #tpu.pipeline_mode<synchronous>, transform_indices = @transform_1, window_bounds = array<i64: 384, 128>}, {pipeline_mode = #tpu.pipeline_mode<synchronous>, transform_indices = @transform_2, window_bounds = array<i64: 384, 1>}, {pipeline_mode = #tpu.pipeline_mode<synchronous>, transform_indices = @transform_3, window_bounds = array<i64: 128, 384>}, {pipeline_mode = #tpu.pipeline_mode<synchronous>, transform_indices = @transform_4, window_bounds = array<i64: 128, 1>}, {pipeline_mode = #tpu.pipeline_mode<synchronous>, transform_indices = @transform_5, window_bounds = array<i64: 128, 128>}, {pipeline_mode = #tpu.pipeline_mode<synchronous>, transform_indices = @transform_6, window_bounds = array<i64: 128, 1>}, {pipeline_mode = #tpu.pipeline_mode<synchronous>, transform_indices = @transform_7, window_bounds = array<i64: 384, 128>}, {pipeline_mode = #tpu.pipeline_mode<synchronous>, transform_indices = @transform_8, window_bounds = array<i64: 384, 1>}, {pipeline_mode = #tpu.pipeline_mode<synchronous>, transform_indices = @transform_9, window_bounds = array<i64: 128, 384>}, {pipeline_mode = #tpu.pipeline_mode<synchronous>, transform_indices = @transform_10, window_bounds = array<i64: 128, 1>}, {pipeline_mode = #tpu.pipeline_mode<synchronous>, transform_indices = @transform_11, window_bounds = array<i64: 128, 128>}, {pipeline_mode = #tpu.pipeline_mode<synchronous>, transform_indices = @transform_12, window_bounds = array<i64: 128, 1>}, {pipeline_mode = #tpu.pipeline_mode<synchronous>, transform_indices = @transform_13, window_bounds = array<i64: 3, 16, 16>}, {pipeline_mode = #tpu.pipeline_mode<synchronous>, transform_indices = @transform_14, window_bounds = array<i64: 3, 16, 16>}, {transform_indices = @transform_15, window_bounds = array<i64: 3>}, {transform_indices = @transform_16, window_bounds = array<i64: 3>}, {transform_indices = @transform_17, window_bounds = array<i64: 1, 128, 16>}]} {
    %c0 = arith.constant 0 : index
    %c0_0 = arith.constant 0 : index
    %c0_1 = arith.constant 0 : index
    %0 = vector.load %arg1[%c0, %c0_0, %c0_1] : memref<1x128x16xf32, #tpu.memory_space<vmem>>, vector<1x128x16xf32>
    %1 = vector.shape_cast %0 : vector<1x128x16xf32> to vector<128x16xf32>
    %c0_2 = arith.constant 0 : index
    %c0_3 = arith.constant 0 : index
    %2 = vector.load %arg2[%c0_2, %c0_3] : memref<384x128xf32, #tpu.memory_space<vmem>>, vector<384x128xf32>
    %cst = arith.constant dense<0.000000e+00> : vector<384x16xf32>
    %3 = tpu.matmul %2, %1, %cst {dimension_numbers = #tpu.dot_dimension_numbers<[1], [0], [0], [1], [0, 0, 1, 1], [], []>} : vector<384x128xf32>, vector<128x16xf32>, vector<384x16xf32> -> vector<384x16xf32>
    %c0_4 = arith.constant 0 : index
    %c0_5 = arith.constant 0 : index
    %4 = vector.load %arg3[%c0_4, %c0_5] : memref<384x1xf32, #tpu.memory_space<vmem>>, vector<384x1xf32>
    %5 = vector.broadcast %4 : vector<384x1xf32> to vector<384x16xf32>
    %6 = arith.addf %3, %5 : vector<384x16xf32>
    %7 = vector.extract_strided_slice %6 {offsets = [0, 0], sizes = [64, 16], strides = [1, 1]} : vector<384x16xf32> to vector<64x16xf32>
    %8 = vector.extract_strided_slice %6 {offsets = [192, 0], sizes = [64, 16], strides = [1, 1]} : vector<384x16xf32> to vector<64x16xf32>
    %cst_6 = arith.constant dense<0.000000e+00> : vector<16x16xf32>
    %9 = tpu.matmul %7, %8, %cst_6 {dimension_numbers = #tpu.dot_dimension_numbers<[0], [0], [1], [1], [0, 1, 1, 1], [], []>} : vector<64x16xf32>, vector<64x16xf32>, vector<16x16xf32> -> vector<16x16xf32>
    %cst_7 = arith.constant 1.562500e-02 : f32
    %10 = vector.broadcast %cst_7 : f32 to vector<16x16xf32>
    %11 = arith.mulf %9, %10 : vector<16x16xf32>
    %12 = math.tanh %11 : vector<16x16xf32>
    %c0_8 = arith.constant 0 : index
    %13 = memref.load %arg16[%c0_8] : memref<3xf32, #tpu.memory_space<smem>>
    %14 = vector.broadcast %13 : f32 to vector<16x16xf32>
    %15 = arith.mulf %12, %14 : vector<16x16xf32>
    %c0_9 = arith.constant 0 : index
    %c0_10 = arith.constant 0 : index
    %c0_11 = arith.constant 0 : index
    %16 = vector.load %arg14[%c0_9, %c0_10, %c0_11] : memref<3x16x16xf32, #tpu.memory_space<vmem>>, vector<1x16x16xf32>
    %17 = vector.shape_cast %16 : vector<1x16x16xf32> to vector<16x16xf32>
    %18 = arith.addf %15, %17 : vector<16x16xf32>
    %cst_12 = arith.constant dense<0.000000e+00> : vector<128x16xf32>
    %19 = tpu.matmul %1, %18, %cst_12 {dimension_numbers = #tpu.dot_dimension_numbers<[1], [0], [0], [1], [0, 0, 1, 1], [], []>} : vector<128x16xf32>, vector<16x16xf32>, vector<128x16xf32> -> vector<128x16xf32>
    %20 = vector.extract_strided_slice %6 {offsets = [64, 0], sizes = [64, 16], strides = [1, 1]} : vector<384x16xf32> to vector<64x16xf32>
    %21 = vector.extract_strided_slice %6 {offsets = [256, 0], sizes = [64, 16], strides = [1, 1]} : vector<384x16xf32> to vector<64x16xf32>
    %cst_13 = arith.constant dense<0.000000e+00> : vector<16x16xf32>
    %22 = tpu.matmul %20, %21, %cst_13 {dimension_numbers = #tpu.dot_dimension_numbers<[0], [0], [1], [1], [0, 1, 1, 1], [], []>} : vector<64x16xf32>, vector<64x16xf32>, vector<16x16xf32> -> vector<16x16xf32>
    %cst_14 = arith.constant 1.562500e-02 : f32
    %23 = vector.broadcast %cst_14 : f32 to vector<16x16xf32>
    %24 = arith.mulf %22, %23 : vector<16x16xf32>
    %25 = math.tanh %24 : vector<16x16xf32>
    %c1 = arith.constant 1 : index
    %26 = memref.load %arg16[%c1] : memref<3xf32, #tpu.memory_space<smem>>
    %27 = vector.broadcast %26 : f32 to vector<16x16xf32>
    %28 = arith.mulf %25, %27 : vector<16x16xf32>
    %c1_15 = arith.constant 1 : index
    %c0_16 = arith.constant 0 : index
    %c0_17 = arith.constant 0 : index
    %29 = vector.load %arg14[%c1_15, %c0_16, %c0_17] : memref<3x16x16xf32, #tpu.memory_space<vmem>>, vector<1x16x16xf32>
    %30 = vector.shape_cast %29 : vector<1x16x16xf32> to vector<16x16xf32>
    %31 = arith.addf %28, %30 : vector<16x16xf32>
    %cst_18 = arith.constant dense<0.000000e+00> : vector<128x16xf32>
    %32 = tpu.matmul %1, %31, %cst_18 {dimension_numbers = #tpu.dot_dimension_numbers<[1], [0], [0], [1], [0, 0, 1, 1], [], []>} : vector<128x16xf32>, vector<16x16xf32>, vector<128x16xf32> -> vector<128x16xf32>
    %33 = vector.extract_strided_slice %6 {offsets = [128, 0], sizes = [64, 16], strides = [1, 1]} : vector<384x16xf32> to vector<64x16xf32>
    %34 = vector.extract_strided_slice %6 {offsets = [320, 0], sizes = [64, 16], strides = [1, 1]} : vector<384x16xf32> to vector<64x16xf32>
    %cst_19 = arith.constant dense<0.000000e+00> : vector<16x16xf32>
    %35 = tpu.matmul %33, %34, %cst_19 {dimension_numbers = #tpu.dot_dimension_numbers<[0], [0], [1], [1], [0, 1, 1, 1], [], []>} : vector<64x16xf32>, vector<64x16xf32>, vector<16x16xf32> -> vector<16x16xf32>
    %cst_20 = arith.constant 1.562500e-02 : f32
    %36 = vector.broadcast %cst_20 : f32 to vector<16x16xf32>
    %37 = arith.mulf %35, %36 : vector<16x16xf32>
    %38 = math.tanh %37 : vector<16x16xf32>
    %c2 = arith.constant 2 : index
    %39 = memref.load %arg16[%c2] : memref<3xf32, #tpu.memory_space<smem>>
    %40 = vector.broadcast %39 : f32 to vector<16x16xf32>
    %41 = arith.mulf %38, %40 : vector<16x16xf32>
    %c2_21 = arith.constant 2 : index
    %c0_22 = arith.constant 0 : index
    %c0_23 = arith.constant 0 : index
    %42 = vector.load %arg14[%c2_21, %c0_22, %c0_23] : memref<3x16x16xf32, #tpu.memory_space<vmem>>, vector<1x16x16xf32>
    %43 = vector.shape_cast %42 : vector<1x16x16xf32> to vector<16x16xf32>
    %44 = arith.addf %41, %43 : vector<16x16xf32>
    %cst_24 = arith.constant dense<0.000000e+00> : vector<128x16xf32>
    %45 = tpu.matmul %1, %44, %cst_24 {dimension_numbers = #tpu.dot_dimension_numbers<[1], [0], [0], [1], [0, 0, 1, 1], [], []>} : vector<128x16xf32>, vector<16x16xf32>, vector<128x16xf32> -> vector<128x16xf32>
    %46 = tpu.concatenate %19, %32, %45 in 0 : vector<128x16xf32>, vector<128x16xf32>, vector<128x16xf32> -> vector<384x16xf32>
    %c0_25 = arith.constant 0 : index
    %c0_26 = arith.constant 0 : index
    %47 = vector.load %arg4[%c0_25, %c0_26] : memref<128x384xf32, #tpu.memory_space<vmem>>, vector<128x384xf32>
    %cst_27 = arith.constant dense<0.000000e+00> : vector<128x16xf32>
    %48 = tpu.matmul %47, %46, %cst_27 {dimension_numbers = #tpu.dot_dimension_numbers<[1], [0], [0], [1], [0, 0, 1, 1], [], []>} : vector<128x384xf32>, vector<384x16xf32>, vector<128x16xf32> -> vector<128x16xf32>
    %c0_28 = arith.constant 0 : index
    %c0_29 = arith.constant 0 : index
    %49 = vector.load %arg5[%c0_28, %c0_29] : memref<128x1xf32, #tpu.memory_space<vmem>>, vector<128x1xf32>
    %50 = vector.broadcast %49 : vector<128x1xf32> to vector<128x16xf32>
    %51 = arith.addf %48, %50 : vector<128x16xf32>
    %52 = arith.addf %51, %1 : vector<128x16xf32>
    %cst_30 = arith.constant 0.000000e+00 : f32
    %53 = vector.broadcast %cst_30 : f32 to vector<128x16xf32>
    %54 = arith.cmpf oge, %52, %53 : vector<128x16xf32>
    %cst_31 = arith.constant 1.000000e-01 : f32
    %55 = vector.broadcast %cst_31 : f32 to vector<128x16xf32>
    %56 = arith.mulf %55, %52 : vector<128x16xf32>
    %57 = arith.select %54, %52, %56 : vector<128x16xi1>, vector<128x16xf32>
    %c0_32 = arith.constant 0 : index
    %c0_33 = arith.constant 0 : index
    %58 = vector.load %arg6[%c0_32, %c0_33] : memref<128x128xf32, #tpu.memory_space<vmem>>, vector<128x128xf32>
    %cst_34 = arith.constant dense<0.000000e+00> : vector<128x16xf32>
    %59 = tpu.matmul %58, %57, %cst_34 {dimension_numbers = #tpu.dot_dimension_numbers<[1], [0], [0], [1], [0, 0, 1, 1], [], []>} : vector<128x128xf32>, vector<128x16xf32>, vector<128x16xf32> -> vector<128x16xf32>
    %c0_35 = arith.constant 0 : index
    %c0_36 = arith.constant 0 : index
    %60 = vector.load %arg7[%c0_35, %c0_36] : memref<128x1xf32, #tpu.memory_space<vmem>>, vector<128x1xf32>
    %61 = vector.broadcast %60 : vector<128x1xf32> to vector<128x16xf32>
    %62 = arith.addf %59, %61 : vector<128x16xf32>
    %63 = arith.addf %62, %1 : vector<128x16xf32>
    %cst_37 = arith.constant 0.000000e+00 : f32
    %64 = vector.broadcast %cst_37 : f32 to vector<128x16xf32>
    %65 = arith.cmpf oge, %63, %64 : vector<128x16xf32>
    %cst_38 = arith.constant 1.000000e-01 : f32
    %66 = vector.broadcast %cst_38 : f32 to vector<128x16xf32>
    %67 = arith.mulf %66, %63 : vector<128x16xf32>
    %68 = arith.select %65, %63, %67 : vector<128x16xi1>, vector<128x16xf32>
    %c0_39 = arith.constant 0 : index
    %c0_40 = arith.constant 0 : index
    %69 = vector.load %arg8[%c0_39, %c0_40] : memref<384x128xf32, #tpu.memory_space<vmem>>, vector<384x128xf32>
    %cst_41 = arith.constant dense<0.000000e+00> : vector<384x16xf32>
    %70 = tpu.matmul %69, %68, %cst_41 {dimension_numbers = #tpu.dot_dimension_numbers<[1], [0], [0], [1], [0, 0, 1, 1], [], []>} : vector<384x128xf32>, vector<128x16xf32>, vector<384x16xf32> -> vector<384x16xf32>
    %c0_42 = arith.constant 0 : index
    %c0_43 = arith.constant 0 : index
    %71 = vector.load %arg9[%c0_42, %c0_43] : memref<384x1xf32, #tpu.memory_space<vmem>>, vector<384x1xf32>
    %72 = vector.broadcast %71 : vector<384x1xf32> to vector<384x16xf32>
    %73 = arith.addf %70, %72 : vector<384x16xf32>
    %cst_44 = arith.constant 0.000000e+00 : f32
    %74 = vector.broadcast %cst_44 : f32 to vector<16x16xf32>
    %75 = vector.extract_strided_slice %73 {offsets = [0, 0], sizes = [16, 16], strides = [1, 1]} : vector<384x16xf32> to vector<16x16xf32>
    %76 = vector.extract_strided_slice %73 {offsets = [192, 0], sizes = [16, 16], strides = [1, 1]} : vector<384x16xf32> to vector<16x16xf32>
    %cst_45 = arith.constant dense<0.000000e+00> : vector<16x16xf32>
    %77 = tpu.matmul %75, %76, %cst_45 {dimension_numbers = #tpu.dot_dimension_numbers<[1], [1], [0], [0], [0, 0, 1, 0], [], []>} : vector<16x16xf32>, vector<16x16xf32>, vector<16x16xf32> -> vector<16x16xf32>
    %78 = arith.addf %74, %77 : vector<16x16xf32>
    %79 = vector.extract_strided_slice %73 {offsets = [16, 0], sizes = [16, 16], strides = [1, 1]} : vector<384x16xf32> to vector<16x16xf32>
    %80 = vector.extract_strided_slice %73 {offsets = [208, 0], sizes = [16, 16], strides = [1, 1]} : vector<384x16xf32> to vector<16x16xf32>
    %cst_46 = arith.constant dense<0.000000e+00> : vector<16x16xf32>
    %81 = tpu.matmul %79, %80, %cst_46 {dimension_numbers = #tpu.dot_dimension_numbers<[1], [1], [0], [0], [0, 0, 1, 0], [], []>} : vector<16x16xf32>, vector<16x16xf32>, vector<16x16xf32> -> vector<16x16xf32>
    %82 = arith.addf %78, %81 : vector<16x16xf32>
    %83 = vector.extract_strided_slice %73 {offsets = [32, 0], sizes = [16, 16], strides = [1, 1]} : vector<384x16xf32> to vector<16x16xf32>
    %84 = vector.extract_strided_slice %73 {offsets = [224, 0], sizes = [16, 16], strides = [1, 1]} : vector<384x16xf32> to vector<16x16xf32>
    %cst_47 = arith.constant dense<0.000000e+00> : vector<16x16xf32>
    %85 = tpu.matmul %83, %84, %cst_47 {dimension_numbers = #tpu.dot_dimension_numbers<[1], [1], [0], [0], [0, 0, 1, 0], [], []>} : vector<16x16xf32>, vector<16x16xf32>, vector<16x16xf32> -> vector<16x16xf32>
    %86 = arith.addf %82, %85 : vector<16x16xf32>
    %87 = vector.extract_strided_slice %73 {offsets = [48, 0], sizes = [16, 16], strides = [1, 1]} : vector<384x16xf32> to vector<16x16xf32>
    %88 = vector.extract_strided_slice %73 {offsets = [240, 0], sizes = [16, 16], strides = [1, 1]} : vector<384x16xf32> to vector<16x16xf32>
    %cst_48 = arith.constant dense<0.000000e+00> : vector<16x16xf32>
    %89 = tpu.matmul %87, %88, %cst_48 {dimension_numbers = #tpu.dot_dimension_numbers<[1], [1], [0], [0], [0, 0, 1, 0], [], []>} : vector<16x16xf32>, vector<16x16xf32>, vector<16x16xf32> -> vector<16x16xf32>
    %90 = arith.addf %86, %89 : vector<16x16xf32>
    %cst_49 = arith.constant 1.562500e-02 : f32
    %91 = vector.broadcast %cst_49 : f32 to vector<16x16xf32>
    %92 = arith.mulf %90, %91 : vector<16x16xf32>
    %93 = math.tanh %92 : vector<16x16xf32>
    %c0_50 = arith.constant 0 : index
    %94 = memref.load %arg17[%c0_50] : memref<3xf32, #tpu.memory_space<smem>>
    %95 = vector.broadcast %94 : f32 to vector<16x16xf32>
    %96 = arith.mulf %93, %95 : vector<16x16xf32>
    %c0_51 = arith.constant 0 : index
    %c0_52 = arith.constant 0 : index
    %c0_53 = arith.constant 0 : index
    %97 = vector.load %arg15[%c0_51, %c0_52, %c0_53] : memref<3x16x16xf32, #tpu.memory_space<vmem>>, vector<1x16x16xf32>
    %98 = vector.shape_cast %97 : vector<1x16x16xf32> to vector<16x16xf32>
    %99 = arith.addf %96, %98 : vector<16x16xf32>
    %100 = vector.extract_strided_slice %68 {offsets = [0, 0], sizes = [16, 16], strides = [1, 1]} : vector<128x16xf32> to vector<16x16xf32>
    %cst_54 = arith.constant dense<0.000000e+00> : vector<16x16xf32>
    %101 = tpu.matmul %99, %100, %cst_54 {dimension_numbers = #tpu.dot_dimension_numbers<[0], [0], [1], [1], [0, 1, 1, 1], [], []>} : vector<16x16xf32>, vector<16x16xf32>, vector<16x16xf32> -> vector<16x16xf32>
    %102 = vector.extract_strided_slice %68 {offsets = [16, 0], sizes = [16, 16], strides = [1, 1]} : vector<128x16xf32> to vector<16x16xf32>
    %cst_55 = arith.constant dense<0.000000e+00> : vector<16x16xf32>
    %103 = tpu.matmul %99, %102, %cst_55 {dimension_numbers = #tpu.dot_dimension_numbers<[0], [0], [1], [1], [0, 1, 1, 1], [], []>} : vector<16x16xf32>, vector<16x16xf32>, vector<16x16xf32> -> vector<16x16xf32>
    %104 = vector.extract_strided_slice %68 {offsets = [32, 0], sizes = [16, 16], strides = [1, 1]} : vector<128x16xf32> to vector<16x16xf32>
    %cst_56 = arith.constant dense<0.000000e+00> : vector<16x16xf32>
    %105 = tpu.matmul %99, %104, %cst_56 {dimension_numbers = #tpu.dot_dimension_numbers<[0], [0], [1], [1], [0, 1, 1, 1], [], []>} : vector<16x16xf32>, vector<16x16xf32>, vector<16x16xf32> -> vector<16x16xf32>
    %106 = vector.extract_strided_slice %68 {offsets = [48, 0], sizes = [16, 16], strides = [1, 1]} : vector<128x16xf32> to vector<16x16xf32>
    %cst_57 = arith.constant dense<0.000000e+00> : vector<16x16xf32>
    %107 = tpu.matmul %99, %106, %cst_57 {dimension_numbers = #tpu.dot_dimension_numbers<[0], [0], [1], [1], [0, 1, 1, 1], [], []>} : vector<16x16xf32>, vector<16x16xf32>, vector<16x16xf32> -> vector<16x16xf32>
    %108 = vector.extract_strided_slice %68 {offsets = [64, 0], sizes = [16, 16], strides = [1, 1]} : vector<128x16xf32> to vector<16x16xf32>
    %cst_58 = arith.constant dense<0.000000e+00> : vector<16x16xf32>
    %109 = tpu.matmul %99, %108, %cst_58 {dimension_numbers = #tpu.dot_dimension_numbers<[0], [0], [1], [1], [0, 1, 1, 1], [], []>} : vector<16x16xf32>, vector<16x16xf32>, vector<16x16xf32> -> vector<16x16xf32>
    %110 = vector.extract_strided_slice %68 {offsets = [80, 0], sizes = [16, 16], strides = [1, 1]} : vector<128x16xf32> to vector<16x16xf32>
    %cst_59 = arith.constant dense<0.000000e+00> : vector<16x16xf32>
    %111 = tpu.matmul %99, %110, %cst_59 {dimension_numbers = #tpu.dot_dimension_numbers<[0], [0], [1], [1], [0, 1, 1, 1], [], []>} : vector<16x16xf32>, vector<16x16xf32>, vector<16x16xf32> -> vector<16x16xf32>
    %112 = vector.extract_strided_slice %68 {offsets = [96, 0], sizes = [16, 16], strides = [1, 1]} : vector<128x16xf32> to vector<16x16xf32>
    %cst_60 = arith.constant dense<0.000000e+00> : vector<16x16xf32>
    %113 = tpu.matmul %99, %112, %cst_60 {dimension_numbers = #tpu.dot_dimension_numbers<[0], [0], [1], [1], [0, 1, 1, 1], [], []>} : vector<16x16xf32>, vector<16x16xf32>, vector<16x16xf32> -> vector<16x16xf32>
    %114 = vector.extract_strided_slice %68 {offsets = [112, 0], sizes = [16, 16], strides = [1, 1]} : vector<128x16xf32> to vector<16x16xf32>
    %cst_61 = arith.constant dense<0.000000e+00> : vector<16x16xf32>
    %115 = tpu.matmul %99, %114, %cst_61 {dimension_numbers = #tpu.dot_dimension_numbers<[0], [0], [1], [1], [0, 1, 1, 1], [], []>} : vector<16x16xf32>, vector<16x16xf32>, vector<16x16xf32> -> vector<16x16xf32>
    %116 = tpu.concatenate %101, %103, %105, %107, %109, %111, %113, %115 in 0 : vector<16x16xf32>, vector<16x16xf32>, vector<16x16xf32>, vector<16x16xf32>, vector<16x16xf32>, vector<16x16xf32>, vector<16x16xf32>, vector<16x16xf32> -> vector<128x16xf32>
    %cst_62 = arith.constant 0.000000e+00 : f32
    %117 = vector.broadcast %cst_62 : f32 to vector<16x16xf32>
    %118 = vector.extract_strided_slice %73 {offsets = [64, 0], sizes = [16, 16], strides = [1, 1]} : vector<384x16xf32> to vector<16x16xf32>
    %119 = vector.extract_strided_slice %73 {offsets = [256, 0], sizes = [16, 16], strides = [1, 1]} : vector<384x16xf32> to vector<16x16xf32>
    %cst_63 = arith.constant dense<0.000000e+00> : vector<16x16xf32>
    %120 = tpu.matmul %118, %119, %cst_63 {dimension_numbers = #tpu.dot_dimension_numbers<[1], [1], [0], [0], [0, 0, 1, 0], [], []>} : vector<16x16xf32>, vector<16x16xf32>, vector<16x16xf32> -> vector<16x16xf32>
    %121 = arith.addf %117, %120 : vector<16x16xf32>
    %122 = vector.extract_strided_slice %73 {offsets = [80, 0], sizes = [16, 16], strides = [1, 1]} : vector<384x16xf32> to vector<16x16xf32>
    %123 = vector.extract_strided_slice %73 {offsets = [272, 0], sizes = [16, 16], strides = [1, 1]} : vector<384x16xf32> to vector<16x16xf32>
    %cst_64 = arith.constant dense<0.000000e+00> : vector<16x16xf32>
    %124 = tpu.matmul %122, %123, %cst_64 {dimension_numbers = #tpu.dot_dimension_numbers<[1], [1], [0], [0], [0, 0, 1, 0], [], []>} : vector<16x16xf32>, vector<16x16xf32>, vector<16x16xf32> -> vector<16x16xf32>
    %125 = arith.addf %121, %124 : vector<16x16xf32>
    %126 = vector.extract_strided_slice %73 {offsets = [96, 0], sizes = [16, 16], strides = [1, 1]} : vector<384x16xf32> to vector<16x16xf32>
    %127 = vector.extract_strided_slice %73 {offsets = [288, 0], sizes = [16, 16], strides = [1, 1]} : vector<384x16xf32> to vector<16x16xf32>
    %cst_65 = arith.constant dense<0.000000e+00> : vector<16x16xf32>
    %128 = tpu.matmul %126, %127, %cst_65 {dimension_numbers = #tpu.dot_dimension_numbers<[1], [1], [0], [0], [0, 0, 1, 0], [], []>} : vector<16x16xf32>, vector<16x16xf32>, vector<16x16xf32> -> vector<16x16xf32>
    %129 = arith.addf %125, %128 : vector<16x16xf32>
    %130 = vector.extract_strided_slice %73 {offsets = [112, 0], sizes = [16, 16], strides = [1, 1]} : vector<384x16xf32> to vector<16x16xf32>
    %131 = vector.extract_strided_slice %73 {offsets = [304, 0], sizes = [16, 16], strides = [1, 1]} : vector<384x16xf32> to vector<16x16xf32>
    %cst_66 = arith.constant dense<0.000000e+00> : vector<16x16xf32>
    %132 = tpu.matmul %130, %131, %cst_66 {dimension_numbers = #tpu.dot_dimension_numbers<[1], [1], [0], [0], [0, 0, 1, 0], [], []>} : vector<16x16xf32>, vector<16x16xf32>, vector<16x16xf32> -> vector<16x16xf32>
    %133 = arith.addf %129, %132 : vector<16x16xf32>
    %cst_67 = arith.constant 1.562500e-02 : f32
    %134 = vector.broadcast %cst_67 : f32 to vector<16x16xf32>
    %135 = arith.mulf %133, %134 : vector<16x16xf32>
    %136 = math.tanh %135 : vector<16x16xf32>
    %c1_68 = arith.constant 1 : index
    %137 = memref.load %arg17[%c1_68] : memref<3xf32, #tpu.memory_space<smem>>
    %138 = vector.broadcast %137 : f32 to vector<16x16xf32>
    %139 = arith.mulf %136, %138 : vector<16x16xf32>
    %c1_69 = arith.constant 1 : index
    %c0_70 = arith.constant 0 : index
    %c0_71 = arith.constant 0 : index
    %140 = vector.load %arg15[%c1_69, %c0_70, %c0_71] : memref<3x16x16xf32, #tpu.memory_space<vmem>>, vector<1x16x16xf32>
    %141 = vector.shape_cast %140 : vector<1x16x16xf32> to vector<16x16xf32>
    %142 = arith.addf %139, %141 : vector<16x16xf32>
    %143 = vector.extract_strided_slice %68 {offsets = [0, 0], sizes = [16, 16], strides = [1, 1]} : vector<128x16xf32> to vector<16x16xf32>
    %cst_72 = arith.constant dense<0.000000e+00> : vector<16x16xf32>
    %144 = tpu.matmul %142, %143, %cst_72 {dimension_numbers = #tpu.dot_dimension_numbers<[0], [0], [1], [1], [0, 1, 1, 1], [], []>} : vector<16x16xf32>, vector<16x16xf32>, vector<16x16xf32> -> vector<16x16xf32>
    %145 = vector.extract_strided_slice %68 {offsets = [16, 0], sizes = [16, 16], strides = [1, 1]} : vector<128x16xf32> to vector<16x16xf32>
    %cst_73 = arith.constant dense<0.000000e+00> : vector<16x16xf32>
    %146 = tpu.matmul %142, %145, %cst_73 {dimension_numbers = #tpu.dot_dimension_numbers<[0], [0], [1], [1], [0, 1, 1, 1], [], []>} : vector<16x16xf32>, vector<16x16xf32>, vector<16x16xf32> -> vector<16x16xf32>
    %147 = vector.extract_strided_slice %68 {offsets = [32, 0], sizes = [16, 16], strides = [1, 1]} : vector<128x16xf32> to vector<16x16xf32>
    %cst_74 = arith.constant dense<0.000000e+00> : vector<16x16xf32>
    %148 = tpu.matmul %142, %147, %cst_74 {dimension_numbers = #tpu.dot_dimension_numbers<[0], [0], [1], [1], [0, 1, 1, 1], [], []>} : vector<16x16xf32>, vector<16x16xf32>, vector<16x16xf32> -> vector<16x16xf32>
    %149 = vector.extract_strided_slice %68 {offsets = [48, 0], sizes = [16, 16], strides = [1, 1]} : vector<128x16xf32> to vector<16x16xf32>
    %cst_75 = arith.constant dense<0.000000e+00> : vector<16x16xf32>
    %150 = tpu.matmul %142, %149, %cst_75 {dimension_numbers = #tpu.dot_dimension_numbers<[0], [0], [1], [1], [0, 1, 1, 1], [], []>} : vector<16x16xf32>, vector<16x16xf32>, vector<16x16xf32> -> vector<16x16xf32>
    %151 = vector.extract_strided_slice %68 {offsets = [64, 0], sizes = [16, 16], strides = [1, 1]} : vector<128x16xf32> to vector<16x16xf32>
    %cst_76 = arith.constant dense<0.000000e+00> : vector<16x16xf32>
    %152 = tpu.matmul %142, %151, %cst_76 {dimension_numbers = #tpu.dot_dimension_numbers<[0], [0], [1], [1], [0, 1, 1, 1], [], []>} : vector<16x16xf32>, vector<16x16xf32>, vector<16x16xf32> -> vector<16x16xf32>
    %153 = vector.extract_strided_slice %68 {offsets = [80, 0], sizes = [16, 16], strides = [1, 1]} : vector<128x16xf32> to vector<16x16xf32>
    %cst_77 = arith.constant dense<0.000000e+00> : vector<16x16xf32>
    %154 = tpu.matmul %142, %153, %cst_77 {dimension_numbers = #tpu.dot_dimension_numbers<[0], [0], [1], [1], [0, 1, 1, 1], [], []>} : vector<16x16xf32>, vector<16x16xf32>, vector<16x16xf32> -> vector<16x16xf32>
    %155 = vector.extract_strided_slice %68 {offsets = [96, 0], sizes = [16, 16], strides = [1, 1]} : vector<128x16xf32> to vector<16x16xf32>
    %cst_78 = arith.constant dense<0.000000e+00> : vector<16x16xf32>
    %156 = tpu.matmul %142, %155, %cst_78 {dimension_numbers = #tpu.dot_dimension_numbers<[0], [0], [1], [1], [0, 1, 1, 1], [], []>} : vector<16x16xf32>, vector<16x16xf32>, vector<16x16xf32> -> vector<16x16xf32>
    %157 = vector.extract_strided_slice %68 {offsets = [112, 0], sizes = [16, 16], strides = [1, 1]} : vector<128x16xf32> to vector<16x16xf32>
    %cst_79 = arith.constant dense<0.000000e+00> : vector<16x16xf32>
    %158 = tpu.matmul %142, %157, %cst_79 {dimension_numbers = #tpu.dot_dimension_numbers<[0], [0], [1], [1], [0, 1, 1, 1], [], []>} : vector<16x16xf32>, vector<16x16xf32>, vector<16x16xf32> -> vector<16x16xf32>
    %159 = tpu.concatenate %144, %146, %148, %150, %152, %154, %156, %158 in 0 : vector<16x16xf32>, vector<16x16xf32>, vector<16x16xf32>, vector<16x16xf32>, vector<16x16xf32>, vector<16x16xf32>, vector<16x16xf32>, vector<16x16xf32> -> vector<128x16xf32>
    %cst_80 = arith.constant 0.000000e+00 : f32
    %160 = vector.broadcast %cst_80 : f32 to vector<16x16xf32>
    %161 = vector.extract_strided_slice %73 {offsets = [128, 0], sizes = [16, 16], strides = [1, 1]} : vector<384x16xf32> to vector<16x16xf32>
    %162 = vector.extract_strided_slice %73 {offsets = [320, 0], sizes = [16, 16], strides = [1, 1]} : vector<384x16xf32> to vector<16x16xf32>
    %cst_81 = arith.constant dense<0.000000e+00> : vector<16x16xf32>
    %163 = tpu.matmul %161, %162, %cst_81 {dimension_numbers = #tpu.dot_dimension_numbers<[1], [1], [0], [0], [0, 0, 1, 0], [], []>} : vector<16x16xf32>, vector<16x16xf32>, vector<16x16xf32> -> vector<16x16xf32>
    %164 = arith.addf %160, %163 : vector<16x16xf32>
    %165 = vector.extract_strided_slice %73 {offsets = [144, 0], sizes = [16, 16], strides = [1, 1]} : vector<384x16xf32> to vector<16x16xf32>
    %166 = vector.extract_strided_slice %73 {offsets = [336, 0], sizes = [16, 16], strides = [1, 1]} : vector<384x16xf32> to vector<16x16xf32>
    %cst_82 = arith.constant dense<0.000000e+00> : vector<16x16xf32>
    %167 = tpu.matmul %165, %166, %cst_82 {dimension_numbers = #tpu.dot_dimension_numbers<[1], [1], [0], [0], [0, 0, 1, 0], [], []>} : vector<16x16xf32>, vector<16x16xf32>, vector<16x16xf32> -> vector<16x16xf32>
    %168 = arith.addf %164, %167 : vector<16x16xf32>
    %169 = vector.extract_strided_slice %73 {offsets = [160, 0], sizes = [16, 16], strides = [1, 1]} : vector<384x16xf32> to vector<16x16xf32>
    %170 = vector.extract_strided_slice %73 {offsets = [352, 0], sizes = [16, 16], strides = [1, 1]} : vector<384x16xf32> to vector<16x16xf32>
    %cst_83 = arith.constant dense<0.000000e+00> : vector<16x16xf32>
    %171 = tpu.matmul %169, %170, %cst_83 {dimension_numbers = #tpu.dot_dimension_numbers<[1], [1], [0], [0], [0, 0, 1, 0], [], []>} : vector<16x16xf32>, vector<16x16xf32>, vector<16x16xf32> -> vector<16x16xf32>
    %172 = arith.addf %168, %171 : vector<16x16xf32>
    %173 = vector.extract_strided_slice %73 {offsets = [176, 0], sizes = [16, 16], strides = [1, 1]} : vector<384x16xf32> to vector<16x16xf32>
    %174 = vector.extract_strided_slice %73 {offsets = [368, 0], sizes = [16, 16], strides = [1, 1]} : vector<384x16xf32> to vector<16x16xf32>
    %cst_84 = arith.constant dense<0.000000e+00> : vector<16x16xf32>
    %175 = tpu.matmul %173, %174, %cst_84 {dimension_numbers = #tpu.dot_dimension_numbers<[1], [1], [0], [0], [0, 0, 1, 0], [], []>} : vector<16x16xf32>, vector<16x16xf32>, vector<16x16xf32> -> vector<16x16xf32>
    %176 = arith.addf %172, %175 : vector<16x16xf32>
    %cst_85 = arith.constant 1.562500e-02 : f32
    %177 = vector.broadcast %cst_85 : f32 to vector<16x16xf32>
    %178 = arith.mulf %176, %177 : vector<16x16xf32>
    %179 = math.tanh %178 : vector<16x16xf32>
    %c2_86 = arith.constant 2 : index
    %180 = memref.load %arg17[%c2_86] : memref<3xf32, #tpu.memory_space<smem>>
    %181 = vector.broadcast %180 : f32 to vector<16x16xf32>
    %182 = arith.mulf %179, %181 : vector<16x16xf32>
    %c2_87 = arith.constant 2 : index
    %c0_88 = arith.constant 0 : index
    %c0_89 = arith.constant 0 : index
    %183 = vector.load %arg15[%c2_87, %c0_88, %c0_89] : memref<3x16x16xf32, #tpu.memory_space<vmem>>, vector<1x16x16xf32>
    %184 = vector.shape_cast %183 : vector<1x16x16xf32> to vector<16x16xf32>
    %185 = arith.addf %182, %184 : vector<16x16xf32>
    %186 = vector.extract_strided_slice %68 {offsets = [0, 0], sizes = [16, 16], strides = [1, 1]} : vector<128x16xf32> to vector<16x16xf32>
    %cst_90 = arith.constant dense<0.000000e+00> : vector<16x16xf32>
    %187 = tpu.matmul %185, %186, %cst_90 {dimension_numbers = #tpu.dot_dimension_numbers<[0], [0], [1], [1], [0, 1, 1, 1], [], []>} : vector<16x16xf32>, vector<16x16xf32>, vector<16x16xf32> -> vector<16x16xf32>
    %188 = vector.extract_strided_slice %68 {offsets = [16, 0], sizes = [16, 16], strides = [1, 1]} : vector<128x16xf32> to vector<16x16xf32>
    %cst_91 = arith.constant dense<0.000000e+00> : vector<16x16xf32>
    %189 = tpu.matmul %185, %188, %cst_91 {dimension_numbers = #tpu.dot_dimension_numbers<[0], [0], [1], [1], [0, 1, 1, 1], [], []>} : vector<16x16xf32>, vector<16x16xf32>, vector<16x16xf32> -> vector<16x16xf32>
    %190 = vector.extract_strided_slice %68 {offsets = [32, 0], sizes = [16, 16], strides = [1, 1]} : vector<128x16xf32> to vector<16x16xf32>
    %cst_92 = arith.constant dense<0.000000e+00> : vector<16x16xf32>
    %191 = tpu.matmul %185, %190, %cst_92 {dimension_numbers = #tpu.dot_dimension_numbers<[0], [0], [1], [1], [0, 1, 1, 1], [], []>} : vector<16x16xf32>, vector<16x16xf32>, vector<16x16xf32> -> vector<16x16xf32>
    %192 = vector.extract_strided_slice %68 {offsets = [48, 0], sizes = [16, 16], strides = [1, 1]} : vector<128x16xf32> to vector<16x16xf32>
    %cst_93 = arith.constant dense<0.000000e+00> : vector<16x16xf32>
    %193 = tpu.matmul %185, %192, %cst_93 {dimension_numbers = #tpu.dot_dimension_numbers<[0], [0], [1], [1], [0, 1, 1, 1], [], []>} : vector<16x16xf32>, vector<16x16xf32>, vector<16x16xf32> -> vector<16x16xf32>
    %194 = vector.extract_strided_slice %68 {offsets = [64, 0], sizes = [16, 16], strides = [1, 1]} : vector<128x16xf32> to vector<16x16xf32>
    %cst_94 = arith.constant dense<0.000000e+00> : vector<16x16xf32>
    %195 = tpu.matmul %185, %194, %cst_94 {dimension_numbers = #tpu.dot_dimension_numbers<[0], [0], [1], [1], [0, 1, 1, 1], [], []>} : vector<16x16xf32>, vector<16x16xf32>, vector<16x16xf32> -> vector<16x16xf32>
    %196 = vector.extract_strided_slice %68 {offsets = [80, 0], sizes = [16, 16], strides = [1, 1]} : vector<128x16xf32> to vector<16x16xf32>
    %cst_95 = arith.constant dense<0.000000e+00> : vector<16x16xf32>
    %197 = tpu.matmul %185, %196, %cst_95 {dimension_numbers = #tpu.dot_dimension_numbers<[0], [0], [1], [1], [0, 1, 1, 1], [], []>} : vector<16x16xf32>, vector<16x16xf32>, vector<16x16xf32> -> vector<16x16xf32>
    %198 = vector.extract_strided_slice %68 {offsets = [96, 0], sizes = [16, 16], strides = [1, 1]} : vector<128x16xf32> to vector<16x16xf32>
    %cst_96 = arith.constant dense<0.000000e+00> : vector<16x16xf32>
    %199 = tpu.matmul %185, %198, %cst_96 {dimension_numbers = #tpu.dot_dimension_numbers<[0], [0], [1], [1], [0, 1, 1, 1], [], []>} : vector<16x16xf32>, vector<16x16xf32>, vector<16x16xf32> -> vector<16x16xf32>
    %200 = vector.extract_strided_slice %68 {offsets = [112, 0], sizes = [16, 16], strides = [1, 1]} : vector<128x16xf32> to vector<16x16xf32>
    %cst_97 = arith.constant dense<0.000000e+00> : vector<16x16xf32>
    %201 = tpu.matmul %185, %200, %cst_97 {dimension_numbers = #tpu.dot_dimension_numbers<[0], [0], [1], [1], [0, 1, 1, 1], [], []>} : vector<16x16xf32>, vector<16x16xf32>, vector<16x16xf32> -> vector<16x16xf32>
    %202 = tpu.concatenate %187, %189, %191, %193, %195, %197, %199, %201 in 0 : vector<16x16xf32>, vector<16x16xf32>, vector<16x16xf32>, vector<16x16xf32>, vector<16x16xf32>, vector<16x16xf32>, vector<16x16xf32>, vector<16x16xf32> -> vector<128x16xf32>
    %203 = tpu.concatenate %116, %159, %202 in 0 : vector<128x16xf32>, vector<128x16xf32>, vector<128x16xf32> -> vector<384x16xf32>
    %c0_98 = arith.constant 0 : index
    %c0_99 = arith.constant 0 : index
    %204 = vector.load %arg10[%c0_98, %c0_99] : memref<128x384xf32, #tpu.memory_space<vmem>>, vector<128x384xf32>
    %cst_100 = arith.constant dense<0.000000e+00> : vector<128x16xf32>
    %205 = tpu.matmul %204, %203, %cst_100 {dimension_numbers = #tpu.dot_dimension_numbers<[1], [0], [0], [1], [0, 0, 1, 1], [], []>} : vector<128x384xf32>, vector<384x16xf32>, vector<128x16xf32> -> vector<128x16xf32>
    %c0_101 = arith.constant 0 : index
    %c0_102 = arith.constant 0 : index
    %206 = vector.load %arg11[%c0_101, %c0_102] : memref<128x1xf32, #tpu.memory_space<vmem>>, vector<128x1xf32>
    %207 = vector.broadcast %206 : vector<128x1xf32> to vector<128x16xf32>
    %208 = arith.addf %205, %207 : vector<128x16xf32>
    %209 = arith.addf %208, %68 : vector<128x16xf32>
    %cst_103 = arith.constant 0.000000e+00 : f32
    %210 = vector.broadcast %cst_103 : f32 to vector<128x16xf32>
    %211 = arith.cmpf oge, %209, %210 : vector<128x16xf32>
    %cst_104 = arith.constant 1.000000e-01 : f32
    %212 = vector.broadcast %cst_104 : f32 to vector<128x16xf32>
    %213 = arith.mulf %212, %209 : vector<128x16xf32>
    %214 = arith.select %211, %209, %213 : vector<128x16xi1>, vector<128x16xf32>
    %c0_105 = arith.constant 0 : index
    %c0_106 = arith.constant 0 : index
    %215 = vector.load %arg12[%c0_105, %c0_106] : memref<128x128xf32, #tpu.memory_space<vmem>>, vector<128x128xf32>
    %cst_107 = arith.constant dense<0.000000e+00> : vector<128x16xf32>
    %216 = tpu.matmul %215, %214, %cst_107 {dimension_numbers = #tpu.dot_dimension_numbers<[1], [0], [0], [1], [0, 0, 1, 1], [], []>} : vector<128x128xf32>, vector<128x16xf32>, vector<128x16xf32> -> vector<128x16xf32>
    %c0_108 = arith.constant 0 : index
    %c0_109 = arith.constant 0 : index
    %217 = vector.load %arg13[%c0_108, %c0_109] : memref<128x1xf32, #tpu.memory_space<vmem>>, vector<128x1xf32>
    %218 = vector.broadcast %217 : vector<128x1xf32> to vector<128x16xf32>
    %219 = arith.addf %216, %218 : vector<128x16xf32>
    %220 = arith.addf %219, %68 : vector<128x16xf32>
    %cst_110 = arith.constant 0.000000e+00 : f32
    %221 = vector.broadcast %cst_110 : f32 to vector<128x16xf32>
    %222 = arith.cmpf oge, %220, %221 : vector<128x16xf32>
    %cst_111 = arith.constant 1.000000e-01 : f32
    %223 = vector.broadcast %cst_111 : f32 to vector<128x16xf32>
    %224 = arith.mulf %223, %220 : vector<128x16xf32>
    %225 = arith.select %222, %220, %224 : vector<128x16xi1>, vector<128x16xf32>
    %c0_112 = arith.constant 0 : index
    %c0_113 = arith.constant 0 : index
    %c0_114 = arith.constant 0 : index
    %226 = vector.load %arg18[%c0_112, %c0_113, %c0_114] : memref<1x128x16xf32, #tpu.memory_space<vmem>>, vector<1x128x16xf32>
    %227 = vector.shape_cast %226 : vector<1x128x16xf32> to vector<128x16xf32>
    %228 = vector.shape_cast %225 : vector<128x16xf32> to vector<1x128x16xf32>
    tpu.vector_store %arg18[%c0_112, %c0_113, %c0_114], %228 {strides = array<i32>} : memref<1x128x16xf32, #tpu.memory_space<vmem>>, vector<1x128x16xf32>,
    return
  }
  func.func @transform_0(%arg0: i32) -> (i32, i32, i32) {
    %c0_i32 = arith.constant 0 : i32
    %c0_i32_0 = arith.constant 0 : i32
    %c0_i32_1 = arith.constant 0 : i32
    return %arg0, %c0_i32, %c0_i32_0 : i32, i32, i32
  }
  func.func @transform_1(%arg0: i32) -> (i32, i32) {
    %c0_i32 = arith.constant 0 : i32
    %c0_i32_0 = arith.constant 0 : i32
    %c0_i32_1 = arith.constant 0 : i32
    return %c0_i32, %c0_i32_0 : i32, i32
  }
  func.func @transform_2(%arg0: i32) -> (i32, i32) {
    %c0_i32 = arith.constant 0 : i32
    %c0_i32_0 = arith.constant 0 : i32
    %c0_i32_1 = arith.constant 0 : i32
    return %c0_i32, %c0_i32_0 : i32, i32
  }
  func.func @transform_3(%arg0: i32) -> (i32, i32) {
    %c0_i32 = arith.constant 0 : i32
    %c0_i32_0 = arith.constant 0 : i32
    %c0_i32_1 = arith.constant 0 : i32
    return %c0_i32, %c0_i32_0 : i32, i32
  }
  func.func @transform_4(%arg0: i32) -> (i32, i32) {
    %c0_i32 = arith.constant 0 : i32
    %c0_i32_0 = arith.constant 0 : i32
    %c0_i32_1 = arith.constant 0 : i32
    return %c0_i32, %c0_i32_0 : i32, i32
  }
  func.func @transform_5(%arg0: i32) -> (i32, i32) {
    %c0_i32 = arith.constant 0 : i32
    %c0_i32_0 = arith.constant 0 : i32
    %c0_i32_1 = arith.constant 0 : i32
    return %c0_i32, %c0_i32_0 : i32, i32
  }
  func.func @transform_6(%arg0: i32) -> (i32, i32) {
    %c0_i32 = arith.constant 0 : i32
    %c0_i32_0 = arith.constant 0 : i32
    %c0_i32_1 = arith.constant 0 : i32
    return %c0_i32, %c0_i32_0 : i32, i32
  }
  func.func @transform_7(%arg0: i32) -> (i32, i32) {
    %c0_i32 = arith.constant 0 : i32
    %c0_i32_0 = arith.constant 0 : i32
    %c0_i32_1 = arith.constant 0 : i32
    return %c0_i32, %c0_i32_0 : i32, i32
  }
  func.func @transform_8(%arg0: i32) -> (i32, i32) {
    %c0_i32 = arith.constant 0 : i32
    %c0_i32_0 = arith.constant 0 : i32
    %c0_i32_1 = arith.constant 0 : i32
    return %c0_i32, %c0_i32_0 : i32, i32
  }
  func.func @transform_9(%arg0: i32) -> (i32, i32) {
    %c0_i32 = arith.constant 0 : i32
    %c0_i32_0 = arith.constant 0 : i32
    %c0_i32_1 = arith.constant 0 : i32
    return %c0_i32, %c0_i32_0 : i32, i32
  }
  func.func @transform_10(%arg0: i32) -> (i32, i32) {
    %c0_i32 = arith.constant 0 : i32
    %c0_i32_0 = arith.constant 0 : i32
    %c0_i32_1 = arith.constant 0 : i32
    return %c0_i32, %c0_i32_0 : i32, i32
  }
  func.func @transform_11(%arg0: i32) -> (i32, i32) {
    %c0_i32 = arith.constant 0 : i32
    %c0_i32_0 = arith.constant 0 : i32
    %c0_i32_1 = arith.constant 0 : i32
    return %c0_i32, %c0_i32_0 : i32, i32
  }
  func.func @transform_12(%arg0: i32) -> (i32, i32) {
    %c0_i32 = arith.constant 0 : i32
    %c0_i32_0 = arith.constant 0 : i32
    %c0_i32_1 = arith.constant 0 : i32
    return %c0_i32, %c0_i32_0 : i32, i32
  }
  func.func @transform_13(%arg0: i32) -> (i32, i32, i32) {
    %c0_i32 = arith.constant 0 : i32
    %c0_i32_0 = arith.constant 0 : i32
    %c0_i32_1 = arith.constant 0 : i32
    %c0_i32_2 = arith.constant 0 : i32
    return %c0_i32, %c0_i32_0, %c0_i32_1 : i32, i32, i32
  }
  func.func @transform_14(%arg0: i32) -> (i32, i32, i32) {
    %c0_i32 = arith.constant 0 : i32
    %c0_i32_0 = arith.constant 0 : i32
    %c0_i32_1 = arith.constant 0 : i32
    %c0_i32_2 = arith.constant 0 : i32
    return %c0_i32, %c0_i32_0, %c0_i32_1 : i32, i32, i32
  }
  func.func @transform_15(%arg0: i32) -> i32 {
    %c0_i32 = arith.constant 0 : i32
    %c0_i32_0 = arith.constant 0 : i32
    return %c0_i32 : i32
  }
  func.func @transform_16(%arg0: i32) -> i32 {
    %c0_i32 = arith.constant 0 : i32
    %c0_i32_0 = arith.constant 0 : i32
    return %c0_i32 : i32
  }
  func.func @transform_17(%arg0: i32) -> (i32, i32, i32) {
    %c0_i32 = arith.constant 0 : i32
    %c0_i32_0 = arith.constant 0 : i32
    %c0_i32_1 = arith.constant 0 : i32
    return %arg0, %c0_i32, %c0_i32_0 : i32, i32, i32
  }
}

</mosaic_0001>

<bundles_post_ra>
// kernel: st_attention_block.1
= control target key start
LH: loop header
LB: loop body
LE: loop exit
PB: predicated region body
PF: predicated region fallthrough
CT: control target
= control target key end

     0   :  { %s7395_s0 = inlined_call_operand.vmem [shape: f32[2,128,16], index: 0, kind: input, shape index: {}]   ;;  %s7396_s1 = inlined_call_operand.vmem [shape: f32[384,128], index: 1, kind: input, shape index: {}]   ;;  %s7397_s2 = inlined_call_operand.vmem [shape: f32[384,1], index: 2, kind: input, shape index: {}]   ;;  %s7398_s3 = inlined_call_operand.vmem [shape: f32[128,384], index: 3, kind: input, shape index: {}]   ;;  %s7399_s4 = inlined_call_operand.vmem [shape: f32[128,1], index: 4, kind: input, shape index: {}]   ;;  %s7400_s5 = inlined_call_operand.vmem [shape: f32[128,128], index: 5, kind: input, shape index: {}]   ;;  %s7401_s6 = inlined_call_operand.vmem [shape: f32[128,1], index: 6, kind: input, shape index: {}]   ;;  %s7402_s7 = inlined_call_operand.hbm [shape: f32[384,128], index: 7, kind: input, shape index: {}]   ;;  %s7403_s8 = inlined_call_operand.vmem [shape: f32[384,1], index: 8, kind: input, shape index: {}]   ;;  %s7404_s9 = inlined_call_operand.hbm [shape: f32[128,384], index: 9, kind: input, shape index: {}]   ;;  %s7405_s10 = inlined_call_operand.vmem [shape: f32[128,1], index: 10, kind: input, shape index: {}]   ;;  %s7406_s11 = inlined_call_operand.vmem [shape: f32[128,128], index: 11, kind: input, shape index: {}]   ;;  %s7407_s12 = inlined_call_operand.vmem [shape: f32[128,1], index: 12, kind: input, shape index: {}]   ;;  %s7408_s13 = inlined_call_operand.hbm [shape: f32[3,16,16], index: 13, kind: input, shape index: {}]   ;;  %s7409_s14 = inlined_call_operand.hbm [shape: f32[3,16,16], index: 14, kind: input, shape index: {}]   ;;  %s7410_s15 = inlined_call_operand.vmem [shape: f32[3], index: 15, kind: input, shape index: {}]   ;;  %s7411_s16 = inlined_call_operand.hbm [shape: f32[3], index: 16, kind: input, shape index: {}]   ;;  %s7412_s17 = inlined_call_operand.hbm [shape: f32[2,128,16], index: 17, kind: output, shape index: {}]  }
   0x1   :  { %7443 = sst [smem:[#allocation56_spill]] %s7395_s0 }
   0x2   :  { %7444 = sst [smem:[#allocation57_spill]] %s7396_s1 }
   0x3   :  { %7445 = sst [smem:[#allocation58_spill]] %s7402_s7 }
   0x4   :  { %7446 = sst [smem:[#allocation59_spill]] %s7404_s9 }
   0x5   :  { %7447 = sst [smem:[#allocation60_spill]] %s7408_s13 }
   0x6   :  { %7448 = sst [smem:[#allocation61_spill]] %s7412_s17 }
   0x7   :  { %22 = vsyncpa [#allocation3], 0 }
   0x8   :  { %23 = vsyncpa [#allocation8], 0 }
   0x9   :  { %24 = vsyncpa [#allocation11], 0 }
   0xa   :  { %25 = vsyncpa [#allocation6], 0 }
   0xb   :  { %26 = vsyncpa [#allocation5], 0 }
   0xc   :  { %27 = vsyncpa [#allocation4], 0 }
   0xd   :  { %29 = vsyncpa [#allocation4 + $0x1], 0  ;;  %s5397_s24 = smov 0   ;;  %s5399_s25 = smov 0  }
   0xe   :  { %s5401_s26 = smov 0   ;;  %s5403_s27 = smov 0  }
   0xf LB: > { %7449 = sst [smem:[#allocation21_spill]] %s5280_s24  ;;  %s5418_s28 = sadd.s32 4294967295, %s5292_s27   ;;  %s5292_s27 = sphi %s5403_s27, %s7534_s27   ;;  %s5288_s26 = sphi %s5401_s26, %s7537_s26   ;;  %s5284_s25 = sphi %s5399_s25, %s7536_s25   ;;  %s5280_s24 = sphi %s5397_s24, %s7535_s24  }
  0x10   : > { %7450 = sst [smem:[#allocation22_spill]] %s5284_s25  ;;  %s4700_s29 = sadd.s32 4294967294, %s5292_s27  }
  0x11   : > { %7451 = sst [smem:[#allocation23_spill]] %s5288_s26  ;;  %s5422_s0 = sadd.s32 1, %s5292_s27  }
  0x12   : > { %7452 = sst [smem:[#allocation24_spill]] %s5292_s27  ;;  %s404_s30 = sadd.s32 1, %s5288_s26 }
  0x13   : > { %7453 = sst [smem:[#allocation25_spill]] %s5422_s0  ;;  %s401_s18 = ssub.s32 %s5292_s27, %s5422_s0 }
  0x14   : > { %p414_p0 = scmp.ne.s32.totalorder %s5288_s26, %s5284_s25  ;;  %p402_p1 = scmp.eq.s32.totalorder %s401_s18, 0 }
  0x15   : > { %p415_p2 = scmp.eq.s32.totalorder %s5418_s28, 1  ;;  %p420_p3 = scmp.ne.s32.totalorder %s5284_s25, %s5280_s24 }
  0x16   : > { %p421_p4 = scmp.eq.s32.totalorder %s4700_s29, 1  ;;  %p4701_p7 = scmp.ge.s32.totalorder %s5292_s27, 1 }
  0x17   : > { %s5433_s19 = scalar_select %p402_p1, %s5288_s26, %s404_s30  }
  0x18   : > { %p5435_p5 = por %p415_p2, %p414_p0  ;;  %p5439_p6 = por %p421_p4, %p420_p3 }
  0x19   : > { %7454 = sst [smem:[#allocation26_spill]] %s5433_s19  ;;  %p428_p8 = scmp.lt.s32.totalorder %s5292_s27, 3 }
  0x1a   : > { %s7455_s1 = scalar_select %p5435_p5, 1, 0 }
  0x1b   : > { %s7457_s20 = scalar_select %p5439_p6, 1, 0 }
  0x1c   : > { %7456 = sst [smem:[#allocation27_spill]] %s7455_s1  ;;  %p4943_p9 = scmp.eq.s32.totalorder %s5418_s28, 0 }
  0x1d   : > { %7458 = sst [smem:[#allocation28_spill]] %s7457_s20  ;;  %p5446_p10 = pnand %p4701_p7, %p428_p8 }
  0x1e   : > { %s7460_s9 = sld [smem:[#allocation59_spill]]  ;;  %s5294_s30 = smov [#allocation7]  }
  0x1f   : > { %p4920_p11 = pneg %p5446_p10  ;;  %s476_s18 = sshll.u32 %s5294_s30, 4  ;;  %s477_s18 = int_to_ptr.vmem [resolvable:$true] %s476_s18 }
  0x20   : > { %s7462_s7 = sld [smem:[#allocation58_spill]]  ;;  %s5295_s22 = smov 384  }
  0x21   : > { %p5457_p12 = pnand %p4943_p9, %p4920_p11  ;;  %s5296_s23 = smov 24  }
  0x22   : > { %s5298_s24 = smov 128   ;;  %s5299_s27 = smov 8  }
  0x23   : > { %s7463_s13 = sld [smem:[#allocation60_spill]]  ;;  %s5300_s0 = smov [#allocation9]  }
  0x24   : > { %s474_s29 = sshll.u32 %s7460_s9, 4  ;;  %s5297_s9 = smov [#allocation2]   ;;  %s475_s29 = int_to_ptr.hbm [resolvable:$true] %s474_s29 }
  0x25   : > { %4926 = dma.hbm_to_vmem [thread:$0]  (!%p5457_p12), %s475_s29, 6144, %s477_s18, [#allocation8], %s5295_s22, %s5295_s22, %s5296_s23  }
  0x26   : > { %s457_s20 = sshll.u32 %s7462_s7, 4  ;;  %s459_s30 = sshll.u32 %s5297_s9, 4  ;;  %s458_s20 = int_to_ptr.hbm [resolvable:$true] %s457_s20  ;;  %s460_s30 = int_to_ptr.vmem [resolvable:$true] %s459_s30 }
  0x27   : > { %4923 = dma.hbm_to_vmem [thread:$0]  (!%p5457_p12), %s458_s20, 6144, %s460_s30, [#allocation3], %s5298_s24, %s5298_s24, %s5299_s27  }
  0x28   : > { %s499_s7 = sshll.u32 %s5300_s0, 4  ;;  %s511_s9 = sshll.u32 %s7409_s14, 4  ;;  %s500_s7 = int_to_ptr.vmem [resolvable:$true] %s499_s7  ;;  %s512_s9 = int_to_ptr.hbm [resolvable:$true] %s511_s9 }
  0x29   : > { %s497_s26 = sshll.u32 %s7463_s13, 4  ;;  %s5301_s18 = smov [#allocation10]   ;;  %s498_s26 = int_to_ptr.hbm [resolvable:$true] %s497_s26 }
  0x2a   : > { %4929 = dma.hbm_to_vmem [thread:$0]  (!%p5457_p12), %s498_s26, 768, %s500_s7, [#allocation8], %s5298_s24, %s5298_s24, %s5299_s27  }
  0x2b   : > { %s513_s22 = sshll.u32 %s5301_s18, 4  ;;  %s526_s17 = sshll.u32 %s7410_s15, 4  ;;  %s514_s22 = int_to_ptr.vmem [resolvable:$true] %s513_s22  ;;  %s527_s17 = int_to_ptr.vmem [resolvable:$true] %s526_s17 }
  0x2c   : > { %4932 = dma.hbm_to_vmem [thread:$0]  (!%p5457_p12), %s512_s9, 768, %s514_s22, [#allocation11], %s5298_s24, %s5298_s24, %s5299_s27  }
  0x2d   : > { %s536_s0 = sshll.u32 %s7411_s16, 4  ;;  %s5302_s13 = smov [#allocation12]   ;;  %s537_s0 = int_to_ptr.hbm [resolvable:$true] %s536_s0 }
  0x2e   : > { %4935 = dma.vmem_to_smem (!%p5457_p12), %s527_s17, 16, %s5302_s13, [#allocation6]  }
  0x2f   : > { %s5303_s7 = smov [#allocation13]   ;;  %557 = sbr.rel (%p5446_p10) target bundleno = 3973 (0xf85), region = 88 }
  0x30   : > { %4938 = dma.hbm_to_smem (!%p5457_p12), %s537_s0, 16, %s5303_s7, [#allocation5]  }
  0x34   : > { %5255 = dma.done.wait (%p4943_p9), [#allocation3], 6144  }
  0x35   : > { %5257 = vsyncadd (%p4943_p9), [#allocation3], 4294961152 }
  0x36   : > { %5259 = dma.done.wait (%p4943_p9), [#allocation8], 6912  }
  0x37   : > { %5261 = vsyncadd (%p4943_p9), [#allocation8], 4294960384 }
  0x38   : > { %5263 = dma.done.wait (%p4943_p9), [#allocation11], 768  }
  0x39   : > { %5265 = vsyncadd (%p4943_p9), [#allocation11], 4294966528 }
  0x3a   : > { %5267 = dma.done.wait (%p4943_p9), [#allocation6], 16  }
  0x3b   : > { %5269 = vsyncadd (%p4943_p9), [#allocation6], 4294967280 }
  0x3c   : > { %5271 = dma.done.wait (%p4943_p9), [#allocation5], 16  }
  0x3d   : > { %5273 = vsyncadd (%p4943_p9), [#allocation5], 4294967280 }
  0x3e   : > { %589 = sfence }
  0x3f   : > { %v717_v0 = vld [vmem:[%s7397_s2 + $0x60] sm:$0xff]  ;;  %p636_p13 = scmp.lt.s32.totalorder %s5418_s28, 1  ;;  %v5304_v2 = vmov 0   ;;  %s7464_s9 = sld [smem:[#allocation56_spill]]  ;;  %v718_v5 = vld [vmem:[%s7397_s2 + $0x68] sm:$0xff]  ;;  %v744_v11 = vld [vmem:[%s7397_s2 + $0x138] sm:$0xff] }
  0x40   : > { %v713_v1 = vld [vmem:[%s7397_s2 + $0x40] sm:$0xff]  ;;  %5004 = vset.pattern.permute.xlu2 %v5304_v2  ;;  %5002 = vset.pattern.permute.xlu0 %v5304_v2  ;;  %v714_v6 = vld [vmem:[%s7397_s2 + $0x48] sm:$0xff]  ;;  %v719_v12 = vld [vmem:[%s7397_s2 + $0x70] sm:$0xff]  ;;  %s7465_s20 = sld [smem:[#allocation57_spill]]  ;;  %vm1186_vm0 = vcmask 523264   ;;  %vm1228_vm1 = vcmask 130048  }
  0x41   : > { %815 = vperm.xlu2 %5004, %v717_v0   ;;  %795 = vperm.xlu0 %5002, %v713_v1   ;;  %s637_s19 = scalar_select %p636_p13, %s5418_s28, 1  ;;  %v741_v17 = vld [vmem:[%s7397_s2 + $0x120] sm:$0xff]  ;;  %v743_v18 = vld [vmem:[%s7397_s2 + $0x130] sm:$0xff]  ;;  %v738_v23 = vld [vmem:[%s7397_s2 + $0x108] sm:$0xff] }
  0x42   : > { %5003 = vset.pattern.permute.xlu1 %v5304_v2  ;;  %v740_v24 = vld [vmem:[%s7397_s2 + $0x118] sm:$0xff]  ;;  %v721_v28 = vld [vmem:[%s7397_s2 + $0x80] sm:$0xff]  ;;  %v723_v31 = vld [vmem:[%s7397_s2 + $0x90] sm:$0xff]  ;;  %s4739_s17 = sld [smem:[#allocation12 + $0x1]]  ;;  %s4879_s23 = sshll.u32 %s5418_s28, 7 }
  0x43   : > { %s4878_s21 = sshll.u32 %s637_s19, 7  ;;  %v737_v29 = vld [vmem:[%s7397_s2 + $0x100] sm:$0xff]  ;;  %v722_v32 = vld [vmem:[%s7397_s2 + $0x88] sm:$0xff]  ;;  %v724_v34 = vld [vmem:[%s7397_s2 + $0x98] sm:$0xff]  ;;  %s4823_s22 = sld [smem:[#allocation13 + $0x1]] }
  0x44   : > { %v705_v35 = vld [vmem:[%s7397_s2] sm:$0xff]  ;;  %v706_v38 = vld [vmem:[%s7397_s2 + $0x8] sm:$0xff]  ;;  %v707_v41 = vld [vmem:[%s7397_s2 + $0x10] sm:$0xff]  ;;  %s7529_s30 = sld [smem:[#allocation61_spill]] }
  0x45   : > { %s5521_s18 = scalar_lea.vmem %s7464_s9, %s4878_s21  ;;  %v725_v37 = vld [vmem:[%s7397_s2 + $0xa0] sm:$0xff]  ;;  %v726_v40 = vld [vmem:[%s7397_s2 + $0xa8] sm:$0xff]  ;;  %v727_v43 = vld [vmem:[%s7397_s2 + $0xb0] sm:$0xff]  ;;  %s1220_s9 = sld [smem:[#allocation12]] }
  0x46   : > { %v656_v3 = vld [vmem:[%s5521_s18 + $0x78] sm:$0xff]  ;;  %v655_v4 = vld [vmem:[%s5521_s18 + $0x70] sm:$0xff]  ;;  %v654_v7 = vld [vmem:[%s5521_s18 + $0x68] sm:$0xff]  ;;  %s4856_s21 = sld [smem:[#allocation13 + $0x2]] }
  0x47   : > { %993 = vmatpush.msra.mxu0 %v656_v3  ;;  %v653_v8 = vld [vmem:[%s5521_s18 + $0x60] sm:$0xff]  ;;  %v652_v9 = vld [vmem:[%s5521_s18 + $0x58] sm:$0xff]  ;;  %v651_v10 = vld [vmem:[%s5521_s18 + $0x50] sm:$0xff] }
  0x48   : > { %v650_v13 = vld [vmem:[%s5521_s18 + $0x48] sm:$0xff]  ;;  %v649_v14 = vld [vmem:[%s5521_s18 + $0x40] sm:$0xff]  ;;  %v648_v15 = vld [vmem:[%s5521_s18 + $0x38] sm:$0xff] }
  0x49   : > { %994 = vmatpush.msra.mxu0 %v655_v4  ;;  %820 = vperm.xlu2 %5004, %v718_v5   ;;  %v647_v16 = vld [vmem:[%s5521_s18 + $0x30] sm:$0xff]  ;;  %v646_v19 = vld [vmem:[%s5521_s18 + $0x28] sm:$0xff]  ;;  %v645_v20 = vld [vmem:[%s5521_s18 + $0x20] sm:$0xff] }
  0x4a   : > { %800 = vperm.xlu0 %5002, %v714_v6   ;;  %v644_v21 = vld [vmem:[%s5521_s18 + $0x18] sm:$0xff]  ;;  %v643_v22 = vld [vmem:[%s5521_s18 + $0x10] sm:$0xff]  ;;  %v642_v25 = vld [vmem:[%s5521_s18 + $0x8] sm:$0xff]  ;;  %s4569_s0 = scalar_lea.hbm %s7529_s30, %s4879_s23  ;;  %s5230_s26 = scalar_lea.hbm %s7529_s30, 256 }
  0x4b   : > { %995 = vmatpush.msra.mxu0 %v654_v7  ;;  %v641_v26 = vld [vmem:[%s5521_s18] sm:$0xff]  ;;  %v658_v30 = vld [vmem:[%s7465_s20 + $0x8] sm:$0xff]  ;;  %v659_v33 = vld [vmem:[%s7465_s20 + $0x10] sm:$0xff]  ;;  %s4572_s24 = sshll.u32 %s4569_s0, 4  ;;  %s4573_s24 = int_to_ptr.hbm [resolvable:$true] %s4572_s24 }
  0x4c   : > { %v657_v27 = vld [vmem:[%s7465_s20] sm:$0xff]  ;;  %v660_v36 = vld [vmem:[%s7465_s20 + $0x18] sm:$0xff]  ;;  %v662_v42 = vld [vmem:[%s7465_s20 + $0x28] sm:$0xff]  ;;  %s5224_s25 = sshra.s32 %s4573_s24, 4  ;;  %s5225_s25 = int_to_ptr.hbm [resolvable:$true] %s5224_s25 }
  0x4d   : > { %996 = vmatpush.msra.mxu0 %v653_v8  ;;  %v661_v39 = vld [vmem:[%s7465_s20 + $0x20] sm:$0xff]  ;;  %v708_v44 = vld [vmem:[%s7397_s2 + $0x18] sm:$0xff]  ;;  %v663_v45 = vld [vmem:[%s7465_s20 + $0x30] sm:$0xff]  ;;  %s5226_s27 = scalar_lea.hbm %s5225_s25, 128  ;;  %p5231_p3 = scmp.lt.s32.totalorder %s5225_s25, %s7529_s30 }
  0x4e   : > { %v728_v46 = vld [vmem:[%s7397_s2 + $0xb8] sm:$0xff]  ;;  %v709_v47 = vld [vmem:[%s7397_s2 + $0x20] sm:$0xff]  ;;  %v715_v49 = vld [vmem:[%s7397_s2 + $0x50] sm:$0xff]  ;;  %p5227_p0 = scmp.ne.s32.totalorder %s5225_s25, %s5226_s27  ;;  %p5232_p4 = scmp.lt.s32.totalorder %s5230_s26, %s5226_s27 }
  0x4f   : > { %997 = vmatpush.msra.mxu0 %v652_v9  ;;  %v664_v48 = vld [vmem:[%s7465_s20 + $0x38] sm:$0xff]  ;;  %v710_v51 = vld [vmem:[%s7397_s2 + $0x28] sm:$0xff]  ;;  %805 = vperm.xlu1 %5003, %v715_v49   ;;  %v665_v52 = vld [vmem:[%s7465_s20 + $0x40] sm:$0xff] }
  0x50   : > { %v752_v50 = vld [vmem:[%s7397_s2 + $0x178] sm:$0xff]  ;;  %v711_v54 = vld [vmem:[%s7397_s2 + $0x30] sm:$0xff]  ;;  %v666_v55 = vld [vmem:[%s7465_s20 + $0x48] sm:$0xff]  ;;  %p5228_p1 = pnand %p5227_p0, %p5435_p5  ;;  %p5233_p7 = por %p5232_p4, %p5231_p3 }
  0x51   : > { %998 = vmatpush.msra.mxu0 %v651_v10  ;;  %950 = vperm.xlu2 %5004, %v744_v11   ;;  %v716_v53 = vld [vmem:[%s7397_s2 + $0x58] sm:$0xff]  ;;  %v667_v58 = vld [vmem:[%s7465_s20 + $0x50] sm:$0xff]  ;;  %v750_v3 = vld [vmem:[%s7397_s2 + $0x168] sm:$0xff] }
  0x52   : > { %825 = vperm.xlu0 %5002, %v719_v12   ;;  %v712_v57 = vld [vmem:[%s7397_s2 + $0x38] sm:$0xff]  ;;  %v751_v62 = vld [vmem:[%s7397_s2 + $0x170] sm:$0xff]  ;;  %v669_v5 = vld [vmem:[%s7465_s20 + $0x60] sm:$0xff]  ;;  %p5229_p2 = pneg %p5228_p1 }
  0x53   : > { %999 = vmatpush.msra.mxu0 %v650_v13  ;;  %v748_v60 = vld [vmem:[%s7397_s2 + $0x158] sm:$0xff]  ;;  %v747_v2 = vld [vmem:[%s7397_s2 + $0x150] sm:$0xff]  ;;  %v742_v6 = vld [vmem:[%s7397_s2 + $0x128] sm:$0xff] }
  0x54   : > { %v668_v63 = vld [vmem:[%s7465_s20 + $0x58] sm:$0xff]  ;;  %v746_v8 = vld [vmem:[%s7397_s2 + $0x148] sm:$0xff]  ;;  %v749_v9 = vld [vmem:[%s7397_s2 + $0x160] sm:$0xff]  ;;  %p5234_p8 = pnand %p5233_p7, %p5229_p2 }
  0x55   : > { %1000 = vmatpush.msra.mxu0 %v649_v14  ;;  %v720_v1 = vld [vmem:[%s7397_s2 + $0x78] sm:$0xff]  ;;  %v670_v10 = vld [vmem:[%s7465_s20 + $0x68] sm:$0xff]  ;;  %v739_v12 = vld [vmem:[%s7397_s2 + $0x110] sm:$0xff] }
  0x56   : > { %v745_v13 = vld [vmem:[%s7397_s2 + $0x140] sm:$0xff]  ;;  %v736_v14 = vld [vmem:[%s7397_s2 + $0xf8] sm:$0xff] }
  0x57   : > { %1001 = vmatpush.msra.mxu0 %v648_v15  ;;  %810 = vperm.xlu1 %5003, %v716_v53  }
  0x59   : > { %1002 = vmatpush.msra.mxu0 %v647_v16  ;;  %935 = vperm.xlu2 %5004, %v741_v17   ;;  %v671_v16 = vld [vmem:[%s7465_s20 + $0x70] sm:$0xff] }
  0x5a   : > { %945 = vperm.xlu0 %5002, %v743_v18   ;;  %v731_v18 = vld [vmem:[%s7397_s2 + $0xd0] sm:$0xff] }
  0x5b   : > { %1003 = vmatpush.msra.mxu0 %v646_v19  ;;  %v735_v19 = vld [vmem:[%s7397_s2 + $0xf0] sm:$0xff] }
  0x5d   : > { %1004 = vmatpush.msra.mxu0 %v645_v20 }
  0x5f   : > { %1005 = vmatpush.msra.mxu0 %v644_v21  ;;  %830 = vperm.xlu1 %5003, %v720_v1   ;;  %v672_v21 = vld [vmem:[%s7465_s20 + $0x78] sm:$0xff]  ;;  %v681_v1 = vld [vmem:[%s7465_s20 + $0xc0] sm:$0xff] }
  0x61   : > { %1006 = vmatpush.msra.mxu0 %v643_v22  ;;  %920 = vperm.xlu2 %5004, %v738_v23   ;;  %v729_v22 = vld [vmem:[%s7397_s2 + $0xc0] sm:$0xff]  ;;  %v734_v23 = vld [vmem:[%s7397_s2 + $0xe8] sm:$0xff] }
  0x62   : > { %930 = vperm.xlu0 %5002, %v740_v24  }
  0x63   : > { %1007 = vmatpush.msra.mxu0 %v642_v25 }
  0x65   : > { %1008 = vmatpush.msra.mxu0 %v641_v26  ;;  %v673_v26 = vld [vmem:[%s7465_s20 + $0x80] sm:$0xff] }
  0x66   : > { %1009 = vmatmul.f32.vlgmr.msra.gmra.mxu0 %v657_v27 }
  0x67   : > { %940 = vperm.xlu1 %5003, %v742_v6  }
  0x69   : > { %835 = vperm.xlu2 %5004, %v721_v28   ;;  %v732_v28 = vld [vmem:[%s7397_s2 + $0xd8] sm:$0xff] }
  0x6a   : > { %915 = vperm.xlu0 %5002, %v737_v29  }
  0x6e   : > { %1012 = vmatmul.f32.gmra.mxu0 %v658_v30 }
  0x6f   : > { %925 = vperm.xlu1 %5003, %v739_v12  }
  0x71   : > { %845 = vperm.xlu2 %5004, %v723_v31   ;;  %v674_v31 = vld [vmem:[%s7465_s20 + $0x88] sm:$0xff] }
  0x72   : > { %840 = vperm.xlu0 %5002, %v722_v32  }
  0x76   : > { %1015 = vmatmul.f32.gmra.mxu0 %v659_v33  ;;  %v730_v33 = vld [vmem:[%s7397_s2 + $0xc8] sm:$0xff] }
  0x79   : > { %850 = vperm.xlu2 %5004, %v724_v34  }
  0x7a   : > { %755 = vperm.xlu0 %5002, %v705_v35   ;;  %v675_v35 = vld [vmem:[%s7465_s20 + $0x90] sm:$0xff] }
  0x7e   : > { %1018 = vmatmul.f32.gmra.mxu0 %v660_v36 }
  0x81   : > { %855 = vperm.xlu2 %5004, %v725_v37  }
  0x82   : > { %760 = vperm.xlu0 %5002, %v706_v38  }
  0x86   : > { %1021 = vmatmul.f32.gmra.mxu0 %v661_v39  ;;  %v676_v39 = vld [vmem:[%s7465_s20 + $0x98] sm:$0xff] }
  0x89   : > { %860 = vperm.xlu2 %5004, %v726_v40  }
  0x8a   : > { %765 = vperm.xlu0 %5002, %v707_v41  }
  0x8e   : > { %1024 = vmatmul.f32.gmra.mxu0 %v662_v42 }
  0x91   : > { %865 = vperm.xlu2 %5004, %v727_v43   ;;  %v677_v43 = vld [vmem:[%s7465_s20 + $0xa0] sm:$0xff] }
  0x92   : > { %770 = vperm.xlu0 %5002, %v708_v44  }
  0x96   : > { %1027 = vmatmul.f32.gmra.mxu0 %v663_v45 }
  0x99   : > { %870 = vperm.xlu2 %5004, %v728_v46  }
  0x9a   : > { %775 = vperm.xlu0 %5002, %v709_v47   ;;  %v678_v47 = vld [vmem:[%s7465_s20 + $0xa8] sm:$0xff] }
  0x9b   : > { %v5650_v56 = vpop.permute.xlu2 %815 }
  0x9e   : > { %1030 = vmatmul.f32.gmra.mxu0 %v664_v48 }
  0xa1   : > { %990 = vperm.xlu2 %5004, %v752_v50  }
  0xa2   : > { %780 = vperm.xlu0 %5002, %v710_v51  }
  0xa3   : > { %v5663_v61 = vpop.permute.xlu2 %820 }
  0xa6   : > { %1033 = vmatmul.f32.gmra.mxu0 %v665_v52  ;;  %v679_v52 = vld [vmem:[%s7465_s20 + $0xb0] sm:$0xff] }
  0xa9   : > { %785 = vperm.xlu2 %5004, %v711_v54  }
  0xaa   : > { %985 = vperm.xlu0 %5002, %v751_v62  }
  0xab   : > { %v5682_v4 = vpop.permute.xlu2 %950 }
  0xae   : > { %1036 = vmatmul.f32.gmra.mxu0 %v666_v55 }
  0xb1   : > { %790 = vperm.xlu2 %5004, %v712_v57   ;;  %v680_v57 = vld [vmem:[%s7465_s20 + $0xb8] sm:$0xff] }
  0xb2   : > { %980 = vperm.xlu0 %5002, %v750_v3  }
  0xb3   : > { %v5658_v59 = vpop.permute.xlu0 %795  ;;  %v5701_v11 = vpop.permute.xlu2 %935 }
  0xb6   : > { %1039 = vmatmul.f32.gmra.mxu0 %v667_v58 }
  0xb9   : > { %970 = vperm.xlu2 %5004, %v748_v60  }
  0xba   : > { %975 = vperm.xlu0 %5002, %v749_v9   ;;  %v682_v9 = vld [vmem:[%s7465_s20 + $0xc8] sm:$0xff] }
  0xbb   : > { %v5717_v17 = vpop.permute.xlu2 %920 }
  0xbc   : > { %v5671_v0 = vpop.permute.xlu0 %800 }
  0xbe   : > { %1042 = vmatmul.f32.gmra.mxu0 %v668_v63 }
  0xc1   : > { %965 = vperm.xlu2 %5004, %v747_v2  }
  0xc2   : > { %910 = vperm.xlu0 %5002, %v736_v14  }
  0xc3   : > { %v5736_v24 = vpop.permute.xlu2 %835 }
  0xc4   : > { %v5690_v7 = vpop.permute.xlu0 %825 }
  0xc6   : > { %1045 = vmatmul.f32.gmra.mxu0 %v669_v5 }
  0xc9   : > { %960 = vperm.xlu2 %5004, %v746_v8  }
  0xca   : > { %905 = vperm.xlu0 %5002, %v735_v19  }
  0xcb   : > { %v5746_v29 = vpop.permute.xlu2 %845 }
  0xcc   : > { %v5712_v15 = vpop.permute.xlu0 %945 }
  0xce   : > { %1048 = vmatmul.f32.gmra.mxu0 %v670_v10 }
  0xd1   : > { %955 = vperm.xlu2 %5004, %v745_v13   ;;  %v806_v13 = vpop.permute.xlu1 %805 }
  0xd2   : > { %900 = vperm.xlu0 %5002, %v734_v23  }
  0xd3   : > { %v5759_v36 = vpop.permute.xlu2 %850 }
  0xd4   : > { %v5725_v20 = vpop.permute.xlu0 %930 }
  0xd6   : > { %1051 = vmatmul.f32.gmra.mxu0 %v671_v16  ;;  %v683_v16 = vld [vmem:[%s7465_s20 + $0xd0] sm:$0xff] }
  0xd9   : > { %885 = vperm.xlu2 %5004, %v731_v18  }
  0xda   : > { %890 = vperm.xlu0 %5002, %v732_v28  }
  0xdb   : > { %v5764_v40 = vpop.permute.xlu2 %855 }
  0xdc   : > { %v5741_v27 = vpop.permute.xlu0 %915 }
  0xde   : > { %1054 = vmatmul.f32.gmra.mxu0 %v672_v21  ;;  %v811_v21 = vpop.permute.xlu1 %810 }
  0xe1   : > { %875 = vperm.xlu2 %5004, %v729_v22  }
  0xe2   : > { %880 = vperm.xlu0 %5002, %v730_v33  }
  0xe3   : > { %v1010_v25 = vpop.f32.mrf.mxu0  ;;  %v5769_v45 = vpop.permute.xlu2 %860 }
  0xe4   : > { %v5751_v32 = vpop.permute.xlu0 %840 }
  0xe6   : > { %1057 = vmatmul.f32.gmra.mxu0 %v673_v26 }
  0xeb   : > { %v1013_v30 = vpop.f32.mrf.mxu0  ;;  %v5774_v50 = vpop.permute.xlu2 %865 }
  0xec   : > { %v756_v37 = vpop.permute.xlu0 %755 }
  0xed   : > { %v1011_v44 = vadd.f32 %v1010_v25, %v756_v37 }
  0xee   : > { %1060 = vmatmul.f32.gmra.mxu0 %v674_v31 }
  0xf3   : > { %v1016_v34 = vpop.f32.mrf.mxu0  ;;  %v5782_v58 = vpop.permute.xlu2 %870 }
  0xf4   : > { %v761_v41 = vpop.permute.xlu0 %760 }
  0xf5   : > { %v1014_v49 = vadd.f32 %v1013_v30, %v761_v41  ;;  %v685_v30 = vld [vmem:[%s7465_s20 + $0xe0] sm:$0xff] }
  0xf6   : > { %1063 = vmatmul.f32.gmra.mxu0 %v675_v35 }
  0xfb   : > { %v1019_v38 = vpop.f32.mrf.mxu0  ;;  %v5788_v5 = vpop.permute.xlu2 %990 }
  0xfc   : > { %v766_v48 = vpop.permute.xlu0 %765 }
  0xfd   : > { %v1017_v53 = vadd.f32 %v1016_v34, %v766_v48  ;;  %v686_v34 = vld [vmem:[%s7465_s20 + $0xe8] sm:$0xff] }
  0xfe   : > { %1066 = vmatmul.f32.gmra.mxu0 %v676_v39 }
 0x103   : > { %v1022_v42 = vpop.f32.mrf.mxu0 }
 0x104   : > { %v771_v54 = vpop.permute.xlu0 %770 }
 0x105   : > { %v1020_v60 = vadd.f32 %v1019_v38, %v771_v54  ;;  %v687_v38 = vld [vmem:[%s7465_s20 + $0xf0] sm:$0xff] }
 0x106   : > { %1069 = vmatmul.f32.gmra.mxu0 %v677_v43 }
 0x107   : > { %1154 = vxpose.xlu2.b32.start [1/8] (short) (narrow) %v1011_v44, 16  ;;  %v689_v44 = vld [vmem:[%s7465_s20 + $0x100] sm:$0xff] }
 0x10b   : > { %v1025_v46 = vpop.f32.mrf.mxu0 }
 0x10c   : > { %v776_v62 = vpop.permute.xlu0 %775 }
 0x10d   : > { %v1023_v3 = vadd.f32 %v1022_v42, %v776_v62  ;;  %v688_v42 = vld [vmem:[%s7465_s20 + $0xf8] sm:$0xff] }
 0x10e   : > { %1072 = vmatmul.f32.gmra.mxu0 %v678_v47  ;;  %v690_v47 = vld [vmem:[%s7465_s20 + $0x108] sm:$0xff] }
 0x10f   : > { %1155 = vxpose.xlu2.b32.cont [2/8] (short) (narrow) %v1014_v49, 16 }
 0x113   : > { %v1028_v51 = vpop.f32.mrf.mxu0 }
 0x114   : > { %v781_v6 = vpop.permute.xlu0 %780 }
 0x115   : > { %v1026_v12 = vadd.f32 %v1025_v46, %v781_v6  ;;  %v697_v6 = vld [vmem:[%s7465_s20 + $0x140] sm:$0xff] }
 0x116   : > { %1075 = vmatmul.f32.gmra.mxu0 %v679_v52 }
 0x117   : > { %1156 = vxpose.xlu2.b32.cont [3/8] (short) (narrow) %v1017_v53, 16  ;;  %v692_v53 = vld [vmem:[%s7465_s20 + $0x118] sm:$0xff] }
 0x11b   : > { %v1031_v55 = vpop.f32.mrf.mxu0 }
 0x11e   : > { %1078 = vmatmul.f32.gmra.mxu0 %v680_v57 }
 0x11f   : > { %1157 = vxpose.xlu2.b32.cont [4/8] (short) (narrow) %v1020_v60, 16  ;;  %v694_v60 = vld [vmem:[%s7465_s20 + $0x128] sm:$0xff] }
 0x123   : > { %v1034_v63 = vpop.f32.mrf.mxu0 }
 0x124   : > { %v1035_v2 = vadd.f32 %v1034_v63, %v5658_v59  ;;  %v786_v59 = vpop.permute.xlu2 %785  ;;  %v695_v63 = vld [vmem:[%s7465_s20 + $0x130] sm:$0xff] }
 0x125   : > { %v1029_v19 = vadd.f32 %v1028_v51, %v786_v59  ;;  %v691_v51 = vld [vmem:[%s7465_s20 + $0x110] sm:$0xff]  ;;  %v733_v59 = vld [vmem:[%s7397_s2 + $0xe0] sm:$0xff] }
 0x126   : > { %1081 = vmatmul.f32.gmra.mxu0 %v681_v1  ;;  %1342 = vxpose.xlu1.b32.start [1/8] (short) (narrow) %v1035_v2, 16  ;;  %v696_v2 = vld [vmem:[%s7465_s20 + $0x138] sm:$0xff] }
 0x127   : > { %1158 = vxpose.xlu2.b32.cont [5/8] (short) (narrow) %v1023_v3, 16 }
 0x12b   : > { %v1037_v8 = vpop.f32.mrf.mxu0 }
 0x12c   : > { %v1038_v10 = vadd.f32 %v1037_v8, %v5671_v0  ;;  %v791_v22 = vpop.permute.xlu2 %790  ;;  %v684_v0 = vld [vmem:[%s7465_s20 + $0xd8] sm:$0xff] }
 0x12d   : > { %v1032_v26 = vadd.f32 %v1031_v55, %v791_v22  ;;  %v693_v55 = vld [vmem:[%s7465_s20 + $0x120] sm:$0xff]  ;;  %v2045_v22 = vld [vmem:[%s7401_s6 + $0x30] sm:$0xff] }
 0x12e   : > { %1084 = vmatmul.f32.gmra.mxu0 %v682_v9  ;;  %1343 = vxpose.xlu1.b32.cont [2/8] (short) (narrow) %v1038_v10, 16  ;;  %v5860_v9 = vpop.permute.xlu0 %985  ;;  %v2051_v10 = vld [vmem:[%s7401_s6 + $0x60] sm:$0xff] }
 0x12f   : > { %1159 = vxpose.xlu2.b32.cont [6/8] (short) (narrow) %v1026_v12, 16 }
 0x133   : > { %v1040_v14 = vpop.f32.mrf.mxu0 }
 0x134   : > { %v1041_v18 = vadd.f32 %v1040_v14, %v806_v13  ;;  %v699_v13 = vld [vmem:[%s7465_s20 + $0x150] sm:$0xff]  ;;  %v2048_v14 = vld [vmem:[%s7401_s6 + $0x48] sm:$0xff] }
 0x136   : > { %1087 = vmatmul.f32.gmra.mxu0 %v683_v16  ;;  %1344 = vxpose.xlu1.b32.cont [3/8] (short) (narrow) %v1041_v18, 16  ;;  %v5876_v16 = vpop.permute.xlu0 %980 }
 0x137   : > { %1160 = vxpose.xlu2.b32.cont [7/8] (short) (narrow) %v1029_v19, 16  ;;  %v700_v19 = vld [vmem:[%s7465_s20 + $0x158] sm:$0xff] }
 0x13b   : > { %v1043_v23 = vpop.f32.mrf.mxu0 }
 0x13c   : > { %v1044_v25 = vadd.f32 %v1043_v23, %v811_v21  ;;  %v1683_v21 = vld [vmem:[%s7399_s4 + $0x78] sm:$0xff] }
 0x13e   : > { %1090 = vmatmul.f32.gmra.mxu0 %v684_v0  ;;  %1345 = vxpose.xlu1.b32.cont [4/8] (short) (narrow) %v1044_v25, 16  ;;  %v5889_v23 = vpop.permute.xlu0 %975  ;;  %v701_v25 = vld [vmem:[%s7465_s20 + $0x160] sm:$0xff] }
 0x13f   : > { %1161 = vxpose.xlu2.b32.end [8/8] (short) (narrow) %v1032_v26, 16  ;;  %v1682_v26 = vld [vmem:[%s7399_s4 + $0x70] sm:$0xff] }
 0x143   : > { %v1046_v28 = vpop.f32.mrf.mxu0 }
 0x144   : > { %v1047_v31 = vadd.f32 %v1046_v28, %v5650_v56  ;;  %v831_v56 = vpop.permute.xlu1 %830  ;;  %v2042_v28 = vld [vmem:[%s7401_s6 + $0x18] sm:$0xff] }
 0x146   : > { %1093 = vmatmul.f32.gmra.mxu0 %v685_v30  ;;  %1346 = vxpose.xlu1.b32.cont [5/8] (short) (narrow) %v1047_v31, 16  ;;  %v911_v30 = vpop.permute.xlu0 %910 }
 0x14b   : > { %v1049_v33 = vpop.f32.mrf.mxu0 }
 0x14c   : > { %v1050_v35 = vadd.f32 %v1049_v33, %v5663_v61  ;;  %v702_v33 = vld [vmem:[%s7465_s20 + $0x168] sm:$0xff] }
 0x14e   : > { %1096 = vmatmul.f32.gmra.mxu0 %v686_v34  ;;  %1347 = vxpose.xlu1.b32.cont [6/8] (short) (narrow) %v1050_v35, 16  ;;  %v1681_v34 = vld [vmem:[%s7399_s4 + $0x68] sm:$0xff]  ;;  %v2039_v35 = vld [vmem:[%s7401_s6] sm:$0xff] }
 0x153   : > { %v1052_v37 = vpop.f32.mrf.mxu0 }
 0x154   : > { %v1053_v39 = vadd.f32 %v1052_v37, %v5690_v7 }
 0x156   : > { %1099 = vmatmul.f32.gmra.mxu0 %v687_v38  ;;  %1348 = vxpose.xlu1.b32.cont [7/8] (short) (narrow) %v1053_v39, 16  ;;  %v703_v38 = vld [vmem:[%s7465_s20 + $0x170] sm:$0xff]  ;;  %v906_v39 = vpop.permute.xlu0 %905 }
 0x15b   : > { %v1055_v41 = vpop.f32.mrf.mxu0 }
 0x15c   : > { %v1056_v43 = vadd.f32 %v1055_v41, %v831_v56  ;;  %v1678_v56 = vld [vmem:[%s7399_s4 + $0x50] sm:$0xff]  ;;  %v2315_v41 = vld [vmem:[%s7403_s8 + $0x18] sm:$0xff] }
 0x15e   : > { %1102 = vmatmul.f32.gmra.mxu0 %v688_v42  ;;  %1349 = vxpose.xlu1.b32.end [8/8] (short) (narrow) %v1056_v43, 16  ;;  %v704_v43 = vld [vmem:[%s7465_s20 + $0x178] sm:$0xff] }
 0x163   : > { %v1058_v61 = vpop.f32.mrf.mxu0 }
 0x164   : > { %v1059_v46 = vadd.f32 %v1058_v61, %v5736_v24 }
 0x166   : > { %1105 = vmatmul.f32.gmra.mxu0 %v689_v44  ;;  %1481 = vxpose.xlu0.b32.start [1/8] (short) (narrow) %v1059_v46, 16  ;;  %v1677_v44 = vld [vmem:[%s7399_s4 + $0x48] sm:$0xff] }
 0x16b   : > { %v1061_v7 = vpop.f32.mrf.mxu0 }
 0x16c   : > { %v1062_v48 = vadd.f32 %v1061_v7, %v5751_v32  ;;  %v2312_v7 = vld [vmem:[%s7403_s8] sm:$0xff] }
 0x16e   : > { %1108 = vmatmul.f32.gmra.mxu0 %v690_v47  ;;  %1482 = vxpose.xlu0.b32.cont [2/8] (short) (narrow) %v1062_v48, 16  ;;  %v901_v47 = vpop.permute.xlu0 %900 }
 0x173   : > { %v1064_v49 = vpop.f32.mrf.mxu0 }
 0x174   : > { %v1065_v52 = vadd.f32 %v1064_v49, %v5746_v29 }
 0x176   : > { %1111 = vmatmul.f32.gmra.mxu0 %v691_v51  ;;  %1483 = vxpose.xlu0.b32.cont [3/8] (short) (narrow) %v1065_v52, 16  ;;  %v1676_v51 = vld [vmem:[%s7399_s4 + $0x40] sm:$0xff] }
 0x177   : > { %v2340_v52 = vld [vmem:[%s7403_s8 + $0xe0] sm:$0xff] }
 0x17b   : > { %v1067_v24 = vpop.f32.mrf.mxu0 }
 0x17c   : > { %v1068_v54 = vadd.f32 %v1067_v24, %v5759_v36 }
 0x17e   : > { %1114 = vmatmul.f32.gmra.mxu0 %v692_v53  ;;  %1484 = vxpose.xlu0.b32.cont [4/8] (short) (narrow) %v1068_v54, 16  ;;  %v1675_v53 = vld [vmem:[%s7399_s4 + $0x38] sm:$0xff] }
 0x17f   : > { %v2343_v54 = vld [vmem:[%s7403_s8 + $0xf8] sm:$0xff] }
 0x183   : > { %v1070_v32 = vpop.f32.mrf.mxu0 }
 0x184   : > { %v1071_v57 = vadd.f32 %v1070_v32, %v5764_v40  ;;  %v5945_v32 = vpop.permute.xlu2 %970 }
 0x186   : > { %1117 = vmatmul.f32.gmra.mxu0 %v693_v55  ;;  %1485 = vxpose.xlu0.b32.cont [5/8] (short) (narrow) %v1071_v57, 16  ;;  %v1674_v57 = vld [vmem:[%s7399_s4 + $0x30] sm:$0xff] }
 0x18b   : > { %v1073_v29 = vpop.f32.mrf.mxu0 }
 0x18c   : > { %v1074_v62 = vadd.f32 %v1073_v29, %v5769_v45  ;;  %v2314_v29 = vld [vmem:[%s7403_s8 + $0x10] sm:$0xff] }
 0x18e   : > { %1120 = vmatmul.f32.gmra.mxu0 %v694_v60  ;;  %1486 = vxpose.xlu0.b32.cont [6/8] (short) (narrow) %v1074_v62, 16  ;;  %v5953_v60 = vpop.permute.xlu2 %965 }
 0x193   : > { %v1076_v36 = vpop.f32.mrf.mxu0 }
 0x194   : > { %v1077_v1 = vadd.f32 %v1076_v36, %v5774_v50  ;;  %v1679_v50 = vld [vmem:[%s7399_s4 + $0x58] sm:$0xff]  ;;  %v1673_v36 = vld [vmem:[%s7399_s4 + $0x28] sm:$0xff] }
 0x196   : > { %1123 = vmatmul.f32.gmra.mxu0 %v695_v63  ;;  %1487 = vxpose.xlu0.b32.cont [7/8] (short) (narrow) %v1077_v1, 16  ;;  %v2347_v63 = vld [vmem:[%s7403_s8 + $0x118] sm:$0xff] }
 0x19b   : > { %v1079_v40 = vpop.f32.mrf.mxu0 }
 0x19c   : > { %v1080_v3 = vadd.f32 %v1079_v40, %v5782_v58  ;;  %v698_v58 = vld [vmem:[%s7465_s20 + $0x148] sm:$0xff]  ;;  %v941_v40 = vpop.permute.xlu1 %940 }
 0x19e   : > { %1126 = vmatmul.f32.gmra.mxu0 %v696_v2  ;;  %1488 = vxpose.xlu0.b32.end [8/8] (short) (narrow) %v1080_v3, 16  ;;  %v5961_v2 = vpop.permute.xlu2 %960  ;;  %v1672_v3 = vld [vmem:[%s7399_s4 + $0x20] sm:$0xff] }
 0x1a3   : > { %v5847_v45 = vpop.f32.mrf.mxu0 }
 0x1a6   : > { %1129 = vmatmul.f32.gmra.mxu0 %v697_v6  ;;  %v2345_v6 = vld [vmem:[%s7403_s8 + $0x108] sm:$0xff] }
 0x1a8   : > { %1741 = vperm.xlu2 %5004, %v1679_v50   ;;  %v1680_v50 = vld [vmem:[%s7399_s4 + $0x60] sm:$0xff] }
 0x1ab   : > { %v5855_v8 = vpop.f32.mrf.mxu0 }
 0x1ae   : > { %1132 = vmatmul.f32.gmra.mxu0 %v698_v58 }
 0x1b0   : > { %2117 = vperm.xlu2 %5004, %v2051_v10   ;;  %v1671_v10 = vld [vmem:[%s7399_s4 + $0x18] sm:$0xff] }
 0x1b3   : > { %v5865_v12 = vpop.f32.mrf.mxu0 }
 0x1b6   : > { %1135 = vmatmul.f32.gmra.mxu0 %v699_v13  ;;  %v926_v13 = vpop.permute.xlu1 %925 }
 0x1b8   : > { %895 = vperm.xlu1 %5003, %v733_v59   ;;  %2102 = vperm.xlu2 %5004, %v2048_v14   ;;  %v2349_v59 = vld [vmem:[%s7403_s8 + $0x128] sm:$0xff]  ;;  %v5978_v14 = vpop.permute.xlu2 %955 }
 0x1bb   : > { %v5878_v18 = vpop.f32.mrf.mxu0 }
 0x1be   : > { %1138 = vmatmul.f32.gmra.mxu0 %v700_v19  ;;  %v2050_v19 = vld [vmem:[%s7401_s6 + $0x58] sm:$0xff] }
 0x1c0   : > { %1761 = vperm.xlu1 %5003, %v1683_v21   ;;  %2087 = vperm.xlu2 %5004, %v2045_v22   ;;  %v1670_v22 = vld [vmem:[%s7399_s4 + $0x10] sm:$0xff] }
 0x1c3   : > { %v5891_v0 = vpop.f32.mrf.mxu0 }
 0x1c6   : > { %1141 = vmatmul.f32.gmra.mxu0 %v701_v25  ;;  %v2348_v25 = vld [vmem:[%s7403_s8 + $0x120] sm:$0xff] }
 0x1c8   : > { %1756 = vperm.xlu1 %5003, %v1682_v26   ;;  %2072 = vperm.xlu2 %5004, %v2042_v28   ;;  %v886_v28 = vpop.permute.xlu2 %885 }
 0x1ca   : > { %v1358_v26 = vpop.trf.xlu1 }
 0x1cb   : > { %v1097_v31 = vpop.f32.mrf.mxu0 }
 0x1cc   : > { %v1098_v48 = vadd.f32 %v1097_v31, %v901_v47 }
 0x1ce   : > { %1144 = vmatmul.f32.gmra.mxu0 %v702_v33 }
 0x1d0   : > { %1751 = vperm.xlu1 %5003, %v1681_v34   ;;  %2057 = vperm.xlu2 %5004, %v2039_v35   ;;  %v1669_v34 = vld [vmem:[%s7399_s4 + $0x8] sm:$0xff] }
 0x1d3   : > { %v1100_v37 = vpop.f32.mrf.mxu0 }
 0x1d4   : > { %v1101_v46 = vadd.f32 %v1100_v37, %v906_v39  ;;  %v2323_v37 = vld [vmem:[%s7403_s8 + $0x58] sm:$0xff]  ;;  %v1359_v39 = vpop.trf.xlu1 }
 0x1d6   : > { %1147 = vmatmul.f32.gmra.mxu0 %v703_v38 }
 0x1d8   : > { %1736 = vperm.xlu1 %5003, %v1678_v56   ;;  %2377 = vperm.xlu2 %5004, %v2315_v41   ;;  %v876_v41 = vpop.permute.xlu2 %875 }
 0x1db   : > { %v1103_v42 = vpop.f32.mrf.mxu0 }
 0x1dc   : > { %v1104_v61 = vadd.f32 %v1103_v42, %v911_v30  ;;  %v2047_v30 = vld [vmem:[%s7401_s6 + $0x40] sm:$0xff] }
 0x1dd   : > { %v1668_v42 = vld [vmem:[%s7399_s4] sm:$0xff] }
 0x1de   : > { %1150 = vmatmul.f32.gmra.mxu0 %v704_v43  ;;  %4880 = vmatpush.msra.mxu1 %v1104_v61  ;;  %v891_v43 = vpop.permute.xlu0 %890 }
 0x1df   : > { %1201 = vmatpush.msrb.mxu0 %v1104_v61 }
 0x1e0   : > { %4881 = vmatpush.msra.mxu1 %v1101_v46  ;;  %1731 = vperm.xlu1 %5003, %v1677_v44   ;;  %v2351_v44 = vld [vmem:[%s7403_s8 + $0x138] sm:$0xff]  ;;  %v1170_v47 = vpop.trf.xlu2 }
 0x1e1   : > { %1202 = vmatpush.msrb.mxu0 %v1101_v46  ;;  %2362 = vperm.xlu2 %5004, %v2312_v7  }
 0x1e2   : > { %4882 = vmatpush.msra.mxu1 %v1098_v48 }
 0x1e3   : > { %1203 = vmatpush.msrb.mxu0 %v1098_v48  ;;  %v5929_v49 = vpop.f32.mrf.mxu0 }
 0x1e4   : > { %v1107_v7 = vadd.f32 %v5929_v49, %v5741_v27  ;;  %v1089_v27 = vadd.f32 %v5865_v12, %v886_v28 }
 0x1e6   : > { %v881_v49 = vpop.permute.xlu0 %880 }
 0x1e8   : > { %1726 = vperm.xlu1 %5003, %v1676_v51   ;;  %v2054_v51 = vld [vmem:[%s7401_s6 + $0x78] sm:$0xff]  ;;  %v1171_v12 = vpop.trf.xlu2 }
 0x1e9   : > { %2502 = vperm.xlu2 %5004, %v2340_v52   ;;  %v2339_v52 = vld [vmem:[%s7403_s8 + $0xd8] sm:$0xff] }
 0x1eb   : > { %v5937_v24 = vpop.f32.mrf.mxu0 }
 0x1f0   : > { %1721 = vperm.xlu1 %5003, %v1675_v53   ;;  %v2053_v53 = vld [vmem:[%s7401_s6 + $0x70] sm:$0xff] }
 0x1f1   : > { %2517 = vperm.xlu2 %5004, %v2343_v54   ;;  %v2052_v54 = vld [vmem:[%s7401_s6 + $0x68] sm:$0xff] }
 0x1f3   : > { %v1112_v55 = vpop.f32.mrf.mxu0 }
 0x1f4   : > { %v1113_v61 = vadd.f32 %v1112_v55, %v926_v13  ;;  %v2355_v55 = vld [vmem:[%s7403_s8 + $0x158] sm:$0xff]  ;;  %v2346_v13 = vld [vmem:[%s7403_s8 + $0x110] sm:$0xff] }
 0x1f8   : > { %1716 = vperm.xlu1 %5003, %v1674_v57   ;;  %v2313_v57 = vld [vmem:[%s7403_s8 + $0x8] sm:$0xff] }
 0x1f9   : > { %2372 = vperm.xlu2 %5004, %v2314_v29   ;;  %v2049_v29 = vld [vmem:[%s7401_s6 + $0x50] sm:$0xff] }
 0x1fb   : > { %v1115_v62 = vpop.f32.mrf.mxu0 }
 0x200   : > { %1711 = vperm.xlu1 %5003, %v1673_v36   ;;  %v2316_v36 = vld [vmem:[%s7403_s8 + $0x20] sm:$0xff] }
 0x201   : > { %2537 = vperm.xlu2 %5004, %v2347_v63   ;;  %v2046_v63 = vld [vmem:[%s7401_s6 + $0x38] sm:$0xff] }
 0x203   : > { %v1118_v1 = vpop.f32.mrf.mxu0 }
 0x204   : > { %v1119_v56 = vadd.f32 %v1118_v1, %v5701_v11  ;;  %v1110_v11 = vadd.f32 %v5937_v24, %v5717_v17  ;;  %v1092_v17 = vadd.f32 %v5878_v18, %v891_v43  ;;  %v1086_v18 = vadd.f32 %v5855_v8, %v881_v49  ;;  %v2326_v8 = vld [vmem:[%s7403_s8 + $0x70] sm:$0xff]  ;;  %v2352_v1 = vld [vmem:[%s7403_s8 + $0x140] sm:$0xff]  ;;  %v3958_v43 = vld [vmem:[%s7405_s10 + $0x68] sm:$0xff] }
 0x205   : > { %v1083_v24 = vadd.f32 %v5847_v45, %v876_v41  ;;  %v2337_v45 = vld [vmem:[%s7403_s8 + $0xc8] sm:$0xff]  ;;  %v3959_v41 = vld [vmem:[%s7405_s10 + $0x70] sm:$0xff]  ;;  %v2356_v49 = vld [vmem:[%s7403_s8 + $0x160] sm:$0xff] }
 0x208   : > { %1706 = vperm.xlu1 %5003, %v1672_v3   ;;  %v2043_v3 = vld [vmem:[%s7401_s6 + $0x20] sm:$0xff] }
 0x209   : > { %2527 = vperm.xlu2 %5004, %v2345_v6   ;;  %v2328_v6 = vld [vmem:[%s7403_s8 + $0x80] sm:$0xff] }
 0x20b   : > { %v1121_v58 = vpop.f32.mrf.mxu0 }
 0x20c   : > { %1746 = vperm.xlu0 %5002, %v1680_v50   ;;  %v1122_v38 = vadd.f32 %v1121_v58, %v941_v40  ;;  %v2342_v40 = vld [vmem:[%s7403_s8 + $0xf0] sm:$0xff]  ;;  %v2319_v50 = vld [vmem:[%s7403_s8 + $0x38] sm:$0xff]  ;;  %v2040_v58 = vld [vmem:[%s7401_s6 + $0x8] sm:$0xff] }
 0x210   : > { %1701 = vperm.xlu1 %5003, %v1671_v10   ;;  %v2332_v10 = vld [vmem:[%s7403_s8 + $0xa0] sm:$0xff] }
 0x211   : > { %2547 = vperm.xlu2 %5004, %v2349_v59   ;;  %v2338_v59 = vld [vmem:[%s7403_s8 + $0xd0] sm:$0xff] }
 0x213   : > { %v1124_v21 = vpop.f32.mrf.mxu0 }
 0x214   : > { %2112 = vperm.xlu0 %5002, %v2050_v19   ;;  %v1125_v35 = vadd.f32 %v1124_v21, %v5712_v15  ;;  %v1116_v15 = vadd.f32 %v1115_v62, %v5725_v20  ;;  %v2041_v20 = vld [vmem:[%s7401_s6 + $0x10] sm:$0xff]  ;;  %v2353_v62 = vld [vmem:[%s7403_s8 + $0x148] sm:$0xff] }
 0x215   : > { %v2358_v21 = vld [vmem:[%s7403_s8 + $0x170] sm:$0xff] }
 0x218   : > { %1696 = vperm.xlu1 %5003, %v1670_v22   ;;  %v2322_v22 = vld [vmem:[%s7403_s8 + $0x50] sm:$0xff] }
 0x219   : > { %2542 = vperm.xlu2 %5004, %v2348_v25   ;;  %v2336_v25 = vld [vmem:[%s7403_s8 + $0xc0] sm:$0xff] }
 0x21b   : > { %v1127_v31 = vpop.f32.mrf.mxu0 }
 0x21c   : > { %2097 = vperm.xlu0 %5002, %v2047_v30   ;;  %v1128_v33 = vadd.f32 %v1127_v31, %v5682_v4  ;;  %v2044_v4 = vld [vmem:[%s7401_s6 + $0x28] sm:$0xff]  ;;  %v2344_v30 = vld [vmem:[%s7403_s8 + $0x100] sm:$0xff] }
 0x21d   : > { %v2341_v31 = vld [vmem:[%s7403_s8 + $0xe8] sm:$0xff] }
 0x21e   : > { %1388 = vmatpush.msra.mxu3 %v1128_v33  ;;  %v2335_v33 = vld [vmem:[%s7403_s8 + $0xb8] sm:$0xff] }
 0x220   : > { %1389 = vmatpush.msra.mxu3 %v1125_v35  ;;  %1691 = vperm.xlu1 %5003, %v1669_v34   ;;  %v2320_v34 = vld [vmem:[%s7403_s8 + $0x40] sm:$0xff] }
 0x221   : > { %2417 = vperm.xlu2 %5004, %v2323_v37   ;;  %v2317_v37 = vld [vmem:[%s7403_s8 + $0x28] sm:$0xff] }
 0x222   : > { %1390 = vmatpush.msra.mxu3 %v1122_v38  ;;  %v3960_v38 = vld [vmem:[%s7405_s10 + $0x78] sm:$0xff] }
 0x223   : > { %v6093_v19 = vpop.f32.mrf.mxu0 }
 0x224   : > { %1391 = vmatpush.msra.mxu3 %v1119_v56  ;;  %2082 = vperm.xlu0 %5002, %v2044_v4   ;;  %v2318_v56 = vld [vmem:[%s7403_s8 + $0x30] sm:$0xff] }
 0x226   : > { %1392 = vmatpush.msra.mxu3 %v1116_v15  ;;  %v2350_v15 = vld [vmem:[%s7403_s8 + $0x130] sm:$0xff] }
 0x228   : > { %1393 = vmatpush.msra.mxu3 %v1113_v61  ;;  %1686 = vperm.xlu1 %5003, %v1668_v42   ;;  %v2325_v61 = vld [vmem:[%s7403_s8 + $0x68] sm:$0xff] }
 0x229   : > { %2557 = vperm.xlu2 %5004, %v2351_v44   ;;  %v3957_v44 = vld [vmem:[%s7405_s10 + $0x60] sm:$0xff] }
 0x22a   : > { %1394 = vmatpush.msra.mxu3 %v1110_v11  ;;  %v896_v46 = vpop.permute.xlu1 %895 }
 0x22b   : > { %v1095_v48 = vadd.f32 %v5891_v0, %v896_v46  ;;  %v2321_v0 = vld [vmem:[%s7403_s8 + $0x48] sm:$0xff]  ;;  %v6107_v28 = vpop.f32.mrf.mxu0  ;;  %v3956_v46 = vld [vmem:[%s7405_s10 + $0x58] sm:$0xff] }
 0x22c   : > { %1395 = vmatpush.msra.mxu3 %v1107_v7  ;;  %2067 = vperm.xlu0 %5002, %v2041_v20   ;;  %v2327_v20 = vld [vmem:[%s7403_s8 + $0x78] sm:$0xff]  ;;  %v2354_v7 = vld [vmem:[%s7403_s8 + $0x150] sm:$0xff] }
 0x22d   : > { %1204 = vmatpush.msrb.mxu0 %v1095_v48  ;;  %4883 = vmatpush.msra.mxu1 %v1095_v48  ;;  %v3953_v48 = vld [vmem:[%s7405_s10 + $0x40] sm:$0xff] }
 0x22e   : > { %4737 = vmatmul.msk.f32.vlgmr.msra.gmra.mxu3 %vm1186_vm0, %v1358_v26  ;;  %v2333_v26 = vld [vmem:[%s7403_s8 + $0xa8] sm:$0xff] }
 0x22f   : > { %1205 = vmatpush.msrb.mxu0 %v1092_v17  ;;  %4884 = vmatpush.msra.mxu1 %v1092_v17  ;;  %v2330_v17 = vld [vmem:[%s7403_s8 + $0x90] sm:$0xff] }
 0x230   : > { %2132 = vperm.xlu1 %5003, %v2054_v51  }
 0x231   : > { %1206 = vmatpush.msrb.mxu0 %v1089_v27  ;;  %4885 = vmatpush.msra.mxu1 %v1089_v27  ;;  %v3951_v27 = vld [vmem:[%s7405_s10 + $0x30] sm:$0xff] }
 0x232   : > { %2407 = vperm.xlu2 %5004, %v2321_v0  }
 0x233   : > { %1207 = vmatpush.msrb.mxu0 %v1086_v18  ;;  %4886 = vmatpush.msra.mxu1 %v1086_v18  ;;  %v6121_v35 = vpop.f32.mrf.mxu0 }
 0x234   : > { %2497 = vperm.xlu0 %5002, %v2339_v52  }
 0x235   : > { %1208 = vmatpush.msrb.mxu0 %v1083_v24  ;;  %4887 = vmatpush.msra.mxu1 %v1083_v24 }
 0x236   : > { %4738 = vmatmul.msk.f32.gmra.mxu3 %vm1186_vm0, %v1359_v39  ;;  %4720 = vmatmul.msk.f32.vlgmr.msra.gmra.mxu1 %vm1186_vm0, %v1171_v12  ;;  %v2324_v39 = vld [vmem:[%s7403_s8 + $0x60] sm:$0xff] }
 0x237   : > { %4719 = vmatmul.msk.f32.vlgmr.msrb.gmra.mxu0 %vm1186_vm0, %v1170_v47 }
 0x238   : > { %2127 = vperm.xlu1 %5003, %v2053_v53  }
 0x23a   : > { %2432 = vperm.xlu2 %5004, %v2326_v8   ;;  %v3949_v8 = vld [vmem:[%s7405_s10 + $0x20] sm:$0xff] }
 0x23b   : > { %v6132_v4 = vpop.f32.mrf.mxu0 }
 0x23c   : > { %2487 = vperm.xlu0 %5002, %v2337_v45  }
 0x240   : > { %2122 = vperm.xlu1 %5003, %v2052_v54   ;;  %v2331_v54 = vld [vmem:[%s7403_s8 + $0x98] sm:$0xff] }
 0x242   : > { %2577 = vperm.xlu2 %5004, %v2355_v55  }
 0x243   : > { %v6143_v42 = vpop.f32.mrf.mxu0 }
 0x244   : > { %2367 = vperm.xlu0 %5002, %v2313_v57   ;;  %v1221_v57 = vstv %s1220_s9  ;;  %s4758_s9 = sld [smem:[#allocation12 + $0x2]] }
 0x248   : > { %2107 = vperm.xlu1 %5003, %v2049_v29  }
 0x24a   : > { %2567 = vperm.xlu2 %5004, %v2353_v62   ;;  %v1225_v62 = vld [vmem:[#allocation9 + $0x8] sm:$0xff] }
 0x24b   : > { %v6154_v11 = vpop.f32.mrf.mxu0 }
 0x24c   : > { %2382 = vperm.xlu0 %5002, %v2316_v36  }
 0x250   : > { %2092 = vperm.xlu1 %5003, %v2046_v63  }
 0x252   : > { %2562 = vperm.xlu2 %5004, %v2352_v1   ;;  %v1224_v1 = vld [vmem:[#allocation9] sm:$0xff] }
 0x253   : > { %v6165_v47 = vpop.f32.mrf.mxu0 }
 0x254   : > { %2512 = vperm.xlu0 %5002, %v2342_v40  }
 0x258   : > { %2077 = vperm.xlu1 %5003, %v2043_v3   ;;  %v3947_v3 = vld [vmem:[%s7405_s10 + $0x10] sm:$0xff] }
 0x25a   : > { %2442 = vperm.xlu2 %5004, %v2328_v6  }
 0x25b   : > { %v1151_v51 = vpop.f32.mrf.mxu0 }
 0x25c   : > { %2397 = vperm.xlu0 %5002, %v2319_v50  }
 0x260   : > { %2062 = vperm.xlu1 %5003, %v2040_v58   ;;  %v1408_v58 = vstv %s4739_s17 }
 0x262   : > { %2462 = vperm.xlu2 %5004, %v2332_v10  }
 0x264   : > { %2532 = vperm.xlu0 %5002, %v2346_v13   ;;  %v2359_v13 = vld [vmem:[%s7403_s8 + $0x178] sm:$0xff] }
 0x268   : > { %2492 = vperm.xlu1 %5003, %v2338_v59  }
 0x26a   : > { %2592 = vperm.xlu2 %5004, %v2358_v21   ;;  %v1413_v21 = vld [vmem:[#allocation9 + $0x18] sm:$0xff] }
 0x26c   : > { %2412 = vperm.xlu0 %5002, %v2322_v22  }
 0x270   : > { %2482 = vperm.xlu1 %5003, %v2336_v25  }
 0x272   : > { %2467 = vperm.xlu2 %5004, %v2333_v26   ;;  %v6192_v26 = vld [vmem:[%s5521_s18] sm:$0xff] }
 0x273   : > { %7466 = vst [vmem:[#allocation29_spill] sm:$0xff] %v6192_v26 }
 0x274   : > { %2522 = vperm.xlu0 %5002, %v2344_v30   ;;  %v1412_v30 = vld [vmem:[#allocation9 + $0x10] sm:$0xff] }
 0x278   : > { %2507 = vperm.xlu1 %5003, %v2341_v31  }
 0x27a   : > { %2477 = vperm.xlu2 %5004, %v2335_v33  }
 0x27c   : > { %2402 = vperm.xlu0 %5002, %v2320_v34   ;;  %v3945_v34 = vld [vmem:[%s7405_s10] sm:$0xff] }
 0x280   : > { %2387 = vperm.xlu1 %5003, %v2317_v37   ;;  %v2329_v37 = vld [vmem:[%s7403_s8 + $0x88] sm:$0xff] }
 0x282   : > { %4038 = vperm.xlu2 %5004, %v3960_v38   ;;  %v1152_v38 = vadd.f32 %v1151_v51, %v5788_v5  ;;  %v6216_v5 = vld [vmem:[%s5521_s18 + $0x8] sm:$0xff] }
 0x283   : > { %7468 = vst [vmem:[#allocation31_spill] sm:$0xff] %v6216_v5  ;;  %v6310_v51 = vld [vmem:[%s5521_s18 + $0x48] sm:$0xff] }
 0x284   : > { %2422 = vperm.xlu0 %5002, %v2324_v39   ;;  %v6204_v39 = vld [vmem:[%s5521_s18 + $0x60] sm:$0xff]  ;;  %7475 = vst [vmem:[#allocation38_spill] sm:$0xff] %v6310_v51 }
 0x288   : > { %2392 = vperm.xlu1 %5003, %v2318_v56   ;;  %v6209_v56 = vld [vmem:[%s5521_s18 + $0x20] sm:$0xff] }
 0x289   : > { %7467 = vst [vmem:[#allocation30_spill] sm:$0xff] %v6209_v56 }
 0x28a   : > { %4033 = vperm.xlu2 %5004, %v3959_v41   ;;  %v1149_v41 = vadd.f32 %v6165_v47, %v5860_v9  ;;  %v4317_v9 = vld [vmem:[%s7407_s12 + $0x8] sm:$0xff]  ;;  %v6299_v47 = vld [vmem:[%s5521_s18 + $0x40] sm:$0xff] }
 0x28b   : > { %7474 = vst [vmem:[#allocation37_spill] sm:$0xff] %v6299_v47 }
 0x28c   : > { %2552 = vperm.xlu0 %5002, %v2350_v15   ;;  %v1146_v15 = vadd.f32 %v6154_v11, %v5876_v16  ;;  %v6235_v16 = vld [vmem:[%s5521_s18 + $0x68] sm:$0xff] }
 0x28d   : > { %v6240_v11 = vld [vmem:[%s5521_s18 + $0x28] sm:$0xff] }
 0x28e   : > { %7469 = vst [vmem:[#allocation32_spill] sm:$0xff] %v6240_v11 }
 0x292   : > { %4028 = vperm.xlu2 %5004, %v3958_v43   ;;  %v1143_v43 = vadd.f32 %v6143_v42, %v5889_v23  ;;  %v1137_v23 = vadd.f32 %v6121_v35, %v5953_v60  ;;  %v4319_v60 = vld [vmem:[%s7407_s12 + $0x18] sm:$0xff]  ;;  %v1131_v35 = vadd.f32 %v6093_v19, %v5978_v14  ;;  %v6261_v42 = vld [vmem:[%s5521_s18 + $0x70] sm:$0xff]  ;;  %v4321_v14 = vld [vmem:[%s7407_s12 + $0x28] sm:$0xff] }
 0x293   : > { %v6281_v19 = vld [vmem:[%s5521_s18 + $0x78] sm:$0xff] }
 0x294   : > { %2427 = vperm.xlu0 %5002, %v2325_v61   ;;  %v2334_v61 = vld [vmem:[%s7403_s8 + $0xb0] sm:$0xff] }
 0x29a   : > { %4023 = vperm.xlu2 %5004, %v3957_v44   ;;  %v1140_v44 = vadd.f32 %v6132_v4, %v5945_v32  ;;  %v6247_v32 = vld [vmem:[%s5521_s18 + $0x10] sm:$0xff]  ;;  %v1134_v4 = vadd.f32 %v6107_v28, %v5961_v2  ;;  %v6271_v2 = vld [vmem:[%s5521_s18 + $0x18] sm:$0xff] }
 0x29b   : > { %7470 = vst [vmem:[#allocation33_spill] sm:$0xff] %v6247_v32  ;;  %v6286_v28 = vld [vmem:[%s5521_s18 + $0x38] sm:$0xff] }
 0x29c   : > { %2437 = vperm.xlu0 %5002, %v2327_v20   ;;  %v6266_v20 = vld [vmem:[%s5521_s18 + $0x30] sm:$0xff]  ;;  %7472 = vst [vmem:[#allocation35_spill] sm:$0xff] %v6271_v2 }
 0x29d   : > { %7471 = vst [vmem:[#allocation34_spill] sm:$0xff] %v6266_v20 }
 0x29e   : > { %7473 = vst [vmem:[#allocation36_spill] sm:$0xff] %v6286_v28 }
 0x2a2   : > { %4018 = vperm.xlu2 %5004, %v3956_v46   ;;  %v4323_v46 = vld [vmem:[%s7407_s12 + $0x38] sm:$0xff] }
 0x2a4   : > { %2572 = vperm.xlu0 %5002, %v2354_v7   ;;  %v1497_v7 = vpop.trf.xlu0 }
 0x2aa   : > { %4003 = vperm.xlu2 %5004, %v3953_v48   ;;  %v4325_v48 = vld [vmem:[%s7407_s12 + $0x48] sm:$0xff] }
 0x2ac   : > { %2452 = vperm.xlu0 %5002, %v2330_v17   ;;  %v1498_v17 = vpop.trf.xlu0 }
 0x2b1   : > { %v1397_v0 = vpop.f32.mrf.mxu3 }
 0x2b2   : > { %3993 = vperm.xlu2 %5004, %v3951_v27   ;;  %v1403_v53 = vmul.f32 0.015625, %v1397_v0  ;;  %v4327_v27 = vld [vmem:[%s7407_s12 + $0x58] sm:$0xff]  ;;  %v6320_v0 = vld [vmem:[%s5521_s18 + $0x50] sm:$0xff] }
 0x2b3   : > { %v1213_v18 = vpop.f32.mrf.mxu1 }
 0x2b4   : > { %v1217_v52 = vmul.f32 0.015625, %v1213_v18  ;;  %2582 = vperm.xlu0 %5002, %v2356_v49   ;;  %v1210_v24 = vpop.f32.mrf.mxu0  ;;  %v4329_v49 = vld [vmem:[%s7407_s12 + $0x68] sm:$0xff]  ;;  %v6330_v18 = vld [vmem:[%s5521_s18 + $0x58] sm:$0xff] }
 0x2b5   : > { %v1216_v12 = vmul.f32 0.015625, %v1210_v24 }
 0x2b6   : > { %5005 = vtanh.f32 %v1217_v52  ;;  %v4331_v52 = vld [vmem:[%s7407_s12 + $0x78] sm:$0xff] }
 0x2b7   : > { %5007 = vtanh.f32 %v1216_v12 }
 0x2b8   : > { %5009 = vtanh.f32 %v1403_v53 }
 0x2b9   : > { %v1400_v45 = vpop.f32.mrf.mxu3 }
 0x2ba   : > { %v1404_v55 = vmul.f32 0.015625, %v1400_v45  ;;  %3983 = vperm.xlu2 %5004, %v3949_v8  }
 0x2bc   : > { %v5006_v29 = vpop.eup %5005  ;;  %5011 = vtanh.f32 %v1404_v55  ;;  %2457 = vperm.xlu0 %5002, %v2331_v54  }
 0x2bd   : > { %v5008_v36 = vpop.eup %5007  ;;  %v1223_v63 = vmul.f32 %v5006_v29, %v1221_v57 }
 0x2be   : > { %v1222_v40 = vmul.f32 %v5008_v36, %v1221_v57  ;;  %v5010_v50 = vpop.eup %5009 }
 0x2bf   : > { %v1227_v6 = vadd.f32 %v1225_v62, %v1223_v63  ;;  %v1409_v25 = vmul.f32 %v5010_v50, %v1408_v58 }
 0x2c0   : > { %v1226_v10 = vadd.f32 %v1224_v1, %v1222_v40 }
 0x2c1   : > { %1291 = vmatpush.msra.mxu2 %v1227_v6  ;;  %v1414_v33 = vadd.f32 %v1412_v30, %v1409_v25  ;;  %v1551_v30 = vld [vmem:[#allocation9 + $0x20] sm:$0xff] }
 0x2c2   : > { %v5012_v59 = vpop.eup %5011  ;;  %3973 = vperm.xlu2 %5004, %v3947_v3  }
 0x2c3   : > { %v1410_v22 = vmul.f32 %v5012_v59, %v1408_v58  ;;  %1292 = vmatpush.msra.mxu2 %v1226_v10  ;;  %v1547_v58 = vstv %s4758_s9 }
 0x2c4   : > { %2597 = vperm.xlu0 %5002, %v2359_v13   ;;  %4721 = vmatmul.msk.f32.vlgmr.msra.gmra.mxu2 %vm1228_vm1, %v6192_v26  ;;  %v1552_v13 = vld [vmem:[#allocation9 + $0x28] sm:$0xff] }
 0x2c5   : > { %v1415_v31 = vadd.f32 %v1413_v21, %v1410_v22 }
 0x2c7   : > { %1430 = vmatpush.msra.mxu0 %v1415_v31  ;;  %4888 = vmatpush.msrb.mxu1 %v1415_v31 }
 0x2c8   : > { %4889 = vmatpush.msrb.mxu3 %v1415_v31 }
 0x2c9   : > { %1431 = vmatpush.msra.mxu0 %v1414_v33  ;;  %4890 = vmatpush.msrb.mxu1 %v1414_v33 }
 0x2ca   : > { %4891 = vmatpush.msrb.mxu3 %v1414_v33  ;;  %3963 = vperm.xlu2 %5004, %v3945_v34  }
 0x2cb   : > { %4752 = vmatmul.msk.f32.vlgmr.msrb.gmra.mxu3 %vm1228_vm1, %v6204_v39  ;;  %4744 = vmatmul.msk.f32.vlgmr.msrb.gmra.mxu1 %vm1228_vm1, %v6209_v56 }
 0x2cc   : > { %1527 = vmatpush.msra.mxu3 %v1152_v38  ;;  %2447 = vperm.xlu0 %5002, %v2329_v37  }
 0x2cd   : > { %4722 = vmatmul.msk.f32.gmra.mxu2 %vm1228_vm1, %v6216_v5  ;;  %4740 = vmatmul.msk.f32.vlgmr.msra.gmra.mxu0 %vm1228_vm1, %v6192_v26 }
 0x2ce   : > { %1528 = vmatpush.msra.mxu3 %v1149_v41 }
 0x2d0   : > { %1529 = vmatpush.msra.mxu3 %v1146_v15 }
 0x2d2   : > { %1530 = vmatpush.msra.mxu3 %v1143_v43  ;;  %4339 = vperm.xlu2 %5004, %v4317_v9  }
 0x2d3   : > { %4753 = vmatmul.msk.f32.gmra.mxu3 %vm1228_vm1, %v6235_v16  ;;  %4745 = vmatmul.msk.f32.gmra.mxu1 %vm1228_vm1, %v6240_v11 }
 0x2d4   : > { %1531 = vmatpush.msra.mxu3 %v1140_v44  ;;  %2472 = vperm.xlu0 %5002, %v2334_v61  }
 0x2d5   : > { %4723 = vmatmul.msk.f32.gmra.mxu2 %vm1228_vm1, %v6247_v32  ;;  %4741 = vmatmul.msk.f32.gmra.mxu0 %vm1228_vm1, %v6216_v5 }
 0x2d6   : > { %1532 = vmatpush.msra.mxu3 %v1137_v23 }
 0x2d8   : > { %1533 = vmatpush.msra.mxu3 %v1134_v4 }
 0x2da   : > { %1534 = vmatpush.msra.mxu3 %v1131_v35  ;;  %4349 = vperm.xlu2 %5004, %v4319_v60  }
 0x2db   : > { %4754 = vmatmul.msk.f32.gmra.mxu3 %vm1228_vm1, %v6261_v42  ;;  %4746 = vmatmul.msk.f32.gmra.mxu1 %vm1228_vm1, %v6266_v20 }
 0x2dd   : > { %4724 = vmatmul.msk.f32.gmra.mxu2 %vm1228_vm1, %v6271_v2  ;;  %4742 = vmatmul.msk.f32.gmra.mxu0 %vm1228_vm1, %v6247_v32 }
 0x2e2   : > { %4359 = vperm.xlu2 %5004, %v4321_v14  }
 0x2e3   : > { %4755 = vmatmul.msk.f32.gmra.mxu3 %vm1228_vm1, %v6281_v19  ;;  %4747 = vmatmul.msk.f32.gmra.mxu1 %vm1228_vm1, %v6286_v28 }
 0x2e5   : > { %4725 = vmatmul.msk.f32.gmra.mxu2 %vm1228_vm1, %v6209_v56  ;;  %4743 = vmatmul.msk.f32.gmra.mxu0 %vm1228_vm1, %v6271_v2 }
 0x2ea   : > { %4369 = vperm.xlu2 %5004, %v4323_v46  }
 0x2eb   : > { %4756 = vmatmul.msk.f32.vlgmr.msra.gmra.mxu3 %vm1186_vm0, %v1497_v7  ;;  %4748 = vmatmul.msk.f32.gmra.mxu1 %vm1228_vm1, %v6299_v47 }
 0x2ed   : > { %4726 = vmatmul.msk.f32.gmra.mxu2 %vm1228_vm1, %v6240_v11 }
 0x2f2   : > { %4379 = vperm.xlu2 %5004, %v4325_v48  }
 0x2f3   : > { %4757 = vmatmul.msk.f32.gmra.mxu3 %vm1186_vm0, %v1498_v17  ;;  %4749 = vmatmul.msk.f32.gmra.mxu1 %vm1228_vm1, %v6310_v51 }
 0x2f5   : > { %4727 = vmatmul.msk.f32.gmra.mxu2 %vm1228_vm1, %v6266_v20 }
 0x2fa   : > { %4389 = vperm.xlu2 %5004, %v4327_v27   ;;  %v1621_v27 = vld [vmem:[%s7398_s3 + $0x8] sm:$0xff] }
 0x2fb   : > { %4750 = vmatmul.msk.f32.gmra.mxu1 %vm1228_vm1, %v6320_v0 }
 0x2fd   : > { %4728 = vmatmul.msk.f32.gmra.mxu2 %vm1228_vm1, %v6286_v28 }
 0x302   : > { %4399 = vperm.xlu2 %5004, %v4329_v49   ;;  %v1624_v49 = vld [vmem:[%s7398_s3 + $0x20] sm:$0xff] }
 0x303   : > { %4751 = vmatmul.msk.f32.gmra.mxu1 %vm1228_vm1, %v6330_v18 }
 0x305   : > { %4729 = vmatmul.msk.f32.gmra.mxu2 %vm1228_vm1, %v6299_v47 }
 0x30a   : > { %4409 = vperm.xlu2 %5004, %v4331_v52   ;;  %v1627_v52 = vld [vmem:[%s7398_s3 + $0x38] sm:$0xff] }
 0x30d   : > { %4730 = vmatmul.msk.f32.gmra.mxu2 %vm1228_vm1, %v6310_v51 }
 0x315   : > { %4731 = vmatmul.msk.f32.gmra.mxu2 %vm1228_vm1, %v6320_v0 }
 0x31d   : > { %4732 = vmatmul.msk.f32.gmra.mxu2 %vm1228_vm1, %v6330_v18 }
 0x325   : > { %4733 = vmatmul.msk.f32.gmra.mxu2 %vm1228_vm1, %v6204_v39 }
 0x32d   : > { %4734 = vmatmul.msk.f32.gmra.mxu2 %vm1228_vm1, %v6235_v16 }
 0x335   : > { %4735 = vmatmul.msk.f32.gmra.mxu2 %vm1228_vm1, %v6261_v42 }
 0x33d   : > { %4736 = vmatmul.msk.f32.gmra.mxu2 %vm1228_vm1, %v6281_v19 }
 0x347   : > { %v6353_v24 = vpop.f32.mrf.mxu2 }
 0x348   : > { %v1445_v6 = vpop.f32.mrf.mxu1 }
 0x34a   : > { %v1433_v44 = vpop.f32.mrf.mxu0 }
 0x34e   : > { %v1469_v12 = vpop.f32.mrf.mxu3 }
 0x350   : > { %v6355_v53 = vpop.f32.mrf.mxu2  ;;  %v1448_v25 = vpop.f32.mrf.mxu1 }
 0x352   : > { %v1436_v60 = vpop.f32.mrf.mxu0 }
 0x356   : > { %v1472_v8 = vpop.f32.mrf.mxu3 }
 0x358   : > { %v6357_v45 = vpop.f32.mrf.mxu2  ;;  %v1451_v37 = vpop.f32.mrf.mxu1 }
 0x35a   : > { %v1439_v46 = vpop.f32.mrf.mxu0 }
 0x35e   : > { %v1475_v54 = vpop.f32.mrf.mxu3 }
 0x360   : > { %v6359_v55 = vpop.f32.mrf.mxu2  ;;  %v1454_v41 = vpop.f32.mrf.mxu1 }
 0x362   : > { %v1442_v48 = vpop.f32.mrf.mxu0 }
 0x366   : > { %v1478_v57 = vpop.f32.mrf.mxu3 }
 0x367   : > { %1829 = vmatpush.msra.mxu1 %v1478_v57  ;;  %v1639_v57 = vld [vmem:[%s7398_s3 + $0x98] sm:$0xff] }
 0x368   : > { %v6361_v29 = vpop.f32.mrf.mxu2  ;;  %v1457_v9 = vpop.f32.mrf.mxu1 }
 0x369   : > { %1830 = vmatpush.msra.mxu1 %v1475_v54  ;;  %v1636_v54 = vld [vmem:[%s7398_s3 + $0x80] sm:$0xff] }
 0x36b   : > { %1831 = vmatpush.msra.mxu1 %v1472_v8  ;;  %v1630_v8 = vld [vmem:[%s7398_s3 + $0x50] sm:$0xff] }
 0x36d   : > { %1832 = vmatpush.msra.mxu1 %v1469_v12  ;;  %v1620_v12 = vld [vmem:[%s7398_s3] sm:$0xff] }
 0x36e   : > { %v1536_v62 = vpop.f32.mrf.mxu3 }
 0x36f   : > { %v1542_v63 = vmul.f32 0.015625, %v1536_v62  ;;  %v1642_v62 = vld [vmem:[%s7398_s3 + $0xb0] sm:$0xff] }
 0x370   : > { %v6363_v36 = vpop.f32.mrf.mxu2  ;;  %v1460_v61 = vpop.f32.mrf.mxu1 }
 0x371   : > { %5013 = vtanh.f32 %v1542_v63  ;;  %v1645_v63 = vld [vmem:[%s7398_s3 + $0xc8] sm:$0xff] }
 0x376   : > { %v1539_v1 = vpop.f32.mrf.mxu3 }
 0x377   : > { %v1543_v40 = vmul.f32 0.015625, %v1539_v1  ;;  %v5014_v50 = vpop.eup %5013 }
 0x378   : > { %v6365_v3 = vpop.f32.mrf.mxu2  ;;  %v1548_v22 = vmul.f32 %v5014_v50, %v1547_v58  ;;  %v1463_v4 = vpop.f32.mrf.mxu1  ;;  %v1641_v50 = vld [vmem:[%s7398_s3 + $0xa8] sm:$0xff] }
 0x379   : > { %5015 = vtanh.f32 %v1543_v40  ;;  %v1638_v40 = vld [vmem:[%s7398_s3 + $0x90] sm:$0xff] }
 0x37a   : > { %v1553_v33 = vadd.f32 %v1551_v30, %v1548_v22  ;;  %v1647_v22 = vld [vmem:[%s7398_s3 + $0xd8] sm:$0xff] }
 0x37f   : > { %v5016_v10 = vpop.eup %5015 }
 0x380   : > { %v1549_v59 = vmul.f32 %v5016_v10, %v1547_v58  ;;  %v1315_v21 = vpop.f32.mrf.mxu2  ;;  %v1466_v14 = vpop.f32.mrf.mxu1  ;;  %v1651_v58 = vld [vmem:[%s7398_s3 + $0xf8] sm:$0xff] }
 0x381   : > { %1833 = vmatpush.msra.mxu1 %v1466_v14 }
 0x382   : > { %v1554_v31 = vadd.f32 %v1552_v13, %v1549_v59  ;;  %v1644_v13 = vld [vmem:[%s7398_s3 + $0xc0] sm:$0xff]  ;;  %v1654_v59 = vld [vmem:[%s7398_s3 + $0x110] sm:$0xff] }
 0x383   : > { %1834 = vmatpush.msra.mxu1 %v1463_v4 }
 0x384   : > { %1569 = vmatpush.msrb.mxu3 %v1554_v31  ;;  %v1650_v31 = vld [vmem:[%s7398_s3 + $0xf0] sm:$0xff] }
 0x385   : > { %1835 = vmatpush.msra.mxu1 %v1460_v61  ;;  %v1659_v61 = vld [vmem:[%s7398_s3 + $0x138] sm:$0xff] }
 0x386   : > { %1570 = vmatpush.msrb.mxu3 %v1553_v33  ;;  %v1660_v33 = vld [vmem:[%s7398_s3 + $0x140] sm:$0xff] }
 0x387   : > { %4759 = vmatmul.msk.f32.vlgmr.msrb.gmra.mxu3 %vm1228_vm1, %v6192_v26  ;;  %1836 = vmatpush.msra.mxu1 %v1457_v9  ;;  %v1666_v9 = vld [vmem:[%s7398_s3 + $0x170] sm:$0xff] }
 0x388   : > { %v1318_v34 = vpop.f32.mrf.mxu2 }
 0x389   : > { %1837 = vmatpush.msra.mxu1 %v1454_v41 }
 0x38b   : > { %1838 = vmatpush.msra.mxu1 %v1451_v37  ;;  %v1653_v37 = vld [vmem:[%s7398_s3 + $0x108] sm:$0xff] }
 0x38d   : > { %1839 = vmatpush.msra.mxu1 %v1448_v25  ;;  %v1657_v25 = vld [vmem:[%s7398_s3 + $0x128] sm:$0xff] }
 0x38f   : > { %4760 = vmatmul.msk.f32.gmra.mxu3 %vm1228_vm1, %v6216_v5  ;;  %1840 = vmatpush.msra.mxu1 %v1445_v6 }
 0x390   : > { %v1321_v38 = vpop.f32.mrf.mxu2 }
 0x391   : > { %1841 = vmatpush.msra.mxu1 %v1442_v48 }
 0x393   : > { %1842 = vmatpush.msra.mxu1 %v1439_v46 }
 0x395   : > { %1843 = vmatpush.msra.mxu1 %v1436_v60  ;;  %v1665_v60 = vld [vmem:[%s7398_s3 + $0x168] sm:$0xff] }
 0x397   : > { %4761 = vmatmul.msk.f32.gmra.mxu3 %vm1228_vm1, %v6247_v32  ;;  %1844 = vmatpush.msra.mxu1 %v1433_v44 }
 0x398   : > { %v1324_v15 = vpop.f32.mrf.mxu2  ;;  %1845 = vmatmul.f32.vlgmr.msra.gmra.mxu1 %v1621_v27  ;;  %v1622_v27 = vld [vmem:[%s7398_s3 + $0x10] sm:$0xff] }
 0x39f   : > { %4762 = vmatmul.msk.f32.gmra.mxu3 %vm1228_vm1, %v6271_v2 }
 0x3a0   : > { %v1327_v43 = vpop.f32.mrf.mxu2  ;;  %1848 = vmatmul.f32.gmra.mxu1 %v1624_v49  ;;  %v1625_v49 = vld [vmem:[%s7398_s3 + $0x28] sm:$0xff] }
 0x3a7   : > { %4763 = vmatmul.msk.f32.gmra.mxu3 %vm1228_vm1, %v6209_v56 }
 0x3a8   : > { %v1330_v23 = vpop.f32.mrf.mxu2  ;;  %1851 = vmatmul.f32.gmra.mxu1 %v1627_v52  ;;  %v1628_v52 = vld [vmem:[%s7398_s3 + $0x40] sm:$0xff] }
 0x3af   : > { %4764 = vmatmul.msk.f32.gmra.mxu3 %vm1228_vm1, %v6240_v11 }
 0x3b0   : > { %v1333_v35 = vpop.f32.mrf.mxu2  ;;  %1854 = vmatmul.f32.gmra.mxu1 %v1630_v8  ;;  %v1634_v8 = vld [vmem:[%s7398_s3 + $0x70] sm:$0xff] }
 0x3b7   : > { %4765 = vmatmul.msk.f32.gmra.mxu3 %vm1228_vm1, %v6266_v20 }
 0x3b8   : > { %v1336_v7 = vpop.f32.mrf.mxu2 }
 0x3bf   : > { %4766 = vmatmul.msk.f32.gmra.mxu3 %vm1228_vm1, %v6286_v28 }
 0x3c0   : > { %v1339_v17 = vpop.f32.mrf.mxu2 }
 0x3c1   : > { %1764 = vmatpush.msrb.mxu2 %v1339_v17 }
 0x3c3   : > { %1765 = vmatpush.msrb.mxu2 %v1336_v7 }
 0x3c5   : > { %1766 = vmatpush.msrb.mxu2 %v1333_v35 }
 0x3c7   : > { %4767 = vmatmul.msk.f32.gmra.mxu3 %vm1228_vm1, %v6299_v47  ;;  %1767 = vmatpush.msrb.mxu2 %v1330_v23  ;;  %v1662_v23 = vld [vmem:[%s7398_s3 + $0x150] sm:$0xff] }
 0x3c9   : > { %1768 = vmatpush.msrb.mxu2 %v1327_v43 }
 0x3cb   : > { %1769 = vmatpush.msrb.mxu2 %v1324_v15  ;;  %v1656_v15 = vld [vmem:[%s7398_s3 + $0x120] sm:$0xff] }
 0x3cd   : > { %1770 = vmatpush.msrb.mxu2 %v1321_v38  ;;  %v1663_v38 = vld [vmem:[%s7398_s3 + $0x158] sm:$0xff] }
 0x3cf   : > { %4768 = vmatmul.msk.f32.gmra.mxu3 %vm1228_vm1, %v6310_v51  ;;  %1771 = vmatpush.msrb.mxu2 %v1318_v34 }
 0x3d1   : > { %1772 = vmatpush.msrb.mxu2 %v1315_v21 }
 0x3d3   : > { %1773 = vmatpush.msrb.mxu2 %v6365_v3  ;;  %v1648_v3 = vld [vmem:[%s7398_s3 + $0xe0] sm:$0xff] }
 0x3d5   : > { %1774 = vmatpush.msrb.mxu2 %v6363_v36  ;;  %v1635_v36 = vld [vmem:[%s7398_s3 + $0x78] sm:$0xff] }
 0x3d7   : > { %4769 = vmatmul.msk.f32.gmra.mxu3 %vm1228_vm1, %v6320_v0  ;;  %1775 = vmatpush.msrb.mxu2 %v6361_v29  ;;  %v1632_v29 = vld [vmem:[%s7398_s3 + $0x60] sm:$0xff] }
 0x3d9   : > { %1776 = vmatpush.msrb.mxu2 %v6359_v55  ;;  %v1629_v55 = vld [vmem:[%s7398_s3 + $0x48] sm:$0xff] }
 0x3db   : > { %1777 = vmatpush.msrb.mxu2 %v6357_v45  ;;  %v1623_v45 = vld [vmem:[%s7398_s3 + $0x18] sm:$0xff] }
 0x3dd   : > { %1778 = vmatpush.msrb.mxu2 %v6355_v53  ;;  %v1633_v53 = vld [vmem:[%s7398_s3 + $0x68] sm:$0xff] }
 0x3de   : > { %1857 = vmatmul.f32.gmra.mxu1 %v1633_v53  ;;  %v1640_v53 = vld [vmem:[%s7398_s3 + $0xa0] sm:$0xff] }
 0x3df   : > { %4770 = vmatmul.msk.f32.gmra.mxu3 %vm1228_vm1, %v6330_v18  ;;  %1779 = vmatpush.msrb.mxu2 %v6353_v24  ;;  %v1626_v24 = vld [vmem:[%s7398_s3 + $0x30] sm:$0xff] }
 0x3e0   : > { %1780 = vmatmul.f32.vlgmr.msrb.gmra.mxu2 %v1620_v12  ;;  %v1631_v12 = vld [vmem:[%s7398_s3 + $0x58] sm:$0xff] }
 0x3e6   : > { %1860 = vmatmul.f32.gmra.mxu1 %v1636_v54  ;;  %v1646_v54 = vld [vmem:[%s7398_s3 + $0xd0] sm:$0xff] }
 0x3e7   : > { %4771 = vmatmul.msk.f32.gmra.mxu3 %vm1228_vm1, %v6204_v39 }
 0x3e8   : > { %1783 = vmatmul.f32.gmra.mxu2 %v1623_v45  ;;  %v1637_v45 = vld [vmem:[%s7398_s3 + $0x88] sm:$0xff] }
 0x3ee   : > { %1863 = vmatmul.f32.gmra.mxu1 %v1639_v57  ;;  %v1652_v57 = vld [vmem:[%s7398_s3 + $0x100] sm:$0xff] }
 0x3ef   : > { %4772 = vmatmul.msk.f32.gmra.mxu3 %vm1228_vm1, %v6235_v16 }
 0x3f0   : > { %1786 = vmatmul.f32.gmra.mxu2 %v1626_v24  ;;  %v1643_v24 = vld [vmem:[%s7398_s3 + $0xb8] sm:$0xff] }
 0x3f6   : > { %1866 = vmatmul.f32.gmra.mxu1 %v1642_v62 }
 0x3f7   : > { %4773 = vmatmul.msk.f32.gmra.mxu3 %vm1228_vm1, %v6261_v42 }
 0x3f8   : > { %1789 = vmatmul.f32.gmra.mxu2 %v1629_v55  ;;  %v1649_v55 = vld [vmem:[%s7398_s3 + $0xe8] sm:$0xff] }
 0x3fe   : > { %1869 = vmatmul.f32.gmra.mxu1 %v1645_v63 }
 0x3ff   : > { %4774 = vmatmul.msk.f32.gmra.mxu3 %vm1228_vm1, %v6281_v19 }
 0x400   : > { %1792 = vmatmul.f32.gmra.mxu2 %v1632_v29  ;;  %v1655_v29 = vld [vmem:[%s7398_s3 + $0x118] sm:$0xff] }
 0x406   : > { %1872 = vmatmul.f32.gmra.mxu1 %v1648_v3 }
 0x408   : > { %1795 = vmatmul.f32.gmra.mxu2 %v1635_v36  ;;  %v1658_v36 = vld [vmem:[%s7398_s3 + $0x130] sm:$0xff] }
 0x40a   : > { %v6451_v1 = vpop.f32.mrf.mxu3 }
 0x40e   : > { %1875 = vmatmul.f32.gmra.mxu1 %v1651_v58 }
 0x410   : > { %1798 = vmatmul.f32.gmra.mxu2 %v1638_v40 }
 0x412   : > { %v1575_v6 = vpop.f32.mrf.mxu3 }
 0x415   : > { %v6546_v63 = vpop.f32.mrf.mxu1 }
 0x416   : > { %1878 = vmatmul.f32.gmra.mxu1 %v1654_v59  ;;  %7477 = vst [vmem:[#allocation40_spill] sm:$0xff] %v6546_v63 }
 0x418   : > { %1801 = vmatmul.f32.gmra.mxu2 %v1641_v50 }
 0x41a   : > { %v1578_v10 = vpop.f32.mrf.mxu3 }
 0x41d   : > { %v6553_v3 = vpop.f32.mrf.mxu1 }
 0x41e   : > { %1881 = vmatmul.f32.gmra.mxu1 %v1657_v25  ;;  %7479 = vst [vmem:[#allocation42_spill] sm:$0xff] %v6553_v3 }
 0x420   : > { %1804 = vmatmul.f32.gmra.mxu2 %v1644_v13 }
 0x422   : > { %v1581_v21 = vpop.f32.mrf.mxu3 }
 0x425   : > { %v6560_v58 = vpop.f32.mrf.mxu1 }
 0x426   : > { %1884 = vmatmul.f32.gmra.mxu1 %v1660_v33  ;;  %7481 = vst [vmem:[#allocation44_spill] sm:$0xff] %v6560_v58 }
 0x428   : > { %1807 = vmatmul.f32.gmra.mxu2 %v1647_v22 }
 0x42a   : > { %v1584_v30 = vpop.f32.mrf.mxu3 }
 0x42d   : > { %v6567_v59 = vpop.f32.mrf.mxu1 }
 0x42e   : > { %1887 = vmatmul.f32.gmra.mxu1 %v1663_v38  ;;  %7483 = vst [vmem:[#allocation46_spill] sm:$0xff] %v6567_v59 }
 0x430   : > { %1810 = vmatmul.f32.gmra.mxu2 %v1650_v31 }
 0x432   : > { %v1587_v34 = vpop.f32.mrf.mxu3 }
 0x436   : > { %1890 = vmatmul.f32.gmra.mxu1 %v1666_v9 }
 0x438   : > { %1813 = vmatmul.f32.gmra.mxu2 %v1653_v37 }
 0x43a   : > { %v1590_v41 = vpop.f32.mrf.mxu3 }
 0x440   : > { %1816 = vmatmul.f32.gmra.mxu2 %v1656_v15 }
 0x442   : > { %v1593_v43 = vpop.f32.mrf.mxu3 }
 0x448   : > { %1819 = vmatmul.f32.gmra.mxu2 %v1659_v61 }
 0x44a   : > { %v1596_v44 = vpop.f32.mrf.mxu3 }
 0x450   : > { %1822 = vmatmul.f32.gmra.mxu2 %v1662_v23 }
 0x452   : > { %v1599_v4 = vpop.f32.mrf.mxu3 }
 0x458   : > { %1825 = vmatmul.f32.gmra.mxu2 %v1665_v60 }
 0x45a   : > { %v1602_v35 = vpop.f32.mrf.mxu3 }
 0x45b   : > { %v6573_v25 = vpop.f32.mrf.mxu1 }
 0x45c   : > { %7485 = vst [vmem:[#allocation48_spill] sm:$0xff] %v6573_v25 }
 0x462   : > { %v1605_v14 = vpop.f32.mrf.mxu3 }
 0x463   : > { %v6541_v62 = vpop.f32.mrf.mxu2 }
 0x464   : > { %7476 = vst [vmem:[#allocation39_spill] sm:$0xff] %v6541_v62 }
 0x46a   : > { %v1608_v46 = vpop.f32.mrf.mxu3 }
 0x46b   : > { %v6551_v40 = vpop.f32.mrf.mxu2 }
 0x46c   : > { %7478 = vst [vmem:[#allocation41_spill] sm:$0xff] %v6551_v40 }
 0x472   : > { %v1611_v7 = vpop.f32.mrf.mxu3 }
 0x473   : > { %v6558_v50 = vpop.f32.mrf.mxu2 }
 0x474   : > { %7480 = vst [vmem:[#allocation43_spill] sm:$0xff] %v6558_v50 }
 0x47a   : > { %v1614_v48 = vpop.f32.mrf.mxu3 }
 0x47b   : > { %v6565_v13 = vpop.f32.mrf.mxu2 }
 0x47c   : > { %7482 = vst [vmem:[#allocation45_spill] sm:$0xff] %v6565_v13 }
 0x482   : > { %v1617_v17 = vpop.f32.mrf.mxu3 }
 0x483   : > { %1894 = vmatpush.msra.mxu3 %v1617_v17  ;;  %v6571_v22 = vpop.f32.mrf.mxu2 }
 0x485   : > { %1895 = vmatpush.msra.mxu3 %v1614_v48 }
 0x487   : > { %1896 = vmatpush.msra.mxu3 %v1611_v7 }
 0x489   : > { %1897 = vmatpush.msra.mxu3 %v1608_v46 }
 0x48b   : > { %1898 = vmatpush.msra.mxu3 %v1605_v14  ;;  %v6577_v33 = vpop.f32.mrf.mxu2 }
 0x48d   : > { %1899 = vmatpush.msra.mxu3 %v1602_v35 }
 0x48f   : > { %1900 = vmatpush.msra.mxu3 %v1599_v4 }
 0x491   : > { %1901 = vmatpush.msra.mxu3 %v1596_v44 }
 0x493   : > { %1902 = vmatpush.msra.mxu3 %v1593_v43 }
 0x495   : > { %1903 = vmatpush.msra.mxu3 %v1590_v41  ;;  %v6583_v41 = vpop.f32.mrf.mxu2 }
 0x497   : > { %1904 = vmatpush.msra.mxu3 %v1587_v34  ;;  %v6579_v34 = vpop.f32.mrf.mxu1 }
 0x498   : > { %7487 = vst [vmem:[#allocation50_spill] sm:$0xff] %v6579_v34 }
 0x499   : > { %1905 = vmatpush.msra.mxu3 %v1584_v30  ;;  %v1762_v30 = vpop.permute.xlu1 %1761 }
 0x49b   : > { %1906 = vmatpush.msra.mxu3 %v1581_v21 }
 0x49d   : > { %1907 = vmatpush.msra.mxu3 %v1578_v10  ;;  %v1667_v10 = vld [vmem:[%s7398_s3 + $0x178] sm:$0xff]  ;;  %v6589_v61 = vpop.f32.mrf.mxu2 }
 0x49f   : > { %1908 = vmatpush.msra.mxu3 %v1575_v6  ;;  %v1664_v6 = vld [vmem:[%s7398_s3 + $0x160] sm:$0xff]  ;;  %v6587_v9 = vpop.f32.mrf.mxu1 }
 0x4a1   : > { %1909 = vmatpush.msra.mxu3 %v6451_v1  ;;  %v1661_v1 = vld [vmem:[%s7398_s3 + $0x148] sm:$0xff]  ;;  %v1757_v38 = vpop.permute.xlu1 %1756 }
 0x4a2   : > { %1910 = vmatmul.f32.vlgmr.msra.gmra.mxu3 %v1622_v27 }
 0x4a5   : > { %v1805_v35 = vpop.f32.mrf.mxu2 }
 0x4a7   : > { %v6593_v23 = vpop.f32.mrf.mxu1 }
 0x4a9   : > { %v1752_v43 = vpop.permute.xlu1 %1751 }
 0x4aa   : > { %1913 = vmatmul.f32.gmra.mxu3 %v1625_v49 }
 0x4ad   : > { %v1808_v48 = vpop.f32.mrf.mxu2 }
 0x4af   : > { %v6597_v14 = vpop.f32.mrf.mxu1 }
 0x4b1   : > { %v1737_v4 = vpop.permute.xlu1 %1736 }
 0x4b2   : > { %1916 = vmatmul.f32.gmra.mxu3 %v1628_v52 }
 0x4b5   : > { %v1811_v52 = vpop.f32.mrf.mxu2 }
 0x4b6   : > { %v1812_v50 = vadd.f32 %v1811_v52, %v1737_v4  ;;  %v7499_v52 = vld [vmem:[#allocation48_spill] sm:$0xff] }
 0x4b7   : > { %v1873_v17 = vpop.f32.mrf.mxu1 }
 0x4b9   : > { %v1732_v46 = vpop.permute.xlu1 %1731 }
 0x4ba   : > { %1919 = vmatmul.f32.gmra.mxu3 %v1631_v12  ;;  %v1809_v13 = vadd.f32 %v1808_v48, %v1732_v46  ;;  %v7497_v48 = vld [vmem:[#allocation37_spill] sm:$0xff] }
 0x4c1   : > { %v1727_v49 = vpop.permute.xlu1 %1726 }
 0x4c2   : > { %1922 = vmatmul.f32.gmra.mxu3 %v1634_v8  ;;  %v1876_v8 = vpop.f32.mrf.mxu1 }
 0x4ca   : > { %1925 = vmatmul.f32.gmra.mxu3 %v1637_v45  ;;  %v1722_v45 = vpop.permute.xlu1 %1721 }
 0x4d2   : > { %1928 = vmatmul.f32.gmra.mxu3 %v1640_v53  ;;  %v1814_v53 = vpop.f32.mrf.mxu2 }
 0x4da   : > { %1931 = vmatmul.f32.gmra.mxu3 %v1643_v24 }
 0x4e2   : > { %1934 = vmatmul.f32.gmra.mxu3 %v1646_v54  ;;  %v1879_v54 = vpop.f32.mrf.mxu1 }
 0x4ea   : > { %1937 = vmatmul.f32.gmra.mxu3 %v1649_v55  ;;  %v1717_v55 = vpop.permute.xlu1 %1716 }
 0x4f2   : > { %1940 = vmatmul.f32.gmra.mxu3 %v1652_v57 }
 0x4fa   : > { %1943 = vmatmul.f32.gmra.mxu3 %v1655_v29  ;;  %v1817_v29 = vpop.f32.mrf.mxu2 }
 0x502   : > { %1946 = vmatmul.f32.gmra.mxu3 %v1658_v36  ;;  %v1882_v36 = vpop.f32.mrf.mxu1 }
 0x50a   : > { %1949 = vmatmul.f32.gmra.mxu3 %v1661_v1  ;;  %v1712_v1 = vpop.permute.xlu1 %1711  ;;  %v1885_v26 = vpop.f32.mrf.mxu1 }
 0x512   : > { %1952 = vmatmul.f32.gmra.mxu3 %v1664_v6  ;;  %v1707_v32 = vpop.permute.xlu1 %1706 }
 0x51a   : > { %1955 = vmatmul.f32.gmra.mxu3 %v1667_v10  ;;  %v1820_v10 = vpop.f32.mrf.mxu2  ;;  %v1702_v63 = vpop.permute.xlu1 %1701 }
 0x51b   : > { %v1821_v11 = vadd.f32 %v1820_v10, %v1752_v43 }
 0x522   : > { %v1697_v40 = vpop.permute.xlu1 %1696 }
 0x525   : > { %v6569_v21 = vpop.f32.mrf.mxu3 }
 0x526   : > { %7484 = vst [vmem:[#allocation47_spill] sm:$0xff] %v6569_v21  ;;  %v1823_v21 = vpop.f32.mrf.mxu2 }
 0x527   : > { %v1824_v56 = vadd.f32 %v1823_v21, %v1757_v38 }
 0x52d   : > { %v6575_v31 = vpop.f32.mrf.mxu3 }
 0x52e   : > { %7486 = vst [vmem:[#allocation49_spill] sm:$0xff] %v6575_v31  ;;  %v1888_v31 = vpop.f32.mrf.mxu1 }
 0x52f   : > { %v1889_v62 = vadd.f32 %v1888_v31, %v1824_v56  ;;  %v1877_v56 = vadd.f32 %v1876_v8, %v1812_v50  ;;  %v1797_v50 = vadd.f32 %v6577_v33, %v1712_v1 }
 0x535   : > { %v6581_v37 = vpop.f32.mrf.mxu3 }
 0x536   : > { %7488 = vst [vmem:[#allocation51_spill] sm:$0xff] %v6581_v37  ;;  %v1826_v37 = vpop.f32.mrf.mxu2  ;;  %v1891_v59 = vpop.f32.mrf.mxu1 }
 0x537   : > { %v1827_v20 = vadd.f32 %v1826_v37, %v1762_v30 }
 0x53d   : > { %v6585_v15 = vpop.f32.mrf.mxu3 }
 0x53e   : > { %7489 = vst [vmem:[#allocation52_spill] sm:$0xff] %v6585_v15  ;;  %v1747_v15 = vpop.permute.xlu0 %1746 }
 0x53f   : > { %v1818_v58 = vadd.f32 %v1817_v29, %v1747_v15  ;;  %v1806_v15 = vadd.f32 %v1805_v35, %v1727_v49 }
 0x541   : > { %v1883_v47 = vadd.f32 %v1882_v36, %v1818_v58 }
 0x545   : > { %v6591_v44 = vpop.f32.mrf.mxu3 }
 0x546   : > { %7490 = vst [vmem:[#allocation53_spill] sm:$0xff] %v6591_v44  ;;  %v1742_v44 = vpop.permute.xlu2 %1741 }
 0x547   : > { %v1815_v28 = vadd.f32 %v1814_v53, %v1742_v44  ;;  %v7493_v44 = vld [vmem:[#allocation38_spill] sm:$0xff] }
 0x549   : > { %v1880_v21 = vadd.f32 %v1879_v54, %v1815_v28  ;;  %v7502_v54 = vld [vmem:[#allocation41_spill] sm:$0xff] }
 0x54d   : > { %v6595_v60 = vpop.f32.mrf.mxu3  ;;  %v7504_v1 = vld [vmem:[#allocation53_spill] sm:$0xff] }
 0x54e   : > { %7491 = vst [vmem:[#allocation54_spill] sm:$0xff] %v6595_v60  ;;  %v1886_v60 = vadd.f32 %v1885_v26, %v1821_v11  ;;  %v1803_v26 = vadd.f32 %v6589_v61, %v1722_v45  ;;  %v1874_v11 = vadd.f32 %v1873_v17, %v1809_v13  ;;  %v7498_v17 = vld [vmem:[#allocation43_spill] sm:$0xff]  ;;  %v7501_v45 = vld [vmem:[#allocation36_spill] sm:$0xff] }
 0x54f   : > { %v1788_v49 = vadd.f32 %v7498_v17, %v1697_v40  ;;  %v7505_v40 = vld [vmem:[#allocation34_spill] sm:$0xff] }
 0x550   : > { %v1868_v58 = vadd.f32 %v6593_v23, %v1803_v26  ;;  %v7509_v26 = vld [vmem:[#allocation32_spill] sm:$0xff] }
 0x555   : > { %v6599_v7 = vpop.f32.mrf.mxu3 }
 0x556   : > { %7492 = vst [vmem:[#allocation55_spill] sm:$0xff] %v6599_v7  ;;  %v1892_v7 = vadd.f32 %v1891_v59, %v1827_v20 }
 0x55d   : > { %v6601_v27 = vpop.f32.mrf.mxu3 }
 0x55e   : > { %v1933_v61 = vadd.f32 %v6601_v27, %v1868_v58  ;;  %v7514_v58 = vld [vmem:[#allocation49_spill] sm:$0xff] }
 0x565   : > { %v6603_v12 = vpop.f32.mrf.mxu3 }
 0x56d   : > { %v1938_v24 = vpop.f32.mrf.mxu3 }
 0x575   : > { %v1941_v57 = vpop.f32.mrf.mxu3 }
 0x57d   : > { %v1944_v6 = vpop.f32.mrf.mxu3 }
 0x57e   : > { %v1945_v30 = vadd.f32 %v1944_v6, %v1880_v21 }
 0x585   : > { %v1947_v5 = vpop.f32.mrf.mxu3 }
 0x586   : > { %v1948_v38 = vadd.f32 %v1947_v5, %v1883_v47  ;;  %v1800_v5 = vadd.f32 %v6583_v41, %v1717_v55  ;;  %v1692_v47 = vpop.permute.xlu1 %1691 }
 0x587   : > { %v1785_v55 = vadd.f32 %v7502_v54, %v1692_v47  ;;  %v7512_v47 = vld [vmem:[#allocation30_spill] sm:$0xff]  ;;  %v2029_v54 = vld [vmem:[%s7400_s5 + $0x30] sm:$0xff] }
 0x588   : > { %v1971_v20 = vadd.f32 %v6204_v39, %v1948_v38  ;;  %v1865_v41 = vadd.f32 %v6587_v9, %v1800_v5  ;;  %v7511_v5 = vld [vmem:[#allocation51_spill] sm:$0xff] }
 0x58a   : > { %vm1987_vm5 = vcmp.ge.f32.partialorder %v1971_v20, 0.0 }
 0x58d   : > { %v1950_v2 = vpop.f32.mrf.mxu3 }
 0x58e   : > { %v1951_v34 = vadd.f32 %v1950_v2, %v1886_v60  ;;  %v7494_v60 = vld [vmem:[#allocation45_spill] sm:$0xff]  ;;  %v1687_v36 = vpop.permute.xlu1 %1686 }
 0x58f   : > { %v1791_v35 = vadd.f32 %v7494_v60, %v1702_v63  ;;  %v1966_v63 = vadd.f32 %v7501_v45, %v1933_v61  ;;  %v7518_v60 = vld [vmem:[#allocation31_spill] sm:$0xff] }
 0x590   : > { %v1972_v31 = vadd.f32 %v6235_v16, %v1951_v34  ;;  %v1970_v16 = vadd.f32 %v6330_v18, %v1945_v30  ;;  %v1794_v34 = vadd.f32 %v6571_v22, %v1707_v32  ;;  %v2025_v45 = vld [vmem:[%s7400_s5 + $0x10] sm:$0xff] }
 0x591   : > { %vm1982_vm10 = vcmp.ge.f32.partialorder %v1966_v63, 0.0 }
 0x592   : > { %vm1988_vm4 = vcmp.ge.f32.partialorder %v1972_v31, 0.0  ;;  %v2002_v23 = vmul.f32 0.1, %v1970_v16  ;;  %vm1986_vm6 = vcmp.ge.f32.partialorder %v1970_v16, 0.0  ;;  %v1859_v27 = vadd.f32 %v7499_v52, %v1794_v34 }
 0x594   : > { %v2018_v53 = vsel %vm1986_vm6, %v1970_v16, %v2002_v23  ;;  %v1924_v6 = vadd.f32 %v7504_v1, %v1859_v27  ;;  %v2023_v27 = vld [vmem:[%s7400_s5] sm:$0xff]  ;;  %v2034_v1 = vld [vmem:[%s7400_s5 + $0x58] sm:$0xff] }
 0x595   : > { %v1953_v3 = vpop.f32.mrf.mxu3 }
 0x596   : > { %v1954_v25 = vadd.f32 %v1953_v3, %v1889_v62  ;;  %v1942_v62 = vadd.f32 %v1941_v57, %v1877_v56  ;;  %v7503_v57 = vld [vmem:[#allocation46_spill] sm:$0xff]  ;;  %v7507_v56 = vld [vmem:[#allocation44_spill] sm:$0xff] }
 0x597   : > { %v1856_v29 = vadd.f32 %v7503_v57, %v1791_v35  ;;  %v1853_v30 = vadd.f32 %v7507_v56, %v1788_v49  ;;  %v2031_v57 = vld [vmem:[%s7400_s5 + $0x40] sm:$0xff] }
 0x598   : > { %v1973_v43 = vadd.f32 %v6261_v42, %v1954_v25  ;;  %v1871_v42 = vadd.f32 %v6597_v14, %v1806_v15  ;;  %v1969_v13 = vadd.f32 %v6320_v0, %v1942_v62  ;;  %v2003_v25 = vmul.f32 0.1, %v1971_v20  ;;  %v7495_v14 = vld [vmem:[#allocation50_spill] sm:$0xff]  ;;  %v7496_v0 = vld [vmem:[#allocation55_spill] sm:$0xff] }
 0x599   : > { %v1862_v46 = vadd.f32 %v7495_v14, %v1797_v50 }
 0x59a   : > { %v2005_v28 = vmul.f32 0.1, %v1973_v43  ;;  %vm1989_vm3 = vcmp.ge.f32.partialorder %v1973_v43, 0.0  ;;  %v1936_v39 = vadd.f32 %v6603_v12, %v1871_v42  ;;  %v2019_v22 = vsel %vm1987_vm5, %v1971_v20, %v2003_v25  ;;  %v7500_v12 = vld [vmem:[#allocation54_spill] sm:$0xff] }
 0x59b   : > { %v2001_v9 = vmul.f32 0.1, %v1969_v13  ;;  %vm1985_vm7 = vcmp.ge.f32.partialorder %v1969_v13, 0.0  ;;  %v1927_v8 = vadd.f32 %v7500_v12, %v1862_v46  ;;  %v1998_v20 = vmul.f32 0.1, %v1966_v63 }
 0x59c   : > { %v2021_v59 = vsel %vm1989_vm3, %v1973_v43, %v2005_v28  ;;  %v1967_v32 = vadd.f32 %v7497_v48, %v1936_v39  ;;  %v1918_v42 = vadd.f32 %v7511_v5, %v1853_v30 }
 0x59d   : > { %v1956_v51 = vpop.f32.mrf.mxu3  ;;  %v2017_v38 = vsel %vm1985_vm7, %v1969_v13, %v2001_v9  ;;  %v7515_v13 = vld [vmem:[#allocation35_spill] sm:$0xff]  ;;  %v2014_v25 = vsel %vm1982_vm10, %v1966_v63, %v1998_v20  ;;  %v2026_v63 = vld [vmem:[%s7400_s5 + $0x18] sm:$0xff] }
 0x59e   : > { %v1957_v10 = vadd.f32 %v1956_v51, %v1892_v7  ;;  %v1939_v51 = vadd.f32 %v1938_v24, %v1874_v11  ;;  %v1930_v7 = vadd.f32 %v7496_v0, %v1865_v41  ;;  %v1999_v43 = vmul.f32 0.1, %v1967_v32  ;;  %v7516_v41 = vld [vmem:[#allocation47_spill] sm:$0xff]  ;;  %v7519_v0 = vld [vmem:[#allocation29_spill] sm:$0xff] }
 0x59f   : > { %vm1983_vm9 = vcmp.ge.f32.partialorder %v1967_v32, 0.0  ;;  %v1964_v11 = vadd.f32 %v7509_v26, %v1927_v8  ;;  %v2024_v8 = vld [vmem:[%s7400_s5 + $0x8] sm:$0xff] }
 0x5a0   : > { %v1974_v37 = vadd.f32 %v6281_v19, %v1957_v10  ;;  %v2004_v19 = vmul.f32 0.1, %v1972_v31  ;;  %v1968_v33 = vadd.f32 %v7493_v44, %v1939_v51  ;;  %v1965_v21 = vadd.f32 %v7505_v40, %v1930_v7  ;;  %v7506_v10 = vld [vmem:[#allocation39_spill] sm:$0xff]  ;;  %v7517_v44 = vld [vmem:[#allocation33_spill] sm:$0xff]  ;;  %v2036_v40 = vld [vmem:[%s7400_s5 + $0x68] sm:$0xff] }
 0x5a1   : > { %v1782_v15 = vadd.f32 %v7506_v10, %v1687_v36  ;;  %v1963_v51 = vadd.f32 %v7512_v47, %v1924_v6  ;;  %v2015_v16 = vsel %vm1983_vm9, %v1967_v32, %v1999_v43  ;;  %v1996_v34 = vmul.f32 0.1, %v1964_v11  ;;  %v2033_v36 = vld [vmem:[%s7400_s5 + $0x50] sm:$0xff]  ;;  %v2035_v6 = vld [vmem:[%s7400_s5 + $0x60] sm:$0xff] }
 0x5a2   : > { %vm1990_vm2 = vcmp.ge.f32.partialorder %v1974_v37, 0.0  ;;  %v2006_v2 = vmul.f32 0.1, %v1974_v37  ;;  %v2020_v4 = vsel %vm1988_vm4, %v1972_v31, %v2004_v19  ;;  %v2000_v24 = vmul.f32 0.1, %v1968_v33  ;;  %v7508_v31 = vld [vmem:[#allocation52_spill] sm:$0xff] }
 0x5a3   : > { %vm1984_vm8 = vcmp.ge.f32.partialorder %v1968_v33, 0.0  ;;  %v7513_v19 = vld [vmem:[#allocation40_spill] sm:$0xff]  ;;  %vm1981_vm11 = vcmp.ge.f32.partialorder %v1965_v21, 0.0  ;;  %vm1980_vm12 = vcmp.ge.f32.partialorder %v1964_v11, 0.0  ;;  %v1995_v23 = vmul.f32 0.1, %v1963_v51 }
 0x5a4   : > { %v2022_v3 = vsel %vm1990_vm2, %v1974_v37, %v2006_v2  ;;  %v1921_v37 = vadd.f32 %v7508_v31, %v1856_v29  ;;  %v2016_v62 = vsel %vm1984_vm8, %v1968_v33, %v2000_v24  ;;  %v7510_v2 = vld [vmem:[#allocation42_spill] sm:$0xff]  ;;  %v1847_v50 = vadd.f32 %v7513_v19, %v1782_v15 }
 0x5a5   : > { %2135 = vmatpush.msra.mxu2 %v2022_v3  ;;  %v1850_v28 = vadd.f32 %v7510_v2, %v1785_v55  ;;  %v1997_v3 = vmul.f32 0.1, %v1965_v21  ;;  %v1961_v33 = vadd.f32 %v7517_v44, %v1918_v42  ;;  %vm1979_vm13 = vcmp.ge.f32.partialorder %v1963_v51, 0.0  ;;  %v2028_v24 = vld [vmem:[%s7400_s5 + $0x28] sm:$0xff]  ;;  %v2030_v55 = vld [vmem:[%s7400_s5 + $0x38] sm:$0xff]  ;;  %v2133_v2 = vpop.permute.xlu1 %2132 }
 0x5a6   : > { %v1912_v61 = vadd.f32 %v7516_v41, %v1847_v50  ;;  %v2012_v14 = vsel %vm1980_vm12, %v1964_v11, %v1996_v34  ;;  %v2011_v48 = vsel %vm1979_vm13, %v1963_v51, %v1995_v23  ;;  %v2032_v29 = vld [vmem:[%s7400_s5 + $0x48] sm:$0xff]  ;;  %v2118_v51 = vpop.permute.xlu2 %2117  ;;  %v5045_v41 = vld [vmem:[%s5521_s18 + $0x70] sm:$0xff] }
 0x5a7   : > { %2136 = vmatpush.msra.mxu2 %v2021_v59  ;;  %v1915_v39 = vadd.f32 %v7514_v58, %v1850_v28  ;;  %v1962_v59 = vadd.f32 %v7515_v13, %v1921_v37  ;;  %v1993_v32 = vmul.f32 0.1, %v1961_v33  ;;  %vm1977_vm15 = vcmp.ge.f32.partialorder %v1961_v33, 0.0  ;;  %v5046_v23 = vld [vmem:[%s5521_s18 + $0x68] sm:$0xff] }
 0x5a8   : > { %v1959_v7 = vadd.f32 %v7519_v0, %v1912_v61 }
 0x5a9   : > { %2137 = vmatpush.msra.mxu2 %v2020_v4  ;;  %v2013_v4 = vsel %vm1981_vm11, %v1965_v21, %v1997_v3  ;;  %v1960_v35 = vadd.f32 %v7518_v60, %v1915_v39  ;;  %v1994_v46 = vmul.f32 0.1, %v1962_v59  ;;  %vm1978_vm14 = vcmp.ge.f32.partialorder %v1962_v59, 0.0  ;;  %v2037_v21 = vld [vmem:[%s7400_s5 + $0x70] sm:$0xff]  ;;  %v2113_v3 = vpop.permute.xlu0 %2112 }
 0x5aa   : > { %v2009_v17 = vsel %vm1977_vm15, %v1961_v33, %v1993_v32  ;;  %v1991_v49 = vmul.f32 0.1, %v1959_v7  ;;  %vm1975_vm2 = vcmp.ge.f32.partialorder %v1959_v7, 0.0 }
 0x5ab   : > { %2138 = vmatpush.msra.mxu2 %v2019_v22  ;;  %v2010_v22 = vsel %vm1978_vm14, %v1962_v59, %v1994_v46  ;;  %v1992_v9 = vmul.f32 0.1, %v1960_v35  ;;  %vm1976_vm0 = vcmp.ge.f32.partialorder %v1960_v35, 0.0 }
 0x5ac   : > { %v2007_v12 = vsel %vm1975_vm2, %v1959_v7, %v1991_v49  ;;  %v5048_v7 = vld [vmem:[%s5521_s18 + $0x60] sm:$0xff] }
 0x5ad   : > { %2139 = vmatpush.msra.mxu2 %v2018_v53  ;;  %v2008_v52 = vsel %vm1976_vm0, %v1960_v35, %v1992_v9  ;;  %v2027_v53 = vld [vmem:[%s7400_s5 + $0x20] sm:$0xff]  ;;  %v2128_v5 = vpop.permute.xlu1 %2127  ;;  %v5047_v35 = vld [vmem:[%s5521_s18 + $0x78] sm:$0xff] }
 0x5ae   : > { %v2103_v58 = vpop.permute.xlu2 %2102 }
 0x5af   : > { %2140 = vmatpush.msra.mxu2 %v2017_v38  ;;  %v2038_v38 = vld [vmem:[%s7400_s5 + $0x78] sm:$0xff] }
 0x5b1   : > { %2141 = vmatpush.msra.mxu2 %v2016_v62  ;;  %v2098_v59 = vpop.permute.xlu0 %2097 }
 0x5b3   : > { %2142 = vmatpush.msra.mxu2 %v2015_v16 }
 0x5b5   : > { %2143 = vmatpush.msra.mxu2 %v2014_v25  ;;  %v2123_v47 = vpop.permute.xlu1 %2122 }
 0x5b6   : > { %v2088_v46 = vpop.permute.xlu2 %2087 }
 0x5b7   : > { %2144 = vmatpush.msra.mxu2 %v2013_v4 }
 0x5b9   : > { %2145 = vmatpush.msra.mxu2 %v2012_v14 }
 0x5bb   : > { %2146 = vmatpush.msra.mxu2 %v2011_v48 }
 0x5bd   : > { %2147 = vmatpush.msra.mxu2 %v2010_v22  ;;  %v2108_v19 = vpop.permute.xlu1 %2107 }
 0x5bf   : > { %2148 = vmatpush.msra.mxu2 %v2009_v17 }
 0x5c1   : > { %2149 = vmatpush.msra.mxu2 %v2008_v52 }
 0x5c3   : > { %2150 = vmatpush.msra.mxu2 %v2007_v12  ;;  %v5049_v12 = vld [vmem:[%s5521_s18 + $0x50] sm:$0xff] }
 0x5c4   : > { %2151 = vmatmul.f32.vlgmr.msra.gmra.mxu2 %v2023_v27 }
 0x5c5   : > { %v2093_v33 = vpop.permute.xlu1 %2092 }
 0x5cc   : > { %2154 = vmatmul.f32.gmra.mxu2 %v2024_v8 }
 0x5d4   : > { %2157 = vmatmul.f32.gmra.mxu2 %v2025_v45 }
 0x5dc   : > { %2160 = vmatmul.f32.gmra.mxu2 %v2026_v63 }
 0x5e4   : > { %2163 = vmatmul.f32.gmra.mxu2 %v2027_v53  ;;  %v2083_v53 = vpop.permute.xlu0 %2082 }
 0x5ec   : > { %2166 = vmatmul.f32.gmra.mxu2 %v2028_v24 }
 0x5f4   : > { %2169 = vmatmul.f32.gmra.mxu2 %v2029_v54  ;;  %v5050_v54 = vld [vmem:[%s5521_s18 + $0x48] sm:$0xff] }
 0x5fc   : > { %2172 = vmatmul.f32.gmra.mxu2 %v2030_v55 }
 0x604   : > { %2175 = vmatmul.f32.gmra.mxu2 %v2031_v57 }
 0x60c   : > { %2178 = vmatmul.f32.gmra.mxu2 %v2032_v29  ;;  %v2078_v29 = vpop.permute.xlu1 %2077 }
 0x614   : > { %2181 = vmatmul.f32.gmra.mxu2 %v2033_v36 }
 0x61c   : > { %2184 = vmatmul.f32.gmra.mxu2 %v2034_v1  ;;  %v5051_v1 = vld [vmem:[%s5521_s18 + $0x40] sm:$0xff] }
 0x624   : > { %2187 = vmatmul.f32.gmra.mxu2 %v2035_v6 }
 0x62c   : > { %2190 = vmatmul.f32.gmra.mxu2 %v2036_v40 }
 0x634   : > { %2193 = vmatmul.f32.gmra.mxu2 %v2037_v21 }
 0x63c   : > { %2196 = vmatmul.f32.gmra.mxu2 %v2038_v38  ;;  %v2073_v38 = vpop.permute.xlu2 %2072 }
 0x647   : > { %v6695_v43 = vpop.f32.mrf.mxu2 }
 0x64f   : > { %v6697_v10 = vpop.f32.mrf.mxu2 }
 0x657   : > { %v6699_v15 = vpop.f32.mrf.mxu2 }
 0x65f   : > { %v6701_v56 = vpop.f32.mrf.mxu2 }
 0x667   : > { %v6703_v30 = vpop.f32.mrf.mxu2 }
 0x66f   : > { %v6705_v31 = vpop.f32.mrf.mxu2 }
 0x677   : > { %v2170_v37 = vpop.f32.mrf.mxu2 }
 0x678   : > { %v2171_v36 = vadd.f32 %v2170_v37, %v2088_v46  ;;  %v2165_v37 = vadd.f32 %v6703_v30, %v2078_v29  ;;  %v2271_v29 = vld [vmem:[#allocation2 + $0x38] sm:$0xff] }
 0x67f   : > { %v2173_v26 = vpop.f32.mrf.mxu2 }
 0x680   : > { %v2174_v24 = vadd.f32 %v2173_v26, %v2093_v33  ;;  %v2168_v26 = vadd.f32 %v6705_v31, %v2083_v53  ;;  %v2162_v31 = vadd.f32 %v6701_v56, %v2073_v38  ;;  %v2058_v33 = vpop.permute.xlu2 %2057  ;;  %v2266_v53 = vld [vmem:[#allocation2 + $0x10] sm:$0xff]  ;;  %v2276_v38 = vld [vmem:[#allocation2 + $0x60] sm:$0xff] }
 0x687   : > { %v2176_v11 = vpop.f32.mrf.mxu2 }
 0x688   : > { %v2177_v27 = vadd.f32 %v2176_v11, %v2098_v59  ;;  %v5052_v11 = vld [vmem:[%s5521_s18 + $0x38] sm:$0xff] }
 0x68a   : > { %v2208_v6 = vadd.f32 %v5051_v1, %v2177_v27  ;;  %v2273_v1 = vld [vmem:[#allocation2 + $0x48] sm:$0xff] }
 0x68c   : > { %vm2224_vm10 = vcmp.ge.f32.partialorder %v2208_v6, 0.0 }
 0x68f   : > { %v2179_v62 = vpop.f32.mrf.mxu2 }
 0x690   : > { %v2180_v9 = vadd.f32 %v2179_v62, %v2103_v58  ;;  %v2207_v62 = vadd.f32 %v5052_v11, %v2174_v24  ;;  %v5055_v58 = vld [vmem:[%s5521_s18 + $0x20] sm:$0xff]  ;;  %v2267_v24 = vld [vmem:[#allocation2 + $0x18] sm:$0xff]  ;;  %v2278_v11 = vld [vmem:[#allocation2 + $0x70] sm:$0xff] }
 0x692   : > { %vm2223_vm11 = vcmp.ge.f32.partialorder %v2207_v62, 0.0 }
 0x697   : > { %v2182_v20 = vpop.f32.mrf.mxu2 }
 0x698   : > { %v2183_v0 = vadd.f32 %v2182_v20, %v2108_v19 }
 0x69a   : > { %v2210_v8 = vadd.f32 %v5049_v12, %v2183_v0  ;;  %v2264_v12 = vld [vmem:[#allocation2] sm:$0xff] }
 0x69c   : > { %v2242_v40 = vmul.f32 0.1, %v2210_v8  ;;  %vm2226_vm8 = vcmp.ge.f32.partialorder %v2210_v8, 0.0 }
 0x69f   : > { %v2185_v28 = vpop.f32.mrf.mxu2 }
 0x6a0   : > { %v2186_v4 = vadd.f32 %v2185_v28, %v2113_v3  ;;  %v5053_v28 = vld [vmem:[%s5521_s18 + $0x30] sm:$0xff]  ;;  %v2239_v3 = vmul.f32 0.1, %v2207_v62 }
 0x6a2   : > { %v2211_v17 = vadd.f32 %v6330_v18, %v2186_v4  ;;  %v2209_v18 = vadd.f32 %v5050_v54, %v2180_v9  ;;  %v5057_v4 = vld [vmem:[%s5521_s18 + $0x10] sm:$0xff]  ;;  %v2268_v54 = vld [vmem:[#allocation2 + $0x20] sm:$0xff] }
 0x6a4   : > { %v2243_v55 = vmul.f32 0.1, %v2211_v17  ;;  %vm2227_vm7 = vcmp.ge.f32.partialorder %v2211_v17, 0.0  ;;  %v2241_v20 = vmul.f32 0.1, %v2209_v18  ;;  %vm2225_vm9 = vcmp.ge.f32.partialorder %v2209_v18, 0.0 }
 0x6a6   : > { %v6739_v19 = vsel %vm2225_vm9, %v2209_v18, %v2241_v20  ;;  %v2269_v18 = vld [vmem:[#allocation2 + $0x28] sm:$0xff] }
 0x6a7   : > { %v2188_v42 = vpop.f32.mrf.mxu2 }
 0x6a8   : > { %v2189_v34 = vadd.f32 %v2188_v42, %v2118_v51  ;;  %v2240_v42 = vmul.f32 0.1, %v2208_v6  ;;  %v5054_v51 = vld [vmem:[%s5521_s18 + $0x28] sm:$0xff] }
 0x6aa   : > { %v2212_v48 = vadd.f32 %v5048_v7, %v2189_v34  ;;  %v6744_v59 = vsel %vm2224_vm10, %v2208_v6, %v2240_v42  ;;  %v5056_v34 = vld [vmem:[%s5521_s18 + $0x18] sm:$0xff]  ;;  %v5059_v7 = vld [vmem:[%s5521_s18] sm:$0xff]  ;;  %v2274_v6 = vld [vmem:[#allocation2 + $0x50] sm:$0xff] }
 0x6ac   : > { %v2244_v45 = vmul.f32 0.1, %v2212_v48  ;;  %vm2228_vm6 = vcmp.ge.f32.partialorder %v2212_v48, 0.0 }
 0x6ae   : > { %v6724_v21 = vsel %vm2228_vm6, %v2212_v48, %v2244_v45  ;;  %v2265_v45 = vld [vmem:[#allocation2 + $0x8] sm:$0xff] }
 0x6af   : > { %v2191_v16 = vpop.f32.mrf.mxu2 }
 0x6b0   : > { %v2192_v13 = vadd.f32 %v2191_v16, %v2123_v47  ;;  %v6734_v47 = vsel %vm2226_vm8, %v2210_v8, %v2242_v40  ;;  %v2205_v16 = vadd.f32 %v5054_v51, %v2168_v26  ;;  %v2275_v40 = vld [vmem:[#allocation2 + $0x58] sm:$0xff]  ;;  %v2277_v26 = vld [vmem:[#allocation2 + $0x68] sm:$0xff] }
 0x6b2   : > { %v2213_v60 = vadd.f32 %v5046_v23, %v2192_v13  ;;  %vm2221_vm13 = vcmp.ge.f32.partialorder %v2205_v16, 0.0 }
 0x6b4   : > { %v2245_v49 = vmul.f32 0.1, %v2213_v60  ;;  %vm2229_vm5 = vcmp.ge.f32.partialorder %v2213_v60, 0.0 }
 0x6b6   : > { %v6720_v57 = vsel %vm2229_vm5, %v2213_v60, %v2245_v49 }
 0x6b7   : > { %v2194_v50 = vpop.f32.mrf.mxu2 }
 0x6b8   : > { %v2195_v39 = vadd.f32 %v2194_v50, %v2128_v5  ;;  %v2206_v5 = vadd.f32 %v5053_v28, %v2171_v36  ;;  %v2068_v50 = vpop.permute.xlu0 %2067  ;;  %v2272_v36 = vld [vmem:[#allocation2 + $0x40] sm:$0xff] }
 0x6b9   : > { %v2159_v30 = vadd.f32 %v6699_v15, %v2068_v50  ;;  %v2153_v15 = vadd.f32 %v6695_v43, %v2058_v33  ;;  %v2284_v50 = vld [vmem:[#allocation2 + $0xa0] sm:$0xff]  ;;  %v2289_v33 = vld [vmem:[#allocation2 + $0xc8] sm:$0xff] }
 0x6ba   : > { %v2214_v61 = vadd.f32 %v5045_v41, %v2195_v39  ;;  %v2204_v39 = vadd.f32 %v5055_v58, %v2165_v37  ;;  %v2238_v13 = vmul.f32 0.1, %v2206_v5  ;;  %vm2222_vm12 = vcmp.ge.f32.partialorder %v2206_v5, 0.0  ;;  %v2280_v37 = vld [vmem:[#allocation2 + $0x80] sm:$0xff]  ;;  %v2285_v58 = vld [vmem:[#allocation2 + $0xa8] sm:$0xff] }
 0x6bb   : > { %v2203_v41 = vadd.f32 %v5056_v34, %v2162_v31  ;;  %v2202_v23 = vadd.f32 %v5057_v4, %v2159_v30  ;;  %v2200_v48 = vadd.f32 %v5059_v7, %v2153_v15  ;;  %v2282_v31 = vld [vmem:[#allocation2 + $0x90] sm:$0xff]  ;;  %v2293_v7 = vld [vmem:[#allocation2 + $0xe8] sm:$0xff] }
 0x6bc   : > { %v2246_v32 = vmul.f32 0.1, %v2214_v61  ;;  %vm2230_vm4 = vcmp.ge.f32.partialorder %v2214_v61, 0.0  ;;  %v2236_v60 = vmul.f32 0.1, %v2204_v39  ;;  %vm2220_vm14 = vcmp.ge.f32.partialorder %v2204_v39, 0.0 }
 0x6bd   : > { %v2235_v46 = vmul.f32 0.1, %v2203_v41  ;;  %vm2219_vm15 = vcmp.ge.f32.partialorder %v2203_v41, 0.0  ;;  %vm2218_vm0 = vcmp.ge.f32.partialorder %v2202_v23, 0.0  ;;  %v2290_v4 = vld [vmem:[#allocation2 + $0xd0] sm:$0xff] }
 0x6be   : > { %v6716_v63 = vsel %vm2230_vm4, %v2214_v61, %v2246_v32  ;;  %v2237_v61 = vmul.f32 0.1, %v2205_v16  ;;  %v2234_v32 = vmul.f32 0.1, %v2202_v23  ;;  %v6762_v43 = vsel %vm2220_vm14, %v2204_v39, %v2236_v60  ;;  %v2291_v60 = vld [vmem:[#allocation2 + $0xd8] sm:$0xff] }
 0x6bf   : > { %v2197_v25 = vpop.f32.mrf.mxu2  ;;  %v6765_v9 = vsel %vm2219_vm15, %v2203_v41, %v2235_v46  ;;  %v2288_v41 = vld [vmem:[#allocation2 + $0xc0] sm:$0xff] }
 0x6c0   : > { %v2198_v44 = vadd.f32 %v2197_v25, %v2133_v2  ;;  %v6729_v2 = vsel %vm2227_vm7, %v2211_v17, %v2243_v55  ;;  %v2063_v25 = vpop.permute.xlu1 %2062  ;;  %v6758_v0 = vsel %vm2221_vm13, %v2205_v16, %v2237_v61  ;;  %7520 = vst [vmem:[#allocation38_spill] sm:$0xff] %v6765_v9  ;;  %v2232_v17 = vmul.f32 0.1, %v2200_v48  ;;  %v2270_v55 = vld [vmem:[#allocation2 + $0x30] sm:$0xff]  ;;  %v2283_v16 = vld [vmem:[#allocation2 + $0x98] sm:$0xff] }
 0x6c1   : > { %v2156_v56 = vadd.f32 %v6697_v10, %v2063_v25  ;;  %v5058_v10 = vld [vmem:[%s5521_s18 + $0x8] sm:$0xff]  ;;  %v6768_v49 = vsel %vm2218_vm0, %v2202_v23, %v2234_v32  ;;  %v2294_v32 = vld [vmem:[#allocation2 + $0xf0] sm:$0xff]  ;;  %s2909_s18 = sld [smem:[#allocation13]] }
 0x6c2   : > { %v2215_v14 = vadd.f32 %v5047_v35, %v2198_v44  ;;  %v6749_v44 = vsel %vm2223_vm11, %v2207_v62, %v2239_v3  ;;  %v6754_v35 = vsel %vm2222_vm12, %v2206_v5, %v2238_v13  ;;  %7521 = vst [vmem:[#allocation45_spill] sm:$0xff] %v6768_v49  ;;  %v2279_v62 = vld [vmem:[#allocation2 + $0x78] sm:$0xff]  ;;  %v2281_v5 = vld [vmem:[#allocation2 + $0x88] sm:$0xff]  ;;  %v2286_v13 = vld [vmem:[#allocation2 + $0xb0] sm:$0xff] }
 0x6c4   : > { %vm2231_vm3 = vcmp.ge.f32.partialorder %v2215_v14, 0.0  ;;  %v2247_v22 = vmul.f32 0.1, %v2215_v14 }
 0x6c6   : > { %v6712_v52 = vsel %vm2231_vm3, %v2215_v14, %v2247_v22  ;;  %v2201_v14 = vadd.f32 %v5058_v10, %v2156_v56  ;;  %vm2216_vm3 = vcmp.ge.f32.partialorder %v2200_v48, 0.0  ;;  %v2287_v56 = vld [vmem:[#allocation2 + $0xb8] sm:$0xff] }
 0x6c7   : > { %2600 = vmatpush.msrb.mxu1 %v6712_v52  ;;  %v6774_v8 = vsel %vm2216_vm3, %v2200_v48, %v2232_v17  ;;  %v2295_v17 = vld [vmem:[#allocation2 + $0xf8] sm:$0xff] }
 0x6c8   : > { %v2233_v22 = vmul.f32 0.1, %v2201_v14  ;;  %vm2217_vm2 = vcmp.ge.f32.partialorder %v2201_v14, 0.0  ;;  %7523 = vst [vmem:[#allocation55_spill] sm:$0xff] %v6774_v8 }
 0x6c9   : > { %2601 = vmatpush.msrb.mxu1 %v6716_v63 }
 0x6ca   : > { %v6771_v27 = vsel %vm2217_vm2, %v2201_v14, %v2233_v22  ;;  %v2292_v14 = vld [vmem:[#allocation2 + $0xe0] sm:$0xff] }
 0x6cb   : > { %2602 = vmatpush.msrb.mxu1 %v6720_v57  ;;  %7522 = vst [vmem:[#allocation50_spill] sm:$0xff] %v6771_v27 }
 0x6cd   : > { %2603 = vmatpush.msrb.mxu1 %v6724_v21 }
 0x6cf   : > { %2604 = vmatpush.msrb.mxu1 %v6729_v2 }
 0x6d1   : > { %2605 = vmatpush.msrb.mxu1 %v6734_v47 }
 0x6d3   : > { %2606 = vmatpush.msrb.mxu1 %v6739_v19 }
 0x6d5   : > { %2607 = vmatpush.msrb.mxu1 %v6744_v59 }
 0x6d7   : > { %2608 = vmatpush.msrb.mxu1 %v6749_v44 }
 0x6d9   : > { %2609 = vmatpush.msrb.mxu1 %v6754_v35 }
 0x6db   : > { %2610 = vmatpush.msrb.mxu1 %v6758_v0 }
 0x6dd   : > { %2611 = vmatpush.msrb.mxu1 %v6762_v43 }
 0x6df   : > { %2612 = vmatpush.msrb.mxu1 %v6765_v9 }
 0x6e1   : > { %2613 = vmatpush.msrb.mxu1 %v6768_v49 }
 0x6e3   : > { %2614 = vmatpush.msrb.mxu1 %v6771_v27 }
 0x6e5   : > { %2615 = vmatpush.msrb.mxu1 %v6774_v8 }
 0x6e6   : > { %2616 = vmatmul.f32.vlgmr.msrb.gmra.mxu1 %v2264_v12 }
 0x6ee   : > { %2619 = vmatmul.f32.gmra.mxu1 %v2265_v45  ;;  %v2296_v45 = vld [vmem:[#allocation2 + $0x100] sm:$0xff] }
 0x6f6   : > { %2622 = vmatmul.f32.gmra.mxu1 %v2266_v53 }
 0x6fe   : > { %2625 = vmatmul.f32.gmra.mxu1 %v2267_v24  ;;  %v2297_v24 = vld [vmem:[#allocation2 + $0x108] sm:$0xff] }
 0x706   : > { %2628 = vmatmul.f32.gmra.mxu1 %v2268_v54 }
 0x70e   : > { %2631 = vmatmul.f32.gmra.mxu1 %v2269_v18  ;;  %v2298_v18 = vld [vmem:[#allocation2 + $0x110] sm:$0xff] }
 0x716   : > { %2634 = vmatmul.f32.gmra.mxu1 %v2270_v55 }
 0x71e   : > { %2637 = vmatmul.f32.gmra.mxu1 %v2271_v29  ;;  %v2299_v29 = vld [vmem:[#allocation2 + $0x118] sm:$0xff] }
 0x726   : > { %2640 = vmatmul.f32.gmra.mxu1 %v2272_v36 }
 0x72e   : > { %2643 = vmatmul.f32.gmra.mxu1 %v2273_v1  ;;  %v2300_v1 = vld [vmem:[#allocation2 + $0x120] sm:$0xff] }
 0x736   : > { %2646 = vmatmul.f32.gmra.mxu1 %v2274_v6 }
 0x73e   : > { %2649 = vmatmul.f32.gmra.mxu1 %v2275_v40  ;;  %v2301_v40 = vld [vmem:[#allocation2 + $0x128] sm:$0xff] }
 0x746   : > { %2652 = vmatmul.f32.gmra.mxu1 %v2276_v38 }
 0x74e   : > { %2655 = vmatmul.f32.gmra.mxu1 %v2277_v26  ;;  %v2302_v26 = vld [vmem:[#allocation2 + $0x130] sm:$0xff] }
 0x756   : > { %2658 = vmatmul.f32.gmra.mxu1 %v2278_v11  ;;  %v2378_v11 = vpop.permute.xlu2 %2377 }
 0x75e   : > { %2661 = vmatmul.f32.gmra.mxu1 %v2279_v62 }
 0x763   : > { %v6777_v20 = vpop.f32.mrf.mxu1 }
 0x766   : > { %2664 = vmatmul.f32.gmra.mxu1 %v2280_v37  ;;  %v2303_v37 = vld [vmem:[#allocation2 + $0x138] sm:$0xff] }
 0x76b   : > { %v6779_v28 = vpop.f32.mrf.mxu1 }
 0x76e   : > { %2667 = vmatmul.f32.gmra.mxu1 %v2281_v5 }
 0x773   : > { %v6781_v42 = vpop.f32.mrf.mxu1 }
 0x776   : > { %2670 = vmatmul.f32.gmra.mxu1 %v2282_v31  ;;  %v2304_v31 = vld [vmem:[#allocation2 + $0x140] sm:$0xff] }
 0x77b   : > { %v6783_v51 = vpop.f32.mrf.mxu1 }
 0x77e   : > { %2673 = vmatmul.f32.gmra.mxu1 %v2283_v16  ;;  %v2363_v16 = vpop.permute.xlu2 %2362 }
 0x783   : > { %v6785_v3 = vpop.f32.mrf.mxu1 }
 0x786   : > { %2676 = vmatmul.f32.gmra.mxu1 %v2284_v50  ;;  %v2498_v50 = vpop.permute.xlu0 %2497 }
 0x78b   : > { %v6787_v30 = vpop.f32.mrf.mxu1 }
 0x78e   : > { %2679 = vmatmul.f32.gmra.mxu1 %v2285_v58 }
 0x793   : > { %v6789_v39 = vpop.f32.mrf.mxu1 }
 0x796   : > { %2682 = vmatmul.f32.gmra.mxu1 %v2286_v13  ;;  %v2305_v13 = vld [vmem:[#allocation2 + $0x148] sm:$0xff] }
 0x79b   : > { %v6791_v25 = vpop.f32.mrf.mxu1 }
 0x79e   : > { %2685 = vmatmul.f32.gmra.mxu1 %v2287_v56  ;;  %v2503_v56 = vpop.permute.xlu2 %2502 }
 0x7a3   : > { %v6793_v34 = vpop.f32.mrf.mxu1 }
 0x7a6   : > { %2688 = vmatmul.f32.gmra.mxu1 %v2288_v41  ;;  %v2488_v41 = vpop.permute.xlu0 %2487 }
 0x7ab   : > { %v6795_v61 = vpop.f32.mrf.mxu1 }
 0x7ae   : > { %2691 = vmatmul.f32.gmra.mxu1 %v2289_v33 }
 0x7b3   : > { %v6797_v15 = vpop.f32.mrf.mxu1 }
 0x7b6   : > { %2694 = vmatmul.f32.gmra.mxu1 %v2290_v4  ;;  %v2306_v4 = vld [vmem:[#allocation2 + $0x150] sm:$0xff] }
 0x7bb   : > { %v6799_v23 = vpop.f32.mrf.mxu1 }
 0x7be   : > { %2697 = vmatmul.f32.gmra.mxu1 %v2291_v60  ;;  %v2493_v60 = vpop.permute.xlu1 %2492 }
 0x7c3   : > { %v6801_v10 = vpop.f32.mrf.mxu1 }
 0x7c6   : > { %2700 = vmatmul.f32.gmra.mxu1 %v2292_v14  ;;  %v2518_v14 = vpop.permute.xlu2 %2517 }
 0x7cb   : > { %v6803_v46 = vpop.f32.mrf.mxu1 }
 0x7ce   : > { %2703 = vmatmul.f32.gmra.mxu1 %v2293_v7 }
 0x7d3   : > { %v6805_v48 = vpop.f32.mrf.mxu1 }
 0x7d6   : > { %2706 = vmatmul.f32.gmra.mxu1 %v2294_v32  ;;  %v2307_v32 = vld [vmem:[#allocation2 + $0x158] sm:$0xff] }
 0x7db   : > { %v6807_v22 = vpop.f32.mrf.mxu1 }
 0x7de   : > { %2709 = vmatmul.f32.gmra.mxu1 %v2295_v17  ;;  %v2368_v17 = vpop.permute.xlu0 %2367 }
 0x7e3   : > { %v6809_v12 = vpop.f32.mrf.mxu1 }
 0x7e6   : > { %2712 = vmatmul.f32.gmra.mxu1 %v2296_v45 }
 0x7eb   : > { %v6811_v53 = vpop.f32.mrf.mxu1 }
 0x7ee   : > { %2715 = vmatmul.f32.gmra.mxu1 %v2297_v24 }
 0x7f3   : > { %v6813_v54 = vpop.f32.mrf.mxu1 }
 0x7f6   : > { %2718 = vmatmul.f32.gmra.mxu1 %v2298_v18  ;;  %v2483_v18 = vpop.permute.xlu1 %2482 }
 0x7fb   : > { %v6815_v55 = vpop.f32.mrf.mxu1 }
 0x7fe   : > { %2721 = vmatmul.f32.gmra.mxu1 %v2299_v29  ;;  %v2373_v29 = vpop.permute.xlu2 %2372 }
 0x803   : > { %v6817_v36 = vpop.f32.mrf.mxu1 }
 0x806   : > { %2724 = vmatmul.f32.gmra.mxu1 %v2300_v1 }
 0x80b   : > { %v6819_v6 = vpop.f32.mrf.mxu1 }
 0x80e   : > { %2727 = vmatmul.f32.gmra.mxu1 %v2301_v40  ;;  %v2624_v40 = vadd.f32 %v6781_v42, %v2373_v29  ;;  %v2508_v42 = vpop.permute.xlu1 %2507 }
 0x813   : > { %v6821_v38 = vpop.f32.mrf.mxu1 }
 0x816   : > { %2730 = vmatmul.f32.gmra.mxu1 %v2302_v26 }
 0x81b   : > { %v6823_v62 = vpop.f32.mrf.mxu1 }
 0x81e   : > { %2733 = vmatmul.f32.gmra.mxu1 %v2303_v37  ;;  %v2627_v37 = vadd.f32 %v6783_v51, %v2378_v11  ;;  %v2618_v11 = vadd.f32 %v6777_v20, %v2363_v16  ;;  %v2538_v16 = vpop.permute.xlu2 %2537 }
 0x823   : > { %v2689_v5 = vpop.f32.mrf.mxu1 }
 0x826   : > { %2736 = vmatmul.f32.gmra.mxu1 %v2304_v31  ;;  %v2308_v31 = vld [vmem:[#allocation2 + $0x160] sm:$0xff] }
 0x82b   : > { %v2692_v58 = vpop.f32.mrf.mxu1 }
 0x82c   : > { %v2693_v1 = vadd.f32 %v2692_v58, %v2488_v41  ;;  %v2309_v41 = vld [vmem:[#allocation2 + $0x168] sm:$0xff] }
 0x82e   : > { %2739 = vmatmul.f32.gmra.mxu1 %v2305_v13  ;;  %v2690_v13 = vadd.f32 %v2689_v5, %v2483_v18  ;;  %v2311_v18 = vld [vmem:[#allocation2 + $0x178] sm:$0xff] }
 0x833   : > { %v2695_v33 = vpop.f32.mrf.mxu1 }
 0x834   : > { %v2696_v24 = vadd.f32 %v2695_v33, %v2493_v60  ;;  %v2621_v60 = vadd.f32 %v6779_v28, %v2368_v17 }
 0x836   : > { %2742 = vmatmul.f32.gmra.mxu1 %v2306_v4 }
 0x83b   : > { %v2698_v7 = vpop.f32.mrf.mxu1 }
 0x83c   : > { %v2699_v45 = vadd.f32 %v2698_v7, %v2498_v50  ;;  %v2383_v50 = vpop.permute.xlu0 %2382  ;;  %v2310_v7 = vld [vmem:[#allocation2 + $0x170] sm:$0xff] }
 0x83e   : > { %2745 = vmatmul.f32.gmra.mxu1 %v2307_v32  ;;  %4775 = vmatpush.xpose.msk.msrb.mxu2 %vm1228_vm1, %v2699_v45 }
 0x83f   : > { %4892 = vmatpush.xpose.msk.msrb.mxu3 %vm1228_vm1, %v2699_v45  ;;  %v2630_v45 = vadd.f32 %v6785_v3, %v2383_v50 }
 0x842   : > { %4776 = vmatpush.xpose.msk.msrb.mxu2 %vm1228_vm1, %v2696_v24 }
 0x843   : > { %4893 = vmatpush.xpose.msk.msrb.mxu3 %vm1228_vm1, %v2696_v24  ;;  %v2701_v26 = vpop.f32.mrf.mxu1 }
 0x844   : > { %v2513_v5 = vpop.permute.xlu0 %2512  ;;  %v2702_v33 = vadd.f32 %v2701_v26, %v2503_v56  ;;  %v2388_v56 = vpop.permute.xlu1 %2387 }
 0x845   : > { %4777 = vmatmul.msk.f32.vlgmr.msrb.gmra.mxu2 %vm1228_vm1, %v2624_v40  ;;  %v6853_v40 = vpop.permute.xlu2 %2527 }
 0x846   : > { %3015 = vmatpush.msra.mxu2 %v6758_v0  ;;  %4778 = vmatmul.msk.f32.vlgmr.msrb.gmra.mxu3 %vm1228_vm1, %v2627_v37 }
 0x847   : > { %4779 = vmatpush.xpose.msk.msra.mxu3 %vm1228_vm1, %v2693_v1  ;;  %2748 = vmatmul.f32.gmra.mxu1 %v2308_v31  ;;  %v2633_v1 = vadd.f32 %v6787_v30, %v2388_v56 }
 0x848   : > { %3016 = vmatpush.msra.mxu2 %v6762_v43 }
 0x84a   : > { %3061 = vmatpush.msrb.mxu2 %v6739_v19 }
 0x84b   : > { %4780 = vmatpush.xpose.msk.msra.mxu3 %vm1228_vm1, %v2690_v13  ;;  %v2704_v51 = vpop.f32.mrf.mxu1 }
 0x84c   : > { %3062 = vmatpush.msrb.mxu2 %v6744_v59  ;;  %v2705_v58 = vadd.f32 %v2704_v51, %v2508_v42  ;;  %v2398_v32 = vpop.permute.xlu0 %2397  ;;  %v2393_v3 = vpop.permute.xlu1 %2392 }
 0x84d   : > { %v2636_v26 = vadd.f32 %v6789_v39, %v2393_v3  ;;  %v6862_v31 = vpop.permute.xlu2 %2547  ;;  %v2639_v50 = vadd.f32 %v6791_v25, %v2398_v32 }
 0x84e   : > { %4781 = vmatmul.msk.f32.vlgmr.msra.gmra.mxu3 %vm1228_vm1, %v2618_v11 }
 0x84f   : > { %2751 = vmatmul.f32.gmra.mxu1 %v2309_v41  ;;  %4783 = vmatpush.xpose.msk.msrb.mxu3 %vm1228_vm1, %v2705_v58 }
 0x853   : > { %4784 = vmatpush.xpose.msk.msrb.mxu3 %vm1228_vm1, %v2702_v33  ;;  %v2707_v4 = vpop.f32.mrf.mxu1 }
 0x854   : > { %v2708_v29 = vadd.f32 %v2707_v4, %v2513_v5  ;;  %v2533_v17 = vpop.permute.xlu0 %2532 }
 0x855   : > { %v6869_v42 = vpop.permute.xlu2 %2542 }
 0x856   : > { %4782 = vmatmul.msk.f32.gmra.mxu3 %vm1228_vm1, %v2621_v60 }
 0x857   : > { %2754 = vmatmul.f32.gmra.mxu1 %v2310_v7 }
 0x85b   : > { %v2710_v20 = vpop.f32.mrf.mxu1 }
 0x85c   : > { %v2711_v24 = vadd.f32 %v2710_v20, %v2518_v14  ;;  %v2413_v37 = vpop.permute.xlu0 %2412 }
 0x85d   : > { %v2648_v41 = vadd.f32 %v6797_v15, %v2413_v37  ;;  %v2418_v25 = vpop.permute.xlu2 %2417 }
 0x85e   : > { %4785 = vmatmul.msk.f32.vlgmr.msrb.gmra.mxu3 %vm1228_vm1, %v2630_v45  ;;  %v2651_v33 = vadd.f32 %v6799_v23, %v2418_v25 }
 0x85f   : > { %2757 = vmatmul.f32.gmra.mxu1 %v2311_v18  ;;  %4787 = vmatpush.xpose.msk.msra.mxu3 %vm1228_vm1, %v2711_v24 }
 0x863   : > { %4788 = vmatpush.xpose.msk.msra.mxu3 %vm1228_vm1, %v2708_v29  ;;  %v6849_v28 = vpop.f32.mrf.mxu1 }
 0x864   : > { %v6867_v13 = vpop.permute.xlu0 %2522 }
 0x865   : > { %v2558_v7 = vpop.permute.xlu2 %2557 }
 0x866   : > { %4786 = vmatmul.msk.f32.gmra.mxu3 %vm1228_vm1, %v2633_v1 }
 0x867   : > { %2969 = vmatpush.msrb.mxu3 %v6771_v27 }
 0x869   : > { %2970 = vmatpush.msrb.mxu3 %v6774_v8 }
 0x86b   : > { %v6857_v14 = vpop.f32.mrf.mxu1 }
 0x86c   : > { %v6872_v58 = vpop.permute.xlu0 %2402 }
 0x86e   : > { %4789 = vmatmul.msk.f32.vlgmr.msra.gmra.mxu3 %vm1228_vm1, %v2636_v26 }
 0x86f   : > { %2992 = vmatpush.msra.mxu3 %v6765_v9 }
 0x871   : > { %2993 = vmatpush.msra.mxu3 %v6768_v49 }
 0x873   : > { %v2719_v30 = vpop.f32.mrf.mxu1 }
 0x874   : > { %v2720_v11 = vadd.f32 %v2719_v30, %v2533_v17  ;;  %v6882_v60 = vpop.permute.xlu0 %2422 }
 0x876   : > { %4790 = vmatmul.msk.f32.gmra.mxu3 %vm1228_vm1, %v2639_v50 }
 0x87b   : > { %v2722_v51 = vpop.f32.mrf.mxu1 }
 0x87c   : > { %v2723_v39 = vadd.f32 %v2722_v51, %v2538_v16  ;;  %v2553_v20 = vpop.permute.xlu0 %2552  ;;  %v6885_v16 = vpop.permute.xlu2 %2407 }
 0x87e   : > { %4807 = vmatpush.xpose.msk.msrb.mxu0 %vm1228_vm1, %v2723_v39 }
 0x882   : > { %4808 = vmatpush.xpose.msk.msrb.mxu0 %vm1228_vm1, %v2720_v11 }
 0x883   : > { %v6876_v5 = vpop.f32.mrf.mxu1 }
 0x884   : > { %v6888_v24 = vpop.permute.xlu0 %2427  ;;  %v2433_v56 = vpop.permute.xlu2 %2432 }
 0x885   : > { %4809 = vmatmul.msk.f32.vlgmr.msrb.gmra.mxu0 %vm1228_vm1, %v2648_v41  ;;  %v2660_v23 = vadd.f32 %v6805_v48, %v2433_v56 }
 0x88b   : > { %v6880_v4 = vpop.f32.mrf.mxu1 }
 0x88c   : > { %v2438_v29 = vpop.permute.xlu0 %2437 }
 0x88d   : > { %4810 = vmatmul.msk.f32.gmra.mxu0 %vm1228_vm1, %v2651_v33  ;;  %v2663_v17 = vadd.f32 %v6807_v22, %v2438_v29  ;;  %v2910_v22 = vstv %s2909_s18  ;;  %v2914_v29 = vld [vmem:[#allocation10 + $0x8] sm:$0xff]  ;;  %s7528_s18 = sld [smem:[#allocation22_spill]] }
 0x893   : > { %v2731_v32 = vpop.f32.mrf.mxu1  ;;  %s633_s29 = sand.u32 1, %s7528_s18  }
 0x894   : > { %v2732_v18 = vadd.f32 %v2731_v32, %v2553_v20  ;;  %s4716_s9 = sshll.u32 %s633_s29, 7  ;;  %s4558_s28 = scalar_lea.sflag [#allocation4], %s633_s29 }
 0x89b   : > { %v2734_v45 = vpop.f32.mrf.mxu1 }
 0x89c   : > { %v2735_v15 = vadd.f32 %v2734_v45, %v2558_v7 }
 0x89e   : > { %4819 = vmatpush.xpose.msk.msra.mxu0 %vm1228_vm1, %v2735_v15  ;;  %v2913_v15 = vld [vmem:[#allocation10] sm:$0xff] }
 0x8a2   : > { %4820 = vmatpush.xpose.msk.msra.mxu0 %vm1228_vm1, %v2732_v18 }
 0x8a5   : > { %4821 = vmatmul.msk.f32.vlgmr.msra.gmra.mxu0 %vm1228_vm1, %v2660_v23 }
 0x8a6   : > { %3394 = vmatpush.msrb.mxu0 %v6758_v0 }
 0x8a8   : > { %3395 = vmatpush.msrb.mxu0 %v6762_v43 }
 0x8aa   : > { %3463 = vmatpush.msra.mxu0 %v6729_v2 }
 0x8ac   : > { %3464 = vmatpush.msra.mxu0 %v6734_v47 }
 0x8ad   : > { %4822 = vmatmul.msk.f32.gmra.mxu0 %vm1228_vm1, %v2663_v17 }
 0x8c8   : > { %v2790_v30 = vpop.f32.mrf.mxu2 }
 0x8c9   : > { %v2793_v1 = vpop.f32.mrf.mxu3 }
 0x8d1   : > { %v2825_v3 = vpop.f32.mrf.mxu3 }
 0x8d2   : > { %v2826_v50 = vadd.f32 %v2825_v3, %v2790_v30  ;;  %v2714_v30 = vadd.f32 %v6849_v28, %v6867_v13  ;;  %v2642_v28 = vadd.f32 %v6793_v34, %v6872_v58  ;;  %v2657_v34 = vadd.f32 %v6803_v46, %v6888_v24 }
 0x8d9   : > { %v2828_v26 = vpop.f32.mrf.mxu3 }
 0x8da   : > { %v2829_v25 = vadd.f32 %v2828_v26, %v2793_v1  ;;  %v2717_v26 = vadd.f32 %v6857_v14, %v6853_v40  ;;  %v2654_v40 = vadd.f32 %v6801_v10, %v6882_v60  ;;  %v2645_v14 = vadd.f32 %v6795_v61, %v6885_v16 }
 0x8e1   : > { %v2860_v37 = vpop.f32.mrf.mxu3 }
 0x8e2   : > { %v2866_v51 = vadd.f32 %v2860_v37, %v2826_v50  ;;  %v2726_v50 = vadd.f32 %v6876_v5, %v6869_v42 }
 0x8e9   : > { %v2863_v48 = vpop.f32.mrf.mxu3 }
 0x8ea   : > { %v2867_v33 = vadd.f32 %v2863_v48, %v2829_v25  ;;  %v2729_v48 = vadd.f32 %v6880_v4, %v6862_v31 }
 0x8f1   : > { %v2897_v39 = vpop.f32.mrf.mxu3 }
 0x8f2   : > { %v2903_v11 = vadd.f32 %v2897_v39, %v2866_v51 }
 0x8f4   : > { %v2905_v41 = vmul.f32 0.015625, %v2903_v11 }
 0x8f6   : > { %5017 = vtanh.f32 %v2905_v41 }
 0x8f9   : > { %v2900_v7 = vpop.f32.mrf.mxu3 }
 0x8fa   : > { %v2904_v32 = vadd.f32 %v2900_v7, %v2867_v33 }
 0x8fc   : > { %v5018_v20 = vpop.eup %5017  ;;  %v2906_v45 = vmul.f32 0.015625, %v2904_v32 }
 0x8fd   : > { %v2911_v18 = vmul.f32 %v5018_v20, %v2910_v22 }
 0x8fe   : > { %5019 = vtanh.f32 %v2906_v45 }
 0x8ff   : > { %v2915_v56 = vadd.f32 %v2913_v15, %v2911_v18 }
 0x901   : > { %2917 = vxpose.xlu1.b32.start [1/2] (short) (narrow) %v2915_v56, 16 }
 0x902   : > { %v3168_v51 = vpop.f32.mrf.mxu0 }
 0x904   : > { %v5020_v23 = vpop.eup %5019 }
 0x905   : > { %v2912_v17 = vmul.f32 %v5020_v23, %v2910_v22 }
 0x907   : > { %v2916_v3 = vadd.f32 %v2914_v29, %v2912_v17 }
 0x909   : > { %2918 = vxpose.xlu1.b32.end [2/2] (short) (narrow) %v2916_v3, 16 }
 0x90a   : > { %v3171_v33 = vpop.f32.mrf.mxu0 }
 0x922   : > { %v3275_v20 = vpop.f32.mrf.mxu0 }
 0x92a   : > { %v3278_v3 = vpop.f32.mrf.mxu0 }
 0x9a5   : > { %v2933_v37 = vpop.trf.xlu1 }
 0x9a6   : > { %4791 = vmatmul.msk.f32.vlgmr.msrb.gmra.mxu3 %vm1228_vm1, %v2933_v37  ;;  %4795 = vmatmul.msk.f32.vlgmr.msra.gmra.mxu2 %vm1228_vm1, %v2933_v37 }
 0x9a7   : > { %3038 = vmatpush.msrb.mxu3 %v6749_v44  ;;  %3084 = vmatpush.msra.mxu2 %v6729_v2 }
 0x9a9   : > { %3039 = vmatpush.msrb.mxu3 %v6754_v35  ;;  %3085 = vmatpush.msra.mxu2 %v6734_v47 }
 0x9ad   : > { %v2934_v1 = vpop.trf.xlu1 }
 0x9ae   : > { %4792 = vmatmul.msk.f32.gmra.mxu3 %vm1228_vm1, %v2934_v1  ;;  %4796 = vmatmul.msk.f32.gmra.mxu2 %vm1228_vm1, %v2934_v1 }
 0x9b6   : > { %4793 = vmatmul.msk.f32.vlgmr.msra.gmra.mxu3 %vm1228_vm1, %v2933_v37  ;;  %4799 = vmatmul.msk.f32.vlgmr.msrb.gmra.mxu2 %vm1228_vm1, %v2933_v37 }
 0x9b7   : > { %3107 = vmatpush.msra.mxu3 %v6720_v57  ;;  %3130 = vmatpush.msrb.mxu2 %v6712_v52 }
 0x9b9   : > { %3108 = vmatpush.msra.mxu3 %v6724_v21  ;;  %3131 = vmatpush.msrb.mxu2 %v6716_v63 }
 0x9be   : > { %4794 = vmatmul.msk.f32.gmra.mxu3 %vm1228_vm1, %v2934_v1  ;;  %4800 = vmatmul.msk.f32.gmra.mxu2 %vm1228_vm1, %v2934_v1 }
 0x9c6   : > { %4797 = vmatmul.msk.f32.vlgmr.msrb.gmra.mxu3 %vm1228_vm1, %v2933_v37  ;;  %4801 = vmatmul.msk.f32.vlgmr.msra.gmra.mxu2 %vm1228_vm1, %v2933_v37 }
 0x9c7   : > { %4811 = vmatpush.xpose.msk.msrb.mxu3 %vm1228_vm1, %v2717_v26  ;;  %4815 = vmatpush.xpose.msk.msra.mxu2 %vm1228_vm1, %v2729_v48 }
 0x9cb   : > { %4812 = vmatpush.xpose.msk.msrb.mxu3 %vm1228_vm1, %v2714_v30  ;;  %4816 = vmatpush.xpose.msk.msra.mxu2 %vm1228_vm1, %v2726_v50  ;;  %v3292_v30 = vld [vmem:[#allocation10 + $0x10] sm:$0xff] }
 0x9ce   : > { %4798 = vmatmul.msk.f32.gmra.mxu3 %vm1228_vm1, %v2934_v1  ;;  %4802 = vmatmul.msk.f32.gmra.mxu2 %vm1228_vm1, %v2934_v1 }
 0x9d6   : > { %4803 = vmatmul.msk.f32.vlgmr.msra.gmra.mxu3 %vm1228_vm1, %v2933_v37  ;;  %4805 = vmatmul.msk.f32.vlgmr.msrb.gmra.mxu2 %vm1228_vm1, %v2933_v37 }
 0x9d7   : > { %3348 = vmatpush.msra.mxu3 %v6771_v27  ;;  %3371 = vmatpush.msrb.mxu2 %v6765_v9 }
 0x9d9   : > { %3349 = vmatpush.msra.mxu3 %v6774_v8  ;;  %3372 = vmatpush.msrb.mxu2 %v6768_v49 }
 0x9de   : > { %4804 = vmatmul.msk.f32.gmra.mxu3 %vm1228_vm1, %v2934_v1  ;;  %4806 = vmatmul.msk.f32.gmra.mxu2 %vm1228_vm1, %v2934_v1  ;;  %v3288_v1 = vstv %s4823_s22  ;;  %s7312_s22 = scalar_lea.vmem [#allocation14], %s4716_s9 }
 0x9df   : > { %s4570_s13 = sshll.u32 %s7312_s22, 4  ;;  %s4571_s13 = int_to_ptr.vmem [resolvable:$true] %s4570_s13 }
 0x9e6   : > { %4813 = vmatmul.msk.f32.vlgmr.msrb.gmra.mxu3 %vm1228_vm1, %v2642_v28  ;;  %4817 = vmatmul.msk.f32.vlgmr.msra.gmra.mxu2 %vm1228_vm1, %v2654_v40 }
 0x9e7   : > { %3417 = vmatpush.msrb.mxu3 %v6749_v44  ;;  %3440 = vmatpush.msra.mxu2 %v6739_v19 }
 0x9e9   : > { %3418 = vmatpush.msrb.mxu3 %v6754_v35  ;;  %3441 = vmatpush.msra.mxu2 %v6744_v59 }
 0x9ee   : > { %4814 = vmatmul.msk.f32.gmra.mxu3 %vm1228_vm1, %v2645_v14  ;;  %4818 = vmatmul.msk.f32.gmra.mxu2 %vm1228_vm1, %v2657_v34  ;;  %v3293_v14 = vld [vmem:[#allocation10 + $0x18] sm:$0xff] }
 0xa29   : > { %v6955_v10 = vpop.f32.mrf.mxu3  ;;  %v6957_v31 = vpop.f32.mrf.mxu2 }
 0xa31   : > { %v6959_v13 = vpop.f32.mrf.mxu3  ;;  %v6961_v42 = vpop.f32.mrf.mxu2 }
 0xa39   : > { %v6963_v58 = vpop.f32.mrf.mxu3  ;;  %v6965_v5 = vpop.f32.mrf.mxu2 }
 0xa41   : > { %v6967_v61 = vpop.f32.mrf.mxu3  ;;  %v6969_v4 = vpop.f32.mrf.mxu2 }
 0xa49   : > { %v6971_v46 = vpop.f32.mrf.mxu3  ;;  %v6973_v60 = vpop.f32.mrf.mxu2 }
 0xa51   : > { %v6975_v16 = vpop.f32.mrf.mxu3  ;;  %v6977_v24 = vpop.f32.mrf.mxu2 }
 0xa59   : > { %v6979_v39 = vpop.f32.mrf.mxu3  ;;  %v6981_v11 = vpop.f32.mrf.mxu2 }
 0xa61   : > { %v6983_v41 = vpop.f32.mrf.mxu3  ;;  %v6985_v25 = vpop.f32.mrf.mxu2 }
 0xa69   : > { %v3203_v7 = vpop.f32.mrf.mxu3  ;;  %v3238_v32 = vpop.f32.mrf.mxu2 }
 0xa6a   : > { %v3204_v22 = vadd.f32 %v3203_v7, %v3168_v51  ;;  %v3954_v7 = vld [vmem:[%s7405_s10 + $0x48] sm:$0xff] }
 0xa6c   : > { %v3244_v45 = vadd.f32 %v3238_v32, %v3204_v22  ;;  %v2737_v32 = vpop.f32.mrf.mxu1  ;;  %v3952_v22 = vld [vmem:[%s7405_s10 + $0x38] sm:$0xff] }
 0xa6e   : > { %v3281_v15 = vadd.f32 %v3275_v20, %v3244_v45  ;;  %v3950_v45 = vld [vmem:[%s7405_s10 + $0x28] sm:$0xff] }
 0xa70   : > { %v3283_v18 = vmul.f32 0.015625, %v3281_v15  ;;  %v3948_v15 = vld [vmem:[%s7405_s10 + $0x18] sm:$0xff] }
 0xa71   : > { %v3206_v56 = vpop.f32.mrf.mxu3  ;;  %v3241_v29 = vpop.f32.mrf.mxu2 }
 0xa72   : > { %5021 = vtanh.f32 %v3283_v18  ;;  %v3207_v23 = vadd.f32 %v3206_v56, %v3171_v33  ;;  %v2357_v33 = vld [vmem:[%s7403_s8 + $0x168] sm:$0xff]  ;;  %v2578_v56 = vpop.permute.xlu2 %2577 }
 0xa74   : > { %v3245_v17 = vadd.f32 %v3241_v29, %v3207_v23  ;;  %v2740_v20 = vpop.f32.mrf.mxu1  ;;  %v3946_v23 = vld [vmem:[%s7405_s10 + $0x8] sm:$0xff] }
 0xa76   : > { %v3282_v37 = vadd.f32 %v3278_v3, %v3245_v17  ;;  %v2573_v17 = vpop.permute.xlu0 %2572  ;;  %v4316_v3 = vld [vmem:[%s7407_s12] sm:$0xff] }
 0xa78   : > { %v5022_v26 = vpop.eup %5021  ;;  %v3284_v48 = vmul.f32 0.015625, %v3282_v37 }
 0xa79   : > { %v3289_v50 = vmul.f32 %v5022_v26, %v3288_v1 }
 0xa7a   : > { %5023 = vtanh.f32 %v3284_v48  ;;  %v2568_v37 = vpop.permute.xlu2 %2567  ;;  %v4318_v48 = vld [vmem:[%s7407_s12 + $0x10] sm:$0xff] }
 0xa7b   : > { %v3294_v28 = vadd.f32 %v3292_v30, %v3289_v50 }
 0xa7c   : > { %v2743_v18 = vpop.f32.mrf.mxu1 }
 0xa7d   : > { %3296 = vxpose.xlu1.b32.start [1/2] (short) (narrow) %v3294_v28, 16  ;;  %v4320_v28 = vld [vmem:[%s7407_s12 + $0x20] sm:$0xff] }
 0xa7e   : > { %v2453_v26 = vpop.permute.xlu0 %2452 }
 0xa80   : > { %v5024_v40 = vpop.eup %5023 }
 0xa81   : > { %v3290_v34 = vmul.f32 %v5024_v40, %v3288_v1 }
 0xa82   : > { %v2563_v30 = vpop.permute.xlu2 %2562 }
 0xa83   : > { %v3295_v51 = vadd.f32 %v3293_v14, %v3290_v34 }
 0xa84   : > { %v2746_v29 = vpop.f32.mrf.mxu1 }
 0xa85   : > { %3297 = vxpose.xlu1.b32.end [2/2] (short) (narrow) %v3295_v51, 16  ;;  %v2747_v51 = vadd.f32 %v2746_v29, %v2578_v56 }
 0xa86   : > { %v7018_v40 = vpop.permute.xlu0 %2582 }
 0xa8a   : > { %v2443_v14 = vpop.permute.xlu2 %2442 }
 0xa8c   : > { %v7008_v1 = vpop.f32.mrf.mxu1 }
 0xa92   : > { %v2463_v56 = vpop.permute.xlu2 %2462 }
 0xa94   : > { %v7013_v50 = vpop.f32.mrf.mxu1 }
 0xadf   : > { %2587 = vperm.xlu1 %5003, %v2357_v33   ;;  %v4322_v33 = vld [vmem:[%s7407_s12 + $0x30] sm:$0xff] }
 0xae7   : > { %4008 = vperm.xlu1 %5003, %v3954_v7   ;;  %v2755_v7 = vpop.f32.mrf.mxu1 }
 0xaef   : > { %3998 = vperm.xlu1 %5003, %v3952_v22   ;;  %v2744_v22 = vadd.f32 %v2743_v18, %v2573_v17  ;;  %v2758_v29 = vpop.f32.mrf.mxu1  ;;  %v2741_v17 = vadd.f32 %v2740_v20, %v2568_v37  ;;  %v4328_v20 = vld [vmem:[%s7407_s12 + $0x60] sm:$0xff]  ;;  %v2672_v37 = vadd.f32 %v6813_v54, %v2453_v26 }
 0xaf7   : > { %3988 = vperm.xlu1 %5003, %v3950_v45   ;;  %v2458_v45 = vpop.permute.xlu0 %2457 }
 0xaf8   : > { %v2675_v54 = vadd.f32 %v6815_v55, %v2458_v45 }
 0xaff   : > { %3978 = vperm.xlu1 %5003, %v3948_v15   ;;  %v2598_v18 = vpop.permute.xlu0 %2597 }
 0xb07   : > { %3968 = vperm.xlu1 %5003, %v3946_v23   ;;  %v4324_v23 = vld [vmem:[%s7407_s12 + $0x40] sm:$0xff] }
 0xb0f   : > { %4334 = vperm.xlu1 %5003, %v4316_v3   ;;  %v2759_v3 = vadd.f32 %v2758_v29, %v2598_v18 }
 0xb17   : > { %4344 = vperm.xlu1 %5003, %v4318_v48   ;;  %v4326_v48 = vld [vmem:[%s7407_s12 + $0x50] sm:$0xff] }
 0xb1f   : > { %4354 = vperm.xlu1 %5003, %v4320_v28   ;;  %v2593_v28 = vpop.permute.xlu2 %2592 }
 0xb21   : > { %v3312_v34 = vpop.trf.xlu1 }
 0xb22   : > { %4824 = vmatmul.msk.f32.vlgmr.msra.gmra.mxu3 %vm1228_vm1, %v3312_v34  ;;  %4826 = vmatmul.msk.f32.vlgmr.msrb.gmra.mxu2 %vm1228_vm1, %v3312_v34 }
 0xb23   : > { %4828 = vmatmul.msk.f32.vlgmr.msrb.gmra.mxu0 %vm1228_vm1, %v3312_v34  ;;  %3486 = vmatpush.msra.mxu3 %v6720_v57 }
 0xb24   : > { %3509 = vmatpush.msrb.mxu2 %v6712_v52  ;;  %4840 = vmatpush.xpose.msk.msrb.mxu0 %vm1228_vm1, %v2747_v51  ;;  %v2738_v51 = vadd.f32 %v2737_v32, %v2563_v30  ;;  %v4330_v32 = vld [vmem:[%s7407_s12 + $0x70] sm:$0xff]  ;;  %v2448_v30 = vpop.permute.xlu0 %2447 }
 0xb25   : > { %3487 = vmatpush.msra.mxu3 %v6724_v21 }
 0xb26   : > { %3510 = vmatpush.msrb.mxu2 %v6716_v63 }
 0xb27   : > { %4364 = vperm.xlu1 %5003, %v4322_v33   ;;  %v2756_v33 = vadd.f32 %v2755_v7, %v2593_v28  ;;  %v2468_v26 = vpop.permute.xlu2 %2467  ;;  %v2666_v7 = vadd.f32 %v6809_v12, %v2443_v14  ;;  %v2750_v12 = vadd.f32 %v7008_v1, %v7018_v40 }
 0xb28   : > { %4841 = vmatpush.xpose.msk.msrb.mxu0 %vm1228_vm1, %v2744_v22 }
 0xb29   : > { %v3313_v15 = vpop.trf.xlu1 }
 0xb2a   : > { %4825 = vmatmul.msk.f32.gmra.mxu3 %vm1228_vm1, %v3313_v15  ;;  %4827 = vmatmul.msk.f32.gmra.mxu2 %vm1228_vm1, %v3313_v15 }
 0xb2b   : > { %4829 = vmatmul.msk.f32.gmra.mxu0 %vm1228_vm1, %v3313_v15 }
 0xb2f   : > { %4374 = vperm.xlu1 %5003, %v4324_v23   ;;  %v2478_v55 = vpop.permute.xlu2 %2477 }
 0xb30   : > { %v2687_v14 = vadd.f32 %v6823_v62, %v2478_v55 }
 0xb32   : > { %4830 = vmatmul.msk.f32.vlgmr.msrb.gmra.mxu3 %vm1228_vm1, %v3312_v34  ;;  %4832 = vmatmul.msk.f32.vlgmr.msra.gmra.mxu2 %vm1228_vm1, %v3312_v34 }
 0xb33   : > { %4834 = vmatmul.msk.f32.vlgmr.msra.gmra.mxu0 %vm1228_vm1, %v3312_v34  ;;  %4844 = vmatpush.xpose.msk.msrb.mxu3 %vm1228_vm1, %v2741_v17 }
 0xb34   : > { %4852 = vmatpush.xpose.msk.msra.mxu0 %vm1228_vm1, %v2759_v3 }
 0xb37   : > { %4845 = vmatpush.xpose.msk.msrb.mxu3 %vm1228_vm1, %v2738_v51  ;;  %4384 = vperm.xlu1 %5003, %v4326_v48  }
 0xb38   : > { %4853 = vmatpush.xpose.msk.msra.mxu0 %vm1228_vm1, %v2756_v33 }
 0xb3a   : > { %4831 = vmatmul.msk.f32.gmra.mxu3 %vm1228_vm1, %v3313_v15  ;;  %4833 = vmatmul.msk.f32.gmra.mxu2 %vm1228_vm1, %v3313_v15 }
 0xb3b   : > { %4835 = vmatmul.msk.f32.gmra.mxu0 %vm1228_vm1, %v3313_v15 }
 0xb3f   : > { %4394 = vperm.xlu1 %5003, %v4328_v20  }
 0xb42   : > { %4836 = vmatmul.msk.f32.vlgmr.msra.gmra.mxu3 %vm1228_vm1, %v3312_v34  ;;  %4838 = vmatmul.msk.f32.vlgmr.msrb.gmra.mxu2 %vm1228_vm1, %v3312_v34  ;;  %v2473_v34 = vpop.permute.xlu0 %2472 }
 0xb43   : > { %4842 = vmatmul.msk.f32.vlgmr.msrb.gmra.mxu0 %vm1228_vm1, %v2672_v37  ;;  %3727 = vmatpush.msra.mxu3 %v6771_v27  ;;  %v2684_v22 = vadd.f32 %v6821_v38, %v2473_v34  ;;  %v2669_v38 = vadd.f32 %v6811_v53, %v2448_v30  ;;  %v2681_v53 = vadd.f32 %v6819_v6, %v2468_v26 }
 0xb44   : > { %3773 = vmatpush.msrb.mxu0 %v6758_v0 }
 0xb45   : > { %3728 = vmatpush.msra.mxu3 %v6774_v8 }
 0xb46   : > { %3774 = vmatpush.msrb.mxu0 %v6762_v43 }
 0xb47   : > { %4404 = vperm.xlu1 %5003, %v4330_v32  }
 0xb4a   : > { %4837 = vmatmul.msk.f32.gmra.mxu3 %vm1228_vm1, %v3313_v15  ;;  %4839 = vmatmul.msk.f32.gmra.mxu2 %vm1228_vm1, %v3313_v15 }
 0xb4b   : > { %4843 = vmatmul.msk.f32.gmra.mxu0 %vm1228_vm1, %v2675_v54 }
 0xb51   : > { %v2588_v23 = vpop.permute.xlu1 %2587 }
 0xb52   : > { %v2753_v29 = vadd.f32 %v7013_v50, %v2588_v23  ;;  %4846 = vmatmul.msk.f32.vlgmr.msrb.gmra.mxu3 %vm1228_vm1, %v2666_v7  ;;  %v2678_v50 = vadd.f32 %v6817_v36, %v2463_v56 }
 0xb53   : > { %4854 = vmatmul.msk.f32.vlgmr.msra.gmra.mxu0 %vm1228_vm1, %v2684_v22  ;;  %3796 = vmatpush.msrb.mxu3 %v6749_v44 }
 0xb54   : > { %3842 = vmatpush.msra.mxu0 %v6729_v2  ;;  %4848 = vmatpush.xpose.msk.msra.mxu2 %vm1228_vm1, %v2753_v29 }
 0xb55   : > { %3797 = vmatpush.msrb.mxu3 %v6754_v35 }
 0xb56   : > { %3843 = vmatpush.msra.mxu0 %v6734_v47 }
 0xb58   : > { %4849 = vmatpush.xpose.msk.msra.mxu2 %vm1228_vm1, %v2750_v12 }
 0xb5a   : > { %4847 = vmatmul.msk.f32.gmra.mxu3 %vm1228_vm1, %v2669_v38 }
 0xb5b   : > { %4855 = vmatmul.msk.f32.gmra.mxu0 %vm1228_vm1, %v2687_v14  ;;  %4850 = vmatmul.msk.f32.vlgmr.msra.gmra.mxu2 %vm1228_vm1, %v2678_v50  ;;  %v3667_v14 = vstv %s4856_s21 }
 0xb5c   : > { %3750 = vmatpush.msrb.mxu2 %v6765_v9 }
 0xb5e   : > { %3751 = vmatpush.msrb.mxu2 %v6768_v49  ;;  %v3671_v49 = vld [vmem:[#allocation10 + $0x20] sm:$0xff] }
 0xb60   : > { %3819 = vmatpush.msra.mxu2 %v6739_v19 }
 0xb62   : > { %3820 = vmatpush.msra.mxu2 %v6744_v59 }
 0xb63   : > { %4851 = vmatmul.msk.f32.gmra.mxu2 %vm1228_vm1, %v2681_v53 }
 0xba0   : > { %v7094_v36 = vpop.f32.mrf.mxu0 }
 0xba5   : > { %v7096_v62 = vpop.f32.mrf.mxu3  ;;  %v7098_v1 = vpop.f32.mrf.mxu2 }
 0xba8   : > { %v7100_v40 = vpop.f32.mrf.mxu0 }
 0xbad   : > { %v7102_v45 = vpop.f32.mrf.mxu3  ;;  %v7104_v15 = vpop.f32.mrf.mxu2 }
 0xbb0   : > { %v7108_v18 = vpop.f32.mrf.mxu0 }
 0xbb5   : > { %v7106_v56 = vpop.f32.mrf.mxu3  ;;  %v7110_v17 = vpop.f32.mrf.mxu2 }
 0xbb8   : > { %v7114_v3 = vpop.f32.mrf.mxu0 }
 0xbbd   : > { %v7112_v6 = vpop.f32.mrf.mxu3  ;;  %v7116_v48 = vpop.f32.mrf.mxu2 }
 0xbc0   : > { %v3547_v51 = vpop.f32.mrf.mxu0 }
 0xbc5   : > { %v7118_v28 = vpop.f32.mrf.mxu3  ;;  %v3512_v33 = vpop.f32.mrf.mxu2 }
 0xbc8   : > { %v3550_v37 = vpop.f32.mrf.mxu0 }
 0xbcd   : > { %v3492_v20 = vpop.f32.mrf.mxu3  ;;  %v3515_v32 = vpop.f32.mrf.mxu2 }
 0xbd0   : > { %v3654_v26 = vpop.f32.mrf.mxu0 }
 0xbd5   : > { %v3582_v30 = vpop.f32.mrf.mxu3 }
 0xbd6   : > { %v3583_v54 = vadd.f32 %v3582_v30, %v3547_v51 }
 0xbd8   : > { %v3657_v50 = vpop.f32.mrf.mxu0 }
 0xbdd   : > { %v3585_v23 = vpop.f32.mrf.mxu3 }
 0xbde   : > { %v3617_v34 = vpop.f32.mrf.mxu2  ;;  %v3586_v12 = vadd.f32 %v3585_v23, %v3550_v37  ;;  %v3955_v37 = vld [vmem:[%s7405_s10 + $0x50] sm:$0xff] }
 0xbdf   : > { %v3623_v7 = vadd.f32 %v3617_v34, %v3583_v54  ;;  %v3672_v54 = vld [vmem:[#allocation10 + $0x28] sm:$0xff] }
 0xbe1   : > { %v3660_v22 = vadd.f32 %v3654_v26, %v3623_v7 }
 0xbe3   : > { %v3662_v29 = vmul.f32 0.015625, %v3660_v22 }
 0xbe5   : > { %5025 = vtanh.f32 %v3662_v29 }
 0xbe6   : > { %v3620_v55 = vpop.f32.mrf.mxu2 }
 0xbe7   : > { %v3624_v38 = vadd.f32 %v3620_v55, %v3586_v12  ;;  %v3934_v55 = vld [vmem:[#allocation7 + $0x128] sm:$0xff] }
 0xbe9   : > { %v3661_v53 = vadd.f32 %v3657_v50, %v3624_v38  ;;  %v3939_v38 = vld [vmem:[#allocation7 + $0x150] sm:$0xff]  ;;  %v7190_v50 = vpop.permute.xlu1 %4008 }
 0xbeb   : > { %v5026_v8 = vpop.eup %5025  ;;  %v3663_v27 = vmul.f32 0.015625, %v3661_v53 }
 0xbec   : > { %v3668_v9 = vmul.f32 %v5026_v8, %v3667_v14  ;;  %v3898_v8 = vld [vmem:[#allocation7 + $0x8] sm:$0xff] }
 0xbed   : > { %5027 = vtanh.f32 %v3663_v27  ;;  %v3900_v27 = vld [vmem:[#allocation7 + $0x18] sm:$0xff] }
 0xbee   : > { %v3673_v51 = vadd.f32 %v3671_v49, %v3668_v9  ;;  %v3897_v49 = vld [vmem:[#allocation7] sm:$0xff] }
 0xbf0   : > { %3675 = vxpose.xlu0.b32.start [1/2] (short) (narrow) %v3673_v51, 16 }
 0xbf3   : > { %v5028_v30 = vpop.eup %5027 }
 0xbf4   : > { %v3669_v26 = vmul.f32 %v5028_v30, %v3667_v14 }
 0xbf6   : > { %v3674_v34 = vadd.f32 %v3672_v54, %v3669_v26  ;;  %v3937_v54 = vld [vmem:[#allocation7 + $0x140] sm:$0xff]  ;;  %v3942_v26 = vld [vmem:[#allocation7 + $0x168] sm:$0xff] }
 0xbf8   : > { %3676 = vxpose.xlu0.b32.end [2/2] (short) (narrow) %v3674_v34, 16 }
 0xc66   : > { %4013 = vperm.xlu0 %5002, %v3955_v37  }
 0xc94   : > { %v3691_v7 = vpop.trf.xlu0 }
 0xc95   : > { %4857 = vmatmul.msk.f32.vlgmr.msra.gmra.mxu3 %vm1228_vm1, %v3691_v7  ;;  %4859 = vmatmul.msk.f32.vlgmr.msrb.gmra.mxu2 %vm1228_vm1, %v3691_v7 }
 0xc96   : > { %4861 = vmatmul.msk.f32.vlgmr.msrb.gmra.mxu0 %vm1228_vm1, %v3691_v7  ;;  %3865 = vmatpush.msra.mxu3 %v6720_v57 }
 0xc97   : > { %3888 = vmatpush.msrb.mxu2 %v6712_v52  ;;  %4041 = vmatpush.msrb.mxu0 %v6985_v25  ;;  %v3919_v25 = vld [vmem:[#allocation7 + $0xb0] sm:$0xff] }
 0xc98   : > { %3866 = vmatpush.msra.mxu3 %v6724_v21 }
 0xc99   : > { %3889 = vmatpush.msrb.mxu2 %v6716_v63  ;;  %4042 = vmatpush.msrb.mxu0 %v6981_v11  ;;  %v3921_v11 = vld [vmem:[#allocation7 + $0xc0] sm:$0xff] }
 0xc9b   : > { %4043 = vmatpush.msrb.mxu0 %v6983_v41 }
 0xc9c   : > { %v3692_v9 = vpop.trf.xlu0 }
 0xc9d   : > { %4044 = vmatpush.msrb.mxu0 %v6979_v39  ;;  %4858 = vmatmul.msk.f32.gmra.mxu3 %vm1228_vm1, %v3692_v9  ;;  %v3916_v39 = vld [vmem:[#allocation7 + $0x98] sm:$0xff] }
 0xc9e   : > { %4860 = vmatmul.msk.f32.gmra.mxu2 %vm1228_vm1, %v3692_v9  ;;  %4862 = vmatmul.msk.f32.gmra.mxu0 %vm1228_vm1, %v3692_v9 }
 0xc9f   : > { %4045 = vmatpush.msrb.mxu0 %v6977_v24  ;;  %v7172_v24 = vpop.permute.xlu2 %4038 }
 0xca1   : > { %4046 = vmatpush.msrb.mxu0 %v6973_v60  ;;  %v3913_v60 = vld [vmem:[#allocation7 + $0x80] sm:$0xff] }
 0xca3   : > { %4047 = vmatpush.msrb.mxu0 %v6969_v4  ;;  %v3910_v4 = vld [vmem:[#allocation7 + $0x68] sm:$0xff] }
 0xca5   : > { %4048 = vmatpush.msrb.mxu0 %v6965_v5  ;;  %4863 = vmatmul.msk.f32.vlgmr.msrb.gmra.mxu3 %vm1228_vm1, %v3691_v7  ;;  %v3907_v5 = vld [vmem:[#allocation7 + $0x50] sm:$0xff] }
 0xca6   : > { %4865 = vmatmul.msk.f32.vlgmr.msra.gmra.mxu2 %vm1228_vm1, %v3691_v7  ;;  %4867 = vmatmul.msk.f32.vlgmr.msra.gmra.mxu0 %vm1228_vm1, %v3691_v7 }
 0xca7   : > { %4049 = vmatpush.msrb.mxu0 %v6975_v16  ;;  %4106 = vmatpush.msrb.mxu3 %v3515_v32  ;;  %v3918_v16 = vld [vmem:[#allocation7 + $0xa8] sm:$0xff]  ;;  %v7174_v41 = vpop.permute.xlu2 %4033  ;;  %v3936_v32 = vld [vmem:[#allocation7 + $0x138] sm:$0xff] }
 0xca9   : > { %4050 = vmatpush.msrb.mxu0 %v6971_v46  ;;  %4107 = vmatpush.msrb.mxu3 %v3512_v33  ;;  %v3915_v46 = vld [vmem:[#allocation7 + $0x90] sm:$0xff] }
 0xcab   : > { %4051 = vmatpush.msrb.mxu0 %v6961_v42  ;;  %4108 = vmatpush.msrb.mxu3 %v3492_v20  ;;  %v3904_v42 = vld [vmem:[#allocation7 + $0x38] sm:$0xff]  ;;  %v3931_v20 = vld [vmem:[#allocation7 + $0x110] sm:$0xff] }
 0xcad   : > { %4052 = vmatpush.msrb.mxu0 %v6957_v31  ;;  %4109 = vmatpush.msrb.mxu3 %v7118_v28  ;;  %v3901_v31 = vld [vmem:[#allocation7 + $0x20] sm:$0xff] }
 0xcae   : > { %4864 = vmatmul.msk.f32.gmra.mxu3 %vm1228_vm1, %v3692_v9  ;;  %4866 = vmatmul.msk.f32.gmra.mxu2 %vm1228_vm1, %v3692_v9 }
 0xcaf   : > { %4868 = vmatmul.msk.f32.gmra.mxu0 %vm1228_vm1, %v3692_v9  ;;  %4110 = vmatpush.msrb.mxu3 %v7114_v3 }
 0xcb0   : > { %4053 = vmatpush.msrb.mxu0 %v6967_v61  ;;  %v3912_v61 = vld [vmem:[#allocation7 + $0x78] sm:$0xff] }
 0xcb1   : > { %4111 = vmatpush.msrb.mxu3 %v7108_v18 }
 0xcb2   : > { %4054 = vmatpush.msrb.mxu0 %v6963_v58  ;;  %v3909_v58 = vld [vmem:[#allocation7 + $0x60] sm:$0xff] }
 0xcb3   : > { %4112 = vmatpush.msrb.mxu3 %v7116_v48 }
 0xcb4   : > { %4055 = vmatpush.msrb.mxu0 %v6959_v13  ;;  %v3906_v13 = vld [vmem:[#allocation7 + $0x48] sm:$0xff] }
 0xcb5   : > { %4113 = vmatpush.msrb.mxu3 %v7110_v17  ;;  %v3928_v17 = vld [vmem:[#allocation7 + $0xf8] sm:$0xff] }
 0xcb6   : > { %4056 = vmatpush.msrb.mxu0 %v6955_v10  ;;  %4869 = vmatmul.msk.f32.vlgmr.msra.gmra.mxu3 %vm1228_vm1, %v3691_v7  ;;  %v3903_v10 = vld [vmem:[#allocation7 + $0x30] sm:$0xff] }
 0xcb7   : > { %4871 = vmatmul.msk.f32.vlgmr.msrb.gmra.mxu2 %vm1228_vm1, %v3691_v7  ;;  %4057 = vmatmul.f32.vlgmr.msrb.gmra.mxu0 %v3897_v49  ;;  %v7194_v7 = vpop.permute.xlu1 %3998  ;;  %v3940_v49 = vld [vmem:[#allocation7 + $0x158] sm:$0xff] }
 0xcb8   : > { %4114 = vmatpush.msrb.mxu3 %v7112_v6  ;;  %v3933_v6 = vld [vmem:[#allocation7 + $0x120] sm:$0xff] }
 0xcba   : > { %4115 = vmatpush.msrb.mxu3 %v7106_v56  ;;  %v3930_v56 = vld [vmem:[#allocation7 + $0x108] sm:$0xff] }
 0xcbc   : > { %4116 = vmatpush.msrb.mxu3 %v7100_v40  ;;  %v3927_v40 = vld [vmem:[#allocation7 + $0xf0] sm:$0xff] }
 0xcbe   : > { %4117 = vmatpush.msrb.mxu3 %v7094_v36  ;;  %v3924_v36 = vld [vmem:[#allocation7 + $0xd8] sm:$0xff] }
 0xcbf   : > { %4870 = vmatmul.msk.f32.gmra.mxu3 %vm1228_vm1, %v3692_v9  ;;  %4872 = vmatmul.msk.f32.gmra.mxu2 %vm1228_vm1, %v3692_v9 }
 0xcc0   : > { %4060 = vmatmul.f32.gmra.mxu0 %v3900_v27  ;;  %4118 = vmatpush.msrb.mxu3 %v7104_v15  ;;  %v3925_v15 = vld [vmem:[#allocation7 + $0xe0] sm:$0xff] }
 0xcc2   : > { %4119 = vmatpush.msrb.mxu3 %v7098_v1  ;;  %v3922_v1 = vld [vmem:[#allocation7 + $0xc8] sm:$0xff] }
 0xcc4   : > { %4120 = vmatpush.msrb.mxu3 %v7102_v45 }
 0xcc6   : > { %4121 = vmatpush.msrb.mxu3 %v7096_v62  ;;  %v7176_v62 = vpop.permute.xlu2 %4028 }
 0xcc7   : > { %4122 = vmatmul.f32.vlgmr.msrb.gmra.mxu3 %v3898_v8 }
 0xcc8   : > { %4063 = vmatmul.f32.gmra.mxu0 %v3903_v10 }
 0xcce   : > { %v7178_v45 = vpop.permute.xlu2 %4023 }
 0xccf   : > { %4125 = vmatmul.f32.gmra.mxu3 %v3901_v31  ;;  %v3989_v31 = vpop.permute.xlu1 %3988 }
 0xcd0   : > { %4066 = vmatmul.f32.gmra.mxu0 %v3906_v13  ;;  %v3943_v13 = vld [vmem:[#allocation7 + $0x170] sm:$0xff] }
 0xcd6   : > { %v7182_v3 = vpop.permute.xlu2 %4018 }
 0xcd7   : > { %4128 = vmatmul.f32.gmra.mxu3 %v3904_v42 }
 0xcd8   : > { %4069 = vmatmul.f32.gmra.mxu0 %v3909_v58 }
 0xcde   : > { %v7188_v22 = vpop.permute.xlu2 %4003 }
 0xcdf   : > { %4131 = vmatmul.f32.gmra.mxu3 %v3907_v5 }
 0xce0   : > { %4072 = vmatmul.f32.gmra.mxu0 %v3912_v61 }
 0xce6   : > { %v7192_v51 = vpop.permute.xlu2 %3993 }
 0xce7   : > { %4134 = vmatmul.f32.gmra.mxu3 %v3910_v4  ;;  %v3979_v4 = vpop.permute.xlu1 %3978 }
 0xce8   : > { %4075 = vmatmul.f32.gmra.mxu0 %v3915_v46 }
 0xcee   : > { %v3984_v9 = vpop.permute.xlu2 %3983 }
 0xcef   : > { %4137 = vmatmul.f32.gmra.mxu3 %v3913_v60 }
 0xcf0   : > { %4078 = vmatmul.f32.gmra.mxu0 %v3918_v16 }
 0xcf6   : > { %v3974_v42 = vpop.permute.xlu2 %3973 }
 0xcf7   : > { %4140 = vmatmul.f32.gmra.mxu3 %v3916_v39 }
 0xcf8   : > { %4081 = vmatmul.f32.gmra.mxu0 %v3921_v11 }
 0xcfe   : > { %v3964_v46 = vpop.permute.xlu2 %3963 }
 0xcff   : > { %4143 = vmatmul.f32.gmra.mxu3 %v3919_v25  ;;  %v3969_v25 = vpop.permute.xlu1 %3968 }
 0xd00   : > { %4084 = vmatmul.f32.gmra.mxu0 %v3924_v36 }
 0xd07   : > { %4146 = vmatmul.f32.gmra.mxu3 %v3922_v1 }
 0xd08   : > { %4087 = vmatmul.f32.gmra.mxu0 %v3927_v40 }
 0xd0f   : > { %4149 = vmatmul.f32.gmra.mxu3 %v3925_v15 }
 0xd10   : > { %4090 = vmatmul.f32.gmra.mxu0 %v3930_v56 }
 0xd13   : > { %v7180_v18 = vpop.f32.mrf.mxu0 }
 0xd17   : > { %4152 = vmatmul.f32.gmra.mxu3 %v3928_v17 }
 0xd18   : > { %4093 = vmatmul.f32.gmra.mxu0 %v3933_v6  ;;  %v7184_v48 = vpop.f32.mrf.mxu3  ;;  %v7186_v28 = vpop.f32.mrf.mxu2 }
 0xd1b   : > { %v3779_v33 = vpop.f32.mrf.mxu0 }
 0xd1f   : > { %4155 = vmatmul.f32.gmra.mxu3 %v3931_v20 }
 0xd20   : > { %4096 = vmatmul.f32.gmra.mxu0 %v3936_v32  ;;  %v3733_v23 = vpop.f32.mrf.mxu3  ;;  %v3899_v32 = vld [vmem:[#allocation7 + $0x10] sm:$0xff] }
 0xd21   : > { %v3756_v29 = vpop.f32.mrf.mxu2 }
 0xd23   : > { %v3845_v12 = vpop.f32.mrf.mxu0 }
 0xd27   : > { %4158 = vmatmul.f32.gmra.mxu3 %v3934_v55 }
 0xd28   : > { %4099 = vmatmul.f32.gmra.mxu0 %v3939_v38  ;;  %v3799_v14 = vpop.f32.mrf.mxu3 }
 0xd29   : > { %v3822_v53 = vpop.f32.mrf.mxu2 }
 0xd2c   : > { %v3848_v30 = vpop.f32.mrf.mxu0 }
 0xd2f   : > { %4161 = vmatmul.f32.gmra.mxu3 %v3937_v54  ;;  %v3905_v54 = vld [vmem:[#allocation7 + $0x40] sm:$0xff] }
 0xd30   : > { %4102 = vmatmul.f32.gmra.mxu0 %v3942_v26 }
 0xd31   : > { %v3802_v34 = vpop.f32.mrf.mxu3  ;;  %v3825_v37 = vpop.f32.mrf.mxu2 }
 0xd34   : > { %v4058_v27 = vpop.f32.mrf.mxu0 }
 0xd35   : > { %v4059_v60 = vadd.f32 %v4058_v27, %v3964_v46  ;;  %v3923_v46 = vld [vmem:[#allocation7 + $0xd0] sm:$0xff] }
 0xd37   : > { %4164 = vmatmul.f32.gmra.mxu3 %v3940_v49 }
 0xd39   : > { %v3868_v8 = vpop.f32.mrf.mxu3 }
 0xd3a   : > { %v3891_v10 = vpop.f32.mrf.mxu2 }
 0xd3d   : > { %v4061_v58 = vpop.f32.mrf.mxu0 }
 0xd3e   : > { %v4062_v36 = vadd.f32 %v4061_v58, %v3969_v25  ;;  %v3914_v58 = vld [vmem:[#allocation7 + $0x88] sm:$0xff] }
 0xd3f   : > { %4167 = vmatmul.f32.gmra.mxu3 %v3943_v13  ;;  %v3938_v25 = vld [vmem:[#allocation7 + $0x148] sm:$0xff] }
 0xd42   : > { %v3871_v5 = vpop.f32.mrf.mxu3  ;;  %v3894_v61 = vpop.f32.mrf.mxu2 }
 0xd43   : > { %4171 = vmatpush.msra.mxu2 %v3894_v61 }
 0xd45   : > { %4172 = vmatpush.msra.mxu2 %v3891_v10  ;;  %v4064_v16 = vpop.f32.mrf.mxu0 }
 0xd46   : > { %v4065_v56 = vadd.f32 %v4064_v16, %v3974_v42  ;;  %v3929_v16 = vld [vmem:[#allocation7 + $0x100] sm:$0xff] }
 0xd47   : > { %4173 = vmatpush.msra.mxu2 %v3871_v5 }
 0xd49   : > { %4174 = vmatpush.msra.mxu2 %v3868_v8  ;;  %v3911_v8 = vld [vmem:[#allocation7 + $0x70] sm:$0xff] }
 0xd4a   : > { %v4123_v39 = vpop.f32.mrf.mxu3 }
 0xd4b   : > { %v7196_v11 = vadd.f32 %v4123_v39, %v4059_v60  ;;  %4175 = vmatpush.msra.mxu2 %v3848_v30  ;;  %v3926_v60 = vld [vmem:[#allocation7 + $0xe8] sm:$0xff]  ;;  %v3935_v39 = vld [vmem:[#allocation7 + $0x130] sm:$0xff] }
 0xd4d   : > { %4176 = vmatpush.msra.mxu2 %v3845_v12  ;;  %v4067_v15 = vpop.f32.mrf.mxu0 }
 0xd4e   : > { %v4068_v12 = vadd.f32 %v4067_v15, %v3979_v4  ;;  %v3917_v4 = vld [vmem:[#allocation7 + $0xa0] sm:$0xff] }
 0xd4f   : > { %4177 = vmatpush.msra.mxu2 %v3825_v37 }
 0xd51   : > { %4178 = vmatpush.msra.mxu2 %v3822_v53 }
 0xd52   : > { %v4126_v1 = vpop.f32.mrf.mxu3 }
 0xd53   : > { %v7198_v40 = vadd.f32 %v4126_v1, %v4062_v36  ;;  %4179 = vmatpush.msra.mxu2 %v3802_v34  ;;  %v3944_v36 = vld [vmem:[#allocation7 + $0x178] sm:$0xff] }
 0xd55   : > { %4180 = vmatpush.msra.mxu2 %v3799_v14  ;;  %v4070_v20 = vpop.f32.mrf.mxu0  ;;  %v3902_v14 = vld [vmem:[#allocation7 + $0x28] sm:$0xff] }
 0xd56   : > { %v4071_v53 = vadd.f32 %v4070_v20, %v3984_v9 }
 0xd57   : > { %4181 = vmatpush.msra.mxu2 %v3779_v33 }
 0xd59   : > { %4182 = vmatpush.msra.mxu2 %v7180_v18 }
 0xd5a   : > { %v4129_v17 = vpop.f32.mrf.mxu3 }
 0xd5b   : > { %v7201_v6 = vadd.f32 %v4129_v17, %v4065_v56  ;;  %4183 = vmatpush.msra.mxu2 %v3756_v29 }
 0xd5d   : > { %4184 = vmatpush.msra.mxu2 %v7186_v28  ;;  %v4073_v33 = vpop.f32.mrf.mxu0 }
 0xd5e   : > { %v4074_v26 = vadd.f32 %v4073_v33, %v3989_v31 }
 0xd5f   : > { %4185 = vmatpush.msra.mxu2 %v3733_v23  ;;  %v3908_v23 = vld [vmem:[#allocation7 + $0x58] sm:$0xff] }
 0xd61   : > { %4186 = vmatpush.msra.mxu2 %v7184_v48 }
 0xd62   : > { %v4132_v55 = vpop.f32.mrf.mxu3  ;;  %4187 = vmatmul.f32.vlgmr.msra.gmra.mxu2 %v3899_v32 }
 0xd63   : > { %v4133_v38 = vadd.f32 %v4132_v55, %v4068_v12 }
 0xd65   : > { %v4076_v29 = vpop.f32.mrf.mxu0 }
 0xd66   : > { %v4077_v37 = vadd.f32 %v4076_v29, %v7192_v51  ;;  %v3920_v51 = vld [vmem:[#allocation7 + $0xb8] sm:$0xff] }
 0xd6a   : > { %v4135_v30 = vpop.f32.mrf.mxu3  ;;  %4190 = vmatmul.f32.gmra.mxu2 %v3902_v14 }
 0xd6b   : > { %v4136_v18 = vadd.f32 %v4135_v30, %v4071_v53 }
 0xd6d   : > { %v4079_v27 = vpop.f32.mrf.mxu0 }
 0xd6e   : > { %v4080_v10 = vadd.f32 %v4079_v27, %v7194_v7  ;;  %v3932_v7 = vld [vmem:[#allocation7 + $0x118] sm:$0xff] }
 0xd72   : > { %v4138_v34 = vpop.f32.mrf.mxu3  ;;  %4193 = vmatmul.f32.gmra.mxu2 %v3905_v54 }
 0xd73   : > { %v4139_v28 = vadd.f32 %v4138_v34, %v4074_v26 }
 0xd75   : > { %v4082_v42 = vpop.f32.mrf.mxu0 }
 0xd76   : > { %v4083_v31 = vadd.f32 %v4082_v42, %v7188_v22  ;;  %v3941_v22 = vld [vmem:[#allocation7 + $0x160] sm:$0xff] }
 0xd7a   : > { %v4141_v49 = vpop.f32.mrf.mxu3  ;;  %4196 = vmatmul.f32.gmra.mxu2 %v3908_v23 }
 0xd7b   : > { %v4142_v48 = vadd.f32 %v4141_v49, %v4077_v37 }
 0xd7d   : > { %v4085_v26 = vpop.f32.mrf.mxu0 }
 0xd82   : > { %v4144_v9 = vpop.f32.mrf.mxu3  ;;  %4199 = vmatmul.f32.gmra.mxu2 %v3911_v8 }
 0xd83   : > { %v4145_v13 = vadd.f32 %v4144_v9, %v4080_v10 }
 0xd85   : > { %v4088_v23 = vpop.f32.mrf.mxu0 }
 0xd8a   : > { %v4147_v5 = vpop.f32.mrf.mxu3  ;;  %4202 = vmatmul.f32.gmra.mxu2 %v3914_v58 }
 0xd8b   : > { %v4148_v61 = vadd.f32 %v4147_v5, %v4083_v31 }
 0xd8d   : > { %v4091_v27 = vpop.f32.mrf.mxu0 }
 0xd92   : > { %4205 = vmatmul.f32.gmra.mxu2 %v3917_v4  ;;  %v4150_v29 = vpop.f32.mrf.mxu3 }
 0xd95   : > { %v4094_v10 = vpop.f32.mrf.mxu0 }
 0xd9a   : > { %4208 = vmatmul.f32.gmra.mxu2 %v3920_v51 }
 0xd9d   : > { %v4097_v42 = vpop.f32.mrf.mxu0 }
 0xda2   : > { %4211 = vmatmul.f32.gmra.mxu2 %v3923_v46 }
 0xda5   : > { %v4100_v31 = vpop.f32.mrf.mxu0 }
 0xda6   : > { %v4101_v51 = vadd.f32 %v4100_v31, %v7174_v41 }
 0xdaa   : > { %4214 = vmatmul.f32.gmra.mxu2 %v3926_v60 }
 0xdad   : > { %v4103_v46 = vpop.f32.mrf.mxu0 }
 0xdb2   : > { %4217 = vmatmul.f32.gmra.mxu2 %v3929_v16 }
 0xdba   : > { %4220 = vmatmul.f32.gmra.mxu2 %v3932_v7  ;;  %v4095_v7 = vadd.f32 %v4094_v10, %v7178_v45 }
 0xdc2   : > { %4223 = vmatmul.f32.gmra.mxu2 %v3935_v39  ;;  %v4104_v39 = vadd.f32 %v4103_v46, %v7172_v24 }
 0xdca   : > { %4226 = vmatmul.f32.gmra.mxu2 %v3938_v25 }
 0xdd2   : > { %4229 = vmatmul.f32.gmra.mxu2 %v3941_v22 }
 0xdda   : > { %4232 = vmatmul.f32.gmra.mxu2 %v3944_v36  ;;  %v4014_v36 = vpop.permute.xlu0 %4013 }
 0xde5   : > { %v4188_v1 = vpop.f32.mrf.mxu2 }
 0xde6   : > { %v7209_v15 = vadd.f32 %v4188_v1, %v7196_v11  ;;  %v4092_v1 = vadd.f32 %v4091_v27, %v7182_v3 }
 0xded   : > { %v4191_v56 = vpop.f32.mrf.mxu2 }
 0xdee   : > { %v7212_v17 = vadd.f32 %v4191_v56, %v7198_v40 }
 0xdf5   : > { %v4194_v20 = vpop.f32.mrf.mxu2 }
 0xdf6   : > { %v7215_v32 = vadd.f32 %v4194_v20, %v7201_v6 }
 0xdfd   : > { %v4197_v12 = vpop.f32.mrf.mxu2 }
 0xdfe   : > { %v7217_v55 = vadd.f32 %v4197_v12, %v4133_v38  ;;  %v4153_v38 = vpop.f32.mrf.mxu3 }
 0xe05   : > { %v4200_v14 = vpop.f32.mrf.mxu2 }
 0xe06   : > { %v7219_v33 = vadd.f32 %v4200_v14, %v4136_v18  ;;  %v4156_v18 = vpop.f32.mrf.mxu3  ;;  %v4089_v14 = vadd.f32 %v4088_v23, %v4014_v36 }
 0xe07   : > { %v4157_v41 = vadd.f32 %v4156_v18, %v4092_v1  ;;  %v7524_v1 = vld [vmem:[#allocation38_spill] sm:$0xff] }
 0xe08   : > { %v4154_v45 = vadd.f32 %v4153_v38, %v4089_v14 }
 0xe0d   : > { %v4203_v53 = vpop.f32.mrf.mxu2 }
 0xe0e   : > { %v7221_v30 = vadd.f32 %v4203_v53, %v4139_v28  ;;  %v4159_v28 = vpop.f32.mrf.mxu3 }
 0xe0f   : > { %v4160_v56 = vadd.f32 %v4159_v28, %v4095_v7 }
 0xe15   : > { %v4206_v54 = vpop.f32.mrf.mxu2 }
 0xe16   : > { %v7223_v11 = vadd.f32 %v4206_v54, %v4142_v48  ;;  %v4162_v48 = vpop.f32.mrf.mxu3 }
 0xe1d   : > { %v4209_v40 = vpop.f32.mrf.mxu2 }
 0xe1e   : > { %v7225_v34 = vadd.f32 %v4209_v40, %v4145_v13  ;;  %v4165_v4 = vpop.f32.mrf.mxu3 }
 0xe1f   : > { %v4166_v60 = vadd.f32 %v4165_v4, %v4101_v51 }
 0xe20   : > { %v4243_v51 = vadd.f32 %v7225_v34, %v6749_v44  ;;  %v4240_v34 = vadd.f32 %v7219_v33, %v6762_v43 }
 0xe22   : > { %vm4259_vm12 = vcmp.ge.f32.partialorder %v4243_v51, 0.0  ;;  %vm4256_vm15 = vcmp.ge.f32.partialorder %v4240_v34, 0.0 }
 0xe25   : > { %v4212_v6 = vpop.f32.mrf.mxu2 }
 0xe26   : > { %v7227_v37 = vadd.f32 %v4212_v6, %v4148_v61  ;;  %v4098_v61 = vadd.f32 %v4097_v42, %v7176_v62  ;;  %v4168_v16 = vpop.f32.mrf.mxu3  ;;  %v4086_v6 = vadd.f32 %v4085_v26, %v7190_v50 }
 0xe27   : > { %v4169_v20 = vadd.f32 %v4168_v16, %v4104_v39 }
 0xe28   : > { %v4163_v25 = vadd.f32 %v4162_v48, %v4098_v61  ;;  %v4151_v48 = vadd.f32 %v4150_v29, %v4086_v6 }
 0xe2d   : > { %v4215_v49 = vpop.f32.mrf.mxu2 }
 0xe2e   : > { %v4216_v18 = vadd.f32 %v4215_v49, %v4151_v48  ;;  %v4244_v49 = vadd.f32 %v7227_v37, %v6744_v59  ;;  %v4241_v37 = vadd.f32 %v7221_v30, %v6758_v0  ;;  %v4300_v48 = vld [vmem:[%s7406_s11] sm:$0xff] }
 0xe30   : > { %v4245_v29 = vadd.f32 %v4216_v18, %v6739_v19  ;;  %v4276_v7 = vmul.f32 0.1, %v4244_v49  ;;  %vm4260_vm11 = vcmp.ge.f32.partialorder %v4244_v49, 0.0  ;;  %vm4257_vm14 = vcmp.ge.f32.partialorder %v4241_v37, 0.0  ;;  %v4305_v18 = vld [vmem:[%s7406_s11 + $0x28] sm:$0xff] }
 0xe32   : > { %v4277_v61 = vmul.f32 0.1, %v4245_v29  ;;  %vm4261_vm10 = vcmp.ge.f32.partialorder %v4245_v29, 0.0 }
 0xe34   : > { %v4293_v39 = vsel %vm4261_vm10, %v4245_v29, %v4277_v61  ;;  %v4312_v29 = vld [vmem:[%s7406_s11 + $0x60] sm:$0xff] }
 0xe35   : > { %v4218_v8 = vpop.f32.mrf.mxu2 }
 0xe36   : > { %v4219_v3 = vadd.f32 %v4218_v8, %v4154_v45 }
 0xe38   : > { %v4246_v50 = vadd.f32 %v4219_v3, %v6734_v47 }
 0xe3a   : > { %vm4262_vm9 = vcmp.ge.f32.partialorder %v4246_v50, 0.0 }
 0xe3d   : > { %v4221_v9 = vpop.f32.mrf.mxu2 }
 0xe3e   : > { %v4222_v10 = vadd.f32 %v4221_v9, %v4157_v41  ;;  %v7526_v41 = vld [vmem:[#allocation50_spill] sm:$0xff] }
 0xe3f   : > { %v4237_v33 = vadd.f32 %v7212_v17, %v7526_v41 }
 0xe41   : > { %vm4253_vm3 = vcmp.ge.f32.partialorder %v4237_v33, 0.0 }
 0xe45   : > { %v4224_v58 = vpop.f32.mrf.mxu2 }
 0xe46   : > { %v4225_v54 = vadd.f32 %v4224_v58, %v4160_v56  ;;  %v4247_v58 = vadd.f32 %v4222_v10, %v6729_v2 }
 0xe48   : > { %v4248_v27 = vadd.f32 %v4225_v54, %v6724_v21  ;;  %v4279_v9 = vmul.f32 0.1, %v4247_v58  ;;  %vm4263_vm8 = vcmp.ge.f32.partialorder %v4247_v58, 0.0 }
 0xe4a   : > { %v4280_v38 = vmul.f32 0.1, %v4248_v27  ;;  %vm4264_vm7 = vcmp.ge.f32.partialorder %v4248_v27, 0.0  ;;  %v4295_v46 = vsel %vm4263_vm8, %v4247_v58, %v4279_v9  ;;  %v4306_v58 = vld [vmem:[%s7406_s11 + $0x30] sm:$0xff] }
 0xe4b   : > { %v4314_v9 = vld [vmem:[%s7406_s11 + $0x70] sm:$0xff] }
 0xe4c   : > { %v4296_v4 = vsel %vm4264_vm7, %v4248_v27, %v4280_v38  ;;  %v4302_v27 = vld [vmem:[%s7406_s11 + $0x10] sm:$0xff]  ;;  %v4311_v38 = vld [vmem:[%s7406_s11 + $0x58] sm:$0xff] }
 0xe4d   : > { %v4227_v5 = vpop.f32.mrf.mxu2 }
 0xe4e   : > { %v4228_v12 = vadd.f32 %v4227_v5, %v4163_v25  ;;  %v4275_v25 = vmul.f32 0.1, %v4243_v51 }
 0xe50   : > { %v4249_v24 = vadd.f32 %v4228_v12, %v6720_v57  ;;  %v4291_v56 = vsel %vm4259_vm12, %v4243_v51, %v4275_v25  ;;  %v7525_v12 = vld [vmem:[#allocation45_spill] sm:$0xff] }
 0xe51   : > { %v4238_v30 = vadd.f32 %v7215_v32, %v7525_v12  ;;  %v4269_v32 = vmul.f32 0.1, %v4237_v33 }
 0xe52   : > { %v4281_v5 = vmul.f32 0.1, %v4249_v24  ;;  %vm4265_vm6 = vcmp.ge.f32.partialorder %v4249_v24, 0.0 }
 0xe53   : > { %v4270_v45 = vmul.f32 0.1, %v4238_v30  ;;  %vm4254_vm2 = vcmp.ge.f32.partialorder %v4238_v30, 0.0  ;;  %v4285_v17 = vsel %vm4253_vm3, %v4237_v33, %v4269_v32 }
 0xe54   : > { %v4297_v8 = vsel %vm4265_vm6, %v4249_v24, %v4281_v5  ;;  %v4308_v5 = vld [vmem:[%s7406_s11 + $0x40] sm:$0xff] }
 0xe55   : > { %v4230_v13 = vpop.f32.mrf.mxu2  ;;  %v4286_v24 = vsel %vm4254_vm2, %v4238_v30, %v4270_v45 }
 0xe56   : > { %v4231_v22 = vadd.f32 %v4230_v13, %v4166_v60  ;;  %v4278_v13 = vmul.f32 0.1, %v4246_v50  ;;  %v4242_v60 = vadd.f32 %v7223_v11, %v6754_v35  ;;  %v4239_v11 = vadd.f32 %v7217_v55, %v7524_v1 }
 0xe58   : > { %v4250_v62 = vadd.f32 %v4231_v22, %v6716_v63  ;;  %v4294_v16 = vsel %vm4262_vm9, %v4246_v50, %v4278_v13  ;;  %v4292_v22 = vsel %vm4260_vm11, %v4244_v49, %v4276_v7  ;;  %v4274_v36 = vmul.f32 0.1, %v4242_v60  ;;  %v4309_v50 = vld [vmem:[%s7406_s11 + $0x48] sm:$0xff]  ;;  %v4315_v49 = vld [vmem:[%s7406_s11 + $0x78] sm:$0xff] }
 0xe59   : > { %vm4258_vm13 = vcmp.ge.f32.partialorder %v4242_v60, 0.0  ;;  %vm4255_vm0 = vcmp.ge.f32.partialorder %v4239_v11, 0.0 }
 0xe5a   : > { %v4282_v23 = vmul.f32 0.1, %v4250_v62  ;;  %vm4266_vm5 = vcmp.ge.f32.partialorder %v4250_v62, 0.0  ;;  %v4290_v14 = vsel %vm4258_vm13, %v4242_v60, %v4274_v36 }
 0xe5c   : > { %v4298_v26 = vsel %vm4266_vm5, %v4250_v62, %v4282_v23  ;;  %v4271_v62 = vmul.f32 0.1, %v4239_v11  ;;  %v4304_v23 = vld [vmem:[%s7406_s11 + $0x20] sm:$0xff] }
 0xe5d   : > { %v4233_v53 = vpop.f32.mrf.mxu2 }
 0xe5e   : > { %v4234_v40 = vadd.f32 %v4233_v53, %v4169_v20  ;;  %v4273_v20 = vmul.f32 0.1, %v4241_v37  ;;  %v4272_v53 = vmul.f32 0.1, %v4240_v34  ;;  %v4287_v10 = vsel %vm4255_vm0, %v4239_v11, %v4271_v62 }
 0xe60   : > { %v4251_v42 = vadd.f32 %v4234_v40, %v6712_v52  ;;  %v4289_v54 = vsel %vm4257_vm14, %v4241_v37, %v4273_v20  ;;  %v7527_v40 = vld [vmem:[#allocation55_spill] sm:$0xff]  ;;  %v4288_v6 = vsel %vm4256_vm15, %v4240_v34, %v4272_v53 }
 0xe61   : > { %v4236_v55 = vadd.f32 %v7209_v15, %v7527_v40  ;;  %v4301_v15 = vld [vmem:[%s7406_s11 + $0x8] sm:$0xff] }
 0xe62   : > { %v4283_v28 = vmul.f32 0.1, %v4251_v42  ;;  %vm4267_vm4 = vcmp.ge.f32.partialorder %v4251_v42, 0.0 }
 0xe64   : > { %v4299_v31 = vsel %vm4267_vm4, %v4251_v42, %v4283_v28  ;;  %v4268_v42 = vmul.f32 0.1, %v4236_v55  ;;  %vm4252_vm4 = vcmp.ge.f32.partialorder %v4236_v55, 0.0  ;;  %v4303_v28 = vld [vmem:[%s7406_s11 + $0x18] sm:$0xff] }
 0xe65   : > { %4412 = vmatpush.msra.mxu1 %v4299_v31  ;;  %v4307_v31 = vld [vmem:[%s7406_s11 + $0x38] sm:$0xff] }
 0xe66   : > { %v4284_v3 = vsel %vm4252_vm4, %v4236_v55, %v4268_v42 }
 0xe67   : > { %4413 = vmatpush.msra.mxu1 %v4298_v26  ;;  %v4310_v26 = vld [vmem:[%s7406_s11 + $0x50] sm:$0xff] }
 0xe69   : > { %4414 = vmatpush.msra.mxu1 %v4297_v8  ;;  %v4313_v8 = vld [vmem:[%s7406_s11 + $0x68] sm:$0xff] }
 0xe6b   : > { %4415 = vmatpush.msra.mxu1 %v4296_v4  ;;  %v4335_v4 = vpop.permute.xlu1 %4334 }
 0xe6d   : > { %4416 = vmatpush.msra.mxu1 %v4295_v46 }
 0xe6f   : > { %4417 = vmatpush.msra.mxu1 %v4294_v16  ;;  %v4340_v16 = vpop.permute.xlu2 %4339 }
 0xe71   : > { %4418 = vmatpush.msra.mxu1 %v4293_v39 }
 0xe73   : > { %4419 = vmatpush.msra.mxu1 %v4292_v22  ;;  %v4345_v22 = vpop.permute.xlu1 %4344 }
 0xe75   : > { %4420 = vmatpush.msra.mxu1 %v4291_v56 }
 0xe77   : > { %4421 = vmatpush.msra.mxu1 %v4290_v14  ;;  %v4350_v14 = vpop.permute.xlu2 %4349 }
 0xe79   : > { %4422 = vmatpush.msra.mxu1 %v4289_v54 }
 0xe7b   : > { %4423 = vmatpush.msra.mxu1 %v4288_v6 }
 0xe7d   : > { %4424 = vmatpush.msra.mxu1 %v4287_v10 }
 0xe7f   : > { %4425 = vmatpush.msra.mxu1 %v4286_v24  ;;  %v4360_v32 = vpop.permute.xlu2 %4359 }
 0xe81   : > { %4426 = vmatpush.msra.mxu1 %v4285_v17 }
 0xe83   : > { %4427 = vmatpush.msra.mxu1 %v4284_v3 }
 0xe84   : > { %4428 = vmatmul.f32.vlgmr.msra.gmra.mxu1 %v4300_v48 }
 0xe8c   : > { %4431 = vmatmul.f32.gmra.mxu1 %v4301_v15 }
 0xe94   : > { %4434 = vmatmul.f32.gmra.mxu1 %v4302_v27 }
 0xe9c   : > { %4437 = vmatmul.f32.gmra.mxu1 %v4303_v28 }
 0xea4   : > { %4440 = vmatmul.f32.gmra.mxu1 %v4304_v23 }
 0xeac   : > { %4443 = vmatmul.f32.gmra.mxu1 %v4305_v18  ;;  %v4370_v18 = vpop.permute.xlu2 %4369 }
 0xeb4   : > { %4446 = vmatmul.f32.gmra.mxu1 %v4306_v58 }
 0xebc   : > { %4449 = vmatmul.f32.gmra.mxu1 %v4307_v31 }
 0xec4   : > { %4452 = vmatmul.f32.gmra.mxu1 %v4308_v5 }
 0xecc   : > { %4455 = vmatmul.f32.gmra.mxu1 %v4309_v50 }
 0xed4   : > { %4458 = vmatmul.f32.gmra.mxu1 %v4310_v26 }
 0xedc   : > { %4461 = vmatmul.f32.gmra.mxu1 %v4311_v38 }
 0xee4   : > { %4464 = vmatmul.f32.gmra.mxu1 %v4312_v29 }
 0xeec   : > { %4467 = vmatmul.f32.gmra.mxu1 %v4313_v8 }
 0xef4   : > { %4470 = vmatmul.f32.gmra.mxu1 %v4314_v9 }
 0xefc   : > { %4473 = vmatmul.f32.gmra.mxu1 %v4315_v49  ;;  %v4380_v49 = vpop.permute.xlu2 %4379 }
 0xf01   : > { %v4429_v13 = vpop.f32.mrf.mxu1 }
 0xf02   : > { %v4430_v51 = vadd.f32 %v4429_v13, %v4335_v4 }
 0xf04   : > { %v4477_v46 = vadd.f32 %v4430_v51, %v7527_v40  ;;  %v4355_v40 = vpop.permute.xlu1 %4354 }
 0xf06   : > { %vm4493_vm5 = vcmp.ge.f32.partialorder %v4477_v46, 0.0  ;;  %v4509_v61 = vmul.f32 0.1, %v4477_v46 }
 0xf08   : > { %v4525_v60 = vsel %vm4493_vm5, %v4477_v46, %v4509_v61 }
 0xf09   : > { %4541 = vst.msk [vmem:[%s7312_s22] sm:$0xff] %vm1228_vm1, %v4525_v60  ;;  %v4432_v7 = vpop.f32.mrf.mxu1 }
 0xf0a   : > { %v4433_v37 = vadd.f32 %v4432_v7, %v4340_v16 }
 0xf0c   : > { %v4478_v39 = vadd.f32 %v4433_v37, %v7526_v41  ;;  %v4365_v3 = vpop.permute.xlu1 %4364 }
 0xf0e   : > { %vm4494_vm6 = vcmp.ge.f32.partialorder %v4478_v39, 0.0  ;;  %v4510_v25 = vmul.f32 0.1, %v4478_v39 }
 0xf10   : > { %v4526_v34 = vsel %vm4494_vm6, %v4478_v39, %v4510_v25  ;;  %v4390_v39 = vpop.permute.xlu2 %4389 }
 0xf11   : > { %4542 = vst.msk [vmem:[%s7312_s22 + $0x8] sm:$0xff] %vm1228_vm1, %v4526_v34  ;;  %v4435_v36 = vpop.f32.mrf.mxu1 }
 0xf12   : > { %v4436_v11 = vadd.f32 %v4435_v36, %v4345_v22 }
 0xf14   : > { %v4479_v56 = vadd.f32 %v4436_v11, %v7525_v12  ;;  %v4375_v26 = vpop.permute.xlu1 %4374 }
 0xf16   : > { %vm4495_vm7 = vcmp.ge.f32.partialorder %v4479_v56, 0.0  ;;  %v4511_v20 = vmul.f32 0.1, %v4479_v56 }
 0xf18   : > { %v4527_v30 = vsel %vm4495_vm7, %v4479_v56, %v4511_v20 }
 0xf19   : > { %4543 = vst.msk [vmem:[%s7312_s22 + $0x10] sm:$0xff] %vm1228_vm1, %v4527_v30  ;;  %v4438_v53 = vpop.f32.mrf.mxu1 }
 0xf1a   : > { %v4439_v41 = vadd.f32 %v4438_v53, %v4350_v14  ;;  %v4400_v53 = vpop.permute.xlu2 %4399 }
 0xf1c   : > { %v4480_v33 = vadd.f32 %v4439_v41, %v7524_v1  ;;  %v4385_v61 = vpop.permute.xlu1 %4384 }
 0xf1e   : > { %vm4496_vm8 = vcmp.ge.f32.partialorder %v4480_v33, 0.0  ;;  %v4512_v54 = vmul.f32 0.1, %v4480_v33 }
 0xf20   : > { %v4528_v62 = vsel %vm4496_vm8, %v4480_v33, %v4512_v54 }
 0xf21   : > { %4544 = vst.msk [vmem:[%s7312_s22 + $0x18] sm:$0xff] %vm1228_vm1, %v4528_v62  ;;  %v4441_v55 = vpop.f32.mrf.mxu1 }
 0xf22   : > { %v4442_v12 = vadd.f32 %v4441_v55, %v4355_v40 }
 0xf24   : > { %v4481_v6 = vadd.f32 %v4442_v12, %v6762_v43  ;;  %v4395_v11 = vpop.permute.xlu1 %4394 }
 0xf26   : > { %vm4497_vm9 = vcmp.ge.f32.partialorder %v4481_v6, 0.0  ;;  %v4513_v45 = vmul.f32 0.1, %v4481_v6 }
 0xf28   : > { %v4529_v10 = vsel %vm4497_vm9, %v4481_v6, %v4513_v45 }
 0xf29   : > { %4545 = vst.msk [vmem:[%s7312_s22 + $0x20] sm:$0xff] %vm1228_vm1, %v4529_v10  ;;  %v4444_v24 = vpop.f32.mrf.mxu1 }
 0xf2a   : > { %v4445_v1 = vadd.f32 %v4444_v24, %v4360_v32 }
 0xf2c   : > { %v4482_v42 = vadd.f32 %v4445_v1, %v6758_v0  ;;  %v4405_v40 = vpop.permute.xlu1 %4404 }
 0xf2e   : > { %vm4498_vm10 = vcmp.ge.f32.partialorder %v4482_v42, 0.0  ;;  %v4514_v17 = vmul.f32 0.1, %v4482_v42 }
 0xf30   : > { %v4530_v48 = vsel %vm4498_vm10, %v4482_v42, %v4514_v17 }
 0xf31   : > { %4546 = vst.msk [vmem:[%s7312_s22 + $0x28] sm:$0xff] %vm1228_vm1, %v4530_v48  ;;  %v4447_v15 = vpop.f32.mrf.mxu1 }
 0xf32   : > { %v4448_v43 = vadd.f32 %v4447_v15, %v4365_v3 }
 0xf34   : > { %v4483_v27 = vadd.f32 %v4448_v43, %v6754_v35 }
 0xf36   : > { %vm4499_vm11 = vcmp.ge.f32.partialorder %v4483_v27, 0.0  ;;  %v4515_v28 = vmul.f32 0.1, %v4483_v27 }
 0xf38   : > { %v4531_v23 = vsel %vm4499_vm11, %v4483_v27, %v4515_v28 }
 0xf39   : > { %4547 = vst.msk [vmem:[%s7312_s22 + $0x30] sm:$0xff] %vm1228_vm1, %v4531_v23  ;;  %v4450_v58 = vpop.f32.mrf.mxu1 }
 0xf3a   : > { %v4451_v0 = vadd.f32 %v4450_v58, %v4370_v18 }
 0xf3c   : > { %v4484_v31 = vadd.f32 %v4451_v0, %v6749_v44 }
 0xf3e   : > { %vm4500_vm12 = vcmp.ge.f32.partialorder %v4484_v31, 0.0  ;;  %v4516_v5 = vmul.f32 0.1, %v4484_v31 }
 0xf40   : > { %v4532_v50 = vsel %vm4500_vm12, %v4484_v31, %v4516_v5 }
 0xf41   : > { %4548 = vst.msk [vmem:[%s7312_s22 + $0x38] sm:$0xff] %vm1228_vm1, %v4532_v50  ;;  %v4453_v38 = vpop.f32.mrf.mxu1 }
 0xf42   : > { %v4454_v35 = vadd.f32 %v4453_v38, %v4375_v26 }
 0xf44   : > { %v4485_v29 = vadd.f32 %v4454_v35, %v6744_v59 }
 0xf46   : > { %vm4501_vm13 = vcmp.ge.f32.partialorder %v4485_v29, 0.0  ;;  %v4517_v8 = vmul.f32 0.1, %v4485_v29 }
 0xf48   : > { %v4533_v9 = vsel %vm4501_vm13, %v4485_v29, %v4517_v8 }
 0xf49   : > { %4549 = vst.msk [vmem:[%s7312_s22 + $0x40] sm:$0xff] %vm1228_vm1, %v4533_v9  ;;  %v4456_v4 = vpop.f32.mrf.mxu1 }
 0xf4a   : > { %v4457_v44 = vadd.f32 %v4456_v4, %v4380_v49 }
 0xf4c   : > { %v4486_v13 = vadd.f32 %v4457_v44, %v6739_v19 }
 0xf4e   : > { %vm4502_vm14 = vcmp.ge.f32.partialorder %v4486_v13, 0.0  ;;  %v4518_v51 = vmul.f32 0.1, %v4486_v13 }
 0xf50   : > { %v4534_v46 = vsel %vm4502_vm14, %v4486_v13, %v4518_v51 }
 0xf51   : > { %4550 = vst.msk [vmem:[%s7312_s22 + $0x48] sm:$0xff] %vm1228_vm1, %v4534_v46  ;;  %v4459_v60 = vpop.f32.mrf.mxu1 }
 0xf52   : > { %v4460_v59 = vadd.f32 %v4459_v60, %v4385_v61 }
 0xf54   : > { %v4487_v16 = vadd.f32 %v4460_v59, %v6734_v47 }
 0xf56   : > { %vm4503_vm15 = vcmp.ge.f32.partialorder %v4487_v16, 0.0  ;;  %v4519_v7 = vmul.f32 0.1, %v4487_v16 }
 0xf58   : > { %v4535_v37 = vsel %vm4503_vm15, %v4487_v16, %v4519_v7 }
 0xf59   : > { %4551 = vst.msk [vmem:[%s7312_s22 + $0x50] sm:$0xff] %vm1228_vm1, %v4535_v37  ;;  %v4462_v25 = vpop.f32.mrf.mxu1 }
 0xf5a   : > { %v4463_v19 = vadd.f32 %v4462_v25, %v4390_v39 }
 0xf5c   : > { %v4488_v34 = vadd.f32 %v4463_v19, %v6729_v2 }
 0xf5e   : > { %vm4504_vm0 = vcmp.ge.f32.partialorder %v4488_v34, 0.0  ;;  %v4520_v22 = vmul.f32 0.1, %v4488_v34 }
 0xf60   : > { %v4536_v36 = vsel %vm4504_vm0, %v4488_v34, %v4520_v22 }
 0xf61   : > { %4552 = vst.msk [vmem:[%s7312_s22 + $0x58] sm:$0xff] %vm1228_vm1, %v4536_v36  ;;  %v4465_v56 = vpop.f32.mrf.mxu1 }
 0xf62   : > { %v4466_v47 = vadd.f32 %v4465_v56, %v4395_v11 }
 0xf64   : > { %v4489_v20 = vadd.f32 %v4466_v47, %v6724_v21 }
 0xf66   : > { %vm4505_vm2 = vcmp.ge.f32.partialorder %v4489_v20, 0.0  ;;  %v4521_v30 = vmul.f32 0.1, %v4489_v20 }
 0xf68   : > { %v4537_v14 = vsel %vm4505_vm2, %v4489_v20, %v4521_v30 }
 0xf69   : > { %4553 = vst.msk [vmem:[%s7312_s22 + $0x60] sm:$0xff] %vm1228_vm1, %v4537_v14  ;;  %v4468_v41 = vpop.f32.mrf.mxu1 }
 0xf6a   : > { %v4469_v2 = vadd.f32 %v4468_v41, %v4400_v53 }
 0xf6c   : > { %v4490_v33 = vadd.f32 %v4469_v2, %v6720_v57  ;;  %v4410_v57 = vpop.permute.xlu2 %4409 }
 0xf6e   : > { %vm4506_vm3 = vcmp.ge.f32.partialorder %v4490_v33, 0.0  ;;  %v4522_v54 = vmul.f32 0.1, %v4490_v33 }
 0xf70   : > { %v4538_v62 = vsel %vm4506_vm3, %v4490_v33, %v4522_v54 }
 0xf71   : > { %4554 = vst.msk [vmem:[%s7312_s22 + $0x68] sm:$0xff] %vm1228_vm1, %v4538_v62  ;;  %v4471_v21 = vpop.f32.mrf.mxu1 }
 0xf72   : > { %v4472_v55 = vadd.f32 %v4471_v21, %v4405_v40 }
 0xf74   : > { %v4491_v12 = vadd.f32 %v4472_v55, %v6716_v63 }
 0xf76   : > { %vm4507_vm4 = vcmp.ge.f32.partialorder %v4491_v12, 0.0  ;;  %v4523_v6 = vmul.f32 0.1, %v4491_v12 }
 0xf78   : > { %v4539_v45 = vsel %vm4507_vm4, %v4491_v12, %v4523_v6 }
 0xf79   : > { %4555 = vst.msk [vmem:[%s7312_s22 + $0x70] sm:$0xff] %vm1228_vm1, %v4539_v45  ;;  %v4474_v10 = vpop.f32.mrf.mxu1 }
 0xf7a   : > { %v4475_v32 = vadd.f32 %v4474_v10, %v4410_v57 }
 0xf7c   : > { %v4492_v63 = vadd.f32 %v4475_v32, %v6712_v52 }
 0xf7e   : > { %vm4508_vm5 = vcmp.ge.f32.partialorder %v4492_v63, 0.0  ;;  %v4524_v24 = vmul.f32 0.1, %v4492_v63 }
 0xf80   : > { %v4540_v1 = vsel %vm4508_vm5, %v4492_v63, %v4524_v24 }
 0xf81   : > { %4556 = vst.msk [vmem:[%s7312_s22 + $0x78] sm:$0xff] %vm1228_vm1, %v4540_v1 }
 0xf82   : > { %5237 = shalt.err (!%p5234_p8)
}
 0xf83   : > { %s5305_s18 = smov 128   ;;  %s5306_s29 = smov 8  }
 0xf84   : > { %4918 = dma.vmem_to_hbm [thread:$0]  (%p5435_p5), %s4571_s13, 2048, %s4573_s24, %s4558_s28, %s5305_s18, %s5305_s18, %s5306_s29  }
 0xf85 PF: > { %s7531_s22 = sld [smem:[#allocation24_spill]] }
 0xf86   : > { %s7532_s17 = sld [smem:[#allocation21_spill]] }
 0xf8b   : > { %p4955_p9 = scmp.ge.s32.totalorder %s7531_s22, 2 }
 0xf8c   : > { %s4587_s0 = sand.u32 1, %s7532_s17  }
 0xf8d   : > { %p4940_p10 = pnand %p4955_p9, %p5439_p6  ;;  %s4588_s19 = scalar_lea.sflag [#allocation4], %s4587_s0 }
 0xf8f   : > { %p4941_p11 = pneg %p4940_p10 }
 0xf91   : > { %5275 = dma.done.wait (%p4941_p11), %s4588_s19, 2048  }
 0xf92   : > { %5277 = vsyncadd (%p4941_p11), %s4588_s19, 4294965248  ;;  %s7534_s27 = sld [smem:[#allocation25_spill]] }
 0xf93   : > { %s7535_s24 = sld [smem:[#allocation22_spill]] }
 0xf94   : > { %s7536_s25 = sld [smem:[#allocation23_spill]] }
 0xf95   : > { %s7537_s26 = sld [smem:[#allocation26_spill]] }
 0xf98   : > { %p32_p12 = scmp.ge.s32.totalorder %s7534_s27, 4  }
 0xf9a   :  { %34 = sbr.rel (!%p32_p12) target bundleno = 15 (0xf), region = 154 }
 0xf9f   :  { %4594 = vsyncpa [#allocation3], 1 }
 0xfa0   :  { %4596 = vsyncpa [#allocation3 + $0x1], 1 }
 0xfa1   :  { %4597 = vsyncpa [#allocation8], 1 }
 0xfa2   :  { %4598 = vsyncpa [#allocation11], 1 }
 0xfa3   :  { %4599 = vsyncpa [#allocation4], 1 }
 0xfa4   :  { %4601 = vsyncpa [#allocation4 + $0x1], 1 }
 0xfa5   :  { %4602 = vsyncpa [#allocation5], 1 }
 0xfa6   :  { %4604 = vsyncpa [#allocation5 + $0x1], 1 }
 0xfa7   :  { %4605 = vsyncpa [#allocation6], 1 }
 0xfa8   :  { %4607 = vsyncpa [#allocation6 + $0x1], 1 }

</bundles_post_ra>
